<compile_context>
chip_gen: v7x
topology: tpu7x:2x2x1
jax: 0.10.0
libtpu: 0.0.40
codegen_flags: <defaults>
</compile_context>

<pallas_src>
import jax
import jax.numpy as jnp
from jax.experimental import pallas as pl
from jax.experimental.pallas import tpu as pltpu

LN_EPS = 1e-5  # PyTorch nn.LayerNorm default


# ---------------------------------------------------------------------------
# Shared math helpers (used by BOTH the Pallas kernels and the JAX reference so
# the numerics match exactly).
# ---------------------------------------------------------------------------

def _softmax_lastdim(x):
    m = jnp.max(x, axis=-1, keepdims=True)
    e = jnp.exp(x - m)
    return e / jnp.sum(e, axis=-1, keepdims=True)


def _gelu_tanh(x):
    # tanh-approximation of GELU (PyTorch nn.GELU default is exact erf).
    c = 0.7978845608028654  # sqrt(2/pi)
    return 0.5 * x * (1.0 + jnp.tanh(c * (x + 0.044715 * x * x * x)))


def _layernorm(y, gamma, beta):
    mean = jnp.mean(y, axis=-1, keepdims=True)
    c = y - mean
    var = jnp.mean(c * c, axis=-1, keepdims=True)
    return c * jax.lax.rsqrt(var + LN_EPS) * gamma + beta


def _linear(x, w, b):
    # Matmul compute dtype follows the weight dtype (bf16 on the hot path).
    return jnp.dot(x.astype(w.dtype), w, preferred_element_type=jnp.float32) + b


def _mha_block(x, wq, bq, wk, bk, wv, bv, wo, bo, gamma, beta):
    """x: (T, D) fp32.  Returns x + LayerNorm(MultiHeadAttention(x, x, x))."""
    cdt = wq.dtype
    xb = x.astype(cdt)
    num_heads, _, d_q = wq.shape
    scale = 1.0 / float(d_q) ** 0.5
    attn = jnp.zeros(x.shape, dtype=jnp.float32)
    for h in range(num_heads):                      # static unroll (6 heads)
        q = jnp.dot(xb, wq[h], preferred_element_type=jnp.float32) + bq[h]
        k = jnp.dot(xb, wk[h], preferred_element_type=jnp.float32) + bk[h]
        v = jnp.dot(xb, wv[h], preferred_element_type=jnp.float32) + bv[h]
        # Q @ K^T without materializing the transpose.
        s = jax.lax.dot_general(q.astype(cdt), k.astype(cdt),
                                (((1,), (1,)), ((), ())),
                                preferred_element_type=jnp.float32) * scale
        p = _softmax_lastdim(s)
        hv = jnp.dot(p.astype(cdt), v.astype(cdt),
                     preferred_element_type=jnp.float32)
        # concat-then-project == sum of per-head projections.
        attn = attn + jnp.dot(hv.astype(cdt), wo[h],
                              preferred_element_type=jnp.float32)
    attn = attn + bo
    return x + _layernorm(attn, gamma, beta)        # dropout = identity (eval)


def _ffn_block(x, w1, b1, w2, b2, gamma, beta):
    """x: (rows, D) fp32.  Returns x + LayerNorm(Linear(GELU(Linear(x))))."""
    cdt = w1.dtype
    xf = x.astype(jnp.float32)
    h = jnp.dot(x.astype(cdt), w1, preferred_element_type=jnp.float32) + b1
    h = _gelu_tanh(h)
    y = jnp.dot(h.astype(cdt), w2, preferred_element_type=jnp.float32) + b2
    return xf + _layernorm(y, gamma, beta)          # dropout = identity (eval)


# ---------------------------------------------------------------------------
# Positional encoding (faithful to the module: phase == pos for every feature).
# ---------------------------------------------------------------------------

def position_encoding(seq_len, dim_model):
    pos = jnp.arange(seq_len, dtype=jnp.float32).reshape(1, -1, 1)
    dim = jnp.arange(dim_model, dtype=jnp.float32).reshape(1, 1, -1)
    phase = pos / jnp.power(10000.0, jnp.floor_divide(dim, float(dim_model)))
    return jnp.where(dim.astype(jnp.int32) % 2 == 0, jnp.sin(phase), jnp.cos(phase))


# ---------------------------------------------------------------------------
# Pallas kernels
# ---------------------------------------------------------------------------

def add_pe_kernel(x_ref, pe_ref, o_ref):
    o_ref[...] = (x_ref[...] + pe_ref[...]).astype(o_ref.dtype)


def mha_residual_kernel(x_ref, wq_ref, bq_ref, wk_ref, bk_ref, wv_ref, bv_ref,
                        wo_ref, bo_ref, g_ref, bta_ref, o_ref):
    o_ref[0] = _mha_block(x_ref[0], wq_ref[...], bq_ref[...], wk_ref[...],
                          bk_ref[...], wv_ref[...], bv_ref[...], wo_ref[...],
                          bo_ref[...], g_ref[...], bta_ref[...]).astype(o_ref.dtype)


def ffn_residual_kernel(x_ref, w1_ref, b1_ref, w2_ref, b2_ref, g_ref, bta_ref,
                        o_ref):
    o_ref[...] = _ffn_block(x_ref[...], w1_ref[...], b1_ref[...], w2_ref[...],
                            b2_ref[...], g_ref[...], bta_ref[...]).astype(o_ref.dtype)


def final_linear_kernel(x_ref, w_ref, b_ref, o_ref):
    o_ref[...] = _linear(x_ref[...], w_ref[...], b_ref[...]).astype(o_ref.dtype)


# ---------------------------------------------------------------------------
# Wrappers (BlockSpecs / grids)
# ---------------------------------------------------------------------------

def _round_up(n, m):
    return ((n + m - 1) // m) * m


def add_position_encoding(x, pe):
    B, T, D = x.shape
    return pl.pallas_call(
        add_pe_kernel,
        out_shape=jax.ShapeDtypeStruct((B, T, D), x.dtype),
        grid_spec=pltpu.PrefetchScalarGridSpec(
            num_scalar_prefetch=0, grid=(B,),
            in_specs=[pl.BlockSpec((1, T, D), lambda b: (b, 0, 0)),
                      pl.BlockSpec((1, T, D), lambda b: (0, 0, 0))],
            out_specs=pl.BlockSpec((1, T, D), lambda b: (b, 0, 0))),
        compiler_params=pltpu.CompilerParams(dimension_semantics=("parallel",)),
    )(x, pe)


def mha_residual(x, a):
    B, T, D = x.shape
    H, _, dq = a['wq'].shape
    dk = a['wk'].shape[-1]
    cost = pl.CostEstimate(
        flops=2 * B * H * (T * D * (dq + 2 * dk) + T * T * (dq + dk) + T * dk * D)
              + 10 * B * T * D,
        transcendentals=B * H * T * T + B * T,
        bytes_accessed=2 * B * T * D * 4
                       + (H * D * (dq + 2 * dk) + H * dk * D) * 2 + 16 * D)
    return pl.pallas_call(
        mha_residual_kernel,
        out_shape=jax.ShapeDtypeStruct((B, T, D), x.dtype),
        grid_spec=pltpu.PrefetchScalarGridSpec(
            num_scalar_prefetch=0, grid=(B,),
            in_specs=[
                pl.BlockSpec((1, T, D), lambda b: (b, 0, 0)),   # x (residual + QKV input)
                pl.BlockSpec((H, D, dq), lambda b: (0, 0, 0)),  # Wq^T stacked (bf16)
                pl.BlockSpec((H, 1, dq), lambda b: (0, 0, 0)),  # bq
                pl.BlockSpec((H, D, dk), lambda b: (0, 0, 0)),  # Wk^T stacked (bf16)
                pl.BlockSpec((H, 1, dk), lambda b: (0, 0, 0)),  # bk
                pl.BlockSpec((H, D, dk), lambda b: (0, 0, 0)),  # Wv^T stacked (bf16)
                pl.BlockSpec((H, 1, dk), lambda b: (0, 0, 0)),  # bv
                pl.BlockSpec((H, dk, D), lambda b: (0, 0, 0)),  # Wo^T per-head (bf16)
                pl.BlockSpec((1, D), lambda b: (0, 0)),         # bo
                pl.BlockSpec((1, D), lambda b: (0, 0)),         # LN gamma
                pl.BlockSpec((1, D), lambda b: (0, 0)),         # LN beta
            ],
            out_specs=pl.BlockSpec((1, T, D), lambda b: (b, 0, 0))),
        compiler_params=pltpu.CompilerParams(
            dimension_semantics=("parallel",),
            vmem_limit_bytes=64 * 1024 * 1024),
        cost_estimate=cost,
    )(x, a['wq'], a['bq'], a['wk'], a['bk'], a['wv'], a['bv'],
      a['wo'], a['bo'], a['ln_g'], a['ln_b'])


def ffn_residual(x2d, f_, *, tile_rows=256):
    N, D = x2d.shape
    F = f_['w1'].shape[-1]
    tile = min(tile_rows, _round_up(N, 8))
    n_blocks = pl.cdiv(N, tile)
    n_pad = n_blocks * tile
    if n_pad != N:
        x2d = jnp.pad(x2d, ((0, n_pad - N), (0, 0)))
    cost = pl.CostEstimate(
        flops=4 * n_pad * D * F + 20 * n_pad * (D + F),
        transcendentals=n_pad * (F + 1),
        bytes_accessed=2 * n_pad * D * 4 + 4 * D * F + 8 * (D + F))
    out = pl.pallas_call(
        ffn_residual_kernel,
        out_shape=jax.ShapeDtypeStruct((n_pad, D), x2d.dtype),
        grid_spec=pltpu.PrefetchScalarGridSpec(
            num_scalar_prefetch=0, grid=(n_blocks,),
            in_specs=[
                pl.BlockSpec((tile, D), lambda i: (i, 0)),  # x rows
                pl.BlockSpec((D, F), lambda i: (0, 0)),     # W1^T (bf16, resident)
                pl.BlockSpec((1, F), lambda i: (0, 0)),     # b1
                pl.BlockSpec((F, D), lambda i: (0, 0)),     # W2^T (bf16, resident)
                pl.BlockSpec((1, D), lambda i: (0, 0)),     # b2
                pl.BlockSpec((1, D), lambda i: (0, 0)),     # LN gamma
                pl.BlockSpec((1, D), lambda i: (0, 0)),     # LN beta
            ],
            out_specs=pl.BlockSpec((tile, D), lambda i: (i, 0))),
        compiler_params=pltpu.CompilerParams(
            dimension_semantics=("parallel",),
            vmem_limit_bytes=64 * 1024 * 1024),
        cost_estimate=cost,
    )(x2d, f_['w1'], f_['b1'], f_['w2'], f_['b2'], f_['ln_g'], f_['ln_b'])
    return out[:N] if n_pad != N else out


def final_linear(x_last, fl):
    B, D = x_last.shape
    O = fl['w'].shape[-1]
    return pl.pallas_call(
        final_linear_kernel,
        out_shape=jax.ShapeDtypeStruct((B, O), jnp.float32),
        grid_spec=pltpu.PrefetchScalarGridSpec(
            num_scalar_prefetch=0, grid=(1,),
            in_specs=[pl.BlockSpec((B, D), lambda i: (0, 0)),
                      pl.BlockSpec((D, O), lambda i: (0, 0)),
                      pl.BlockSpec((1, O), lambda i: (0, 0))],
            out_specs=pl.BlockSpec((B, O), lambda i: (0, 0))),
    )(x_last, fl['w'], fl['b'])


def origin_forward(x, params):
    """origin.forward: positional encoding -> 4 encoder layers -> linear[:, -1, :]."""
    B, T, D = x.shape
    x = add_position_encoding(x, position_encoding(T, D))
    for lp in params['layers']:
        x = mha_residual(x, lp['attn'])
        x = ffn_residual(x.reshape(B * T, D), lp['ffn']).reshape(B, T, D)
    # linear(forward_x)[:, -1, :] == linear applied to the last timestep only.
    return final_linear(x[:, -1, :], params['final'])


# ---------------------------------------------------------------------------
# Pure-JAX reference (matmul dtype follows weight dtype, so the same function
# gives both the bf16-matched reference and the fp32 ground truth).
# ---------------------------------------------------------------------------

def transformer_reference(x, params):
    B, T, D = x.shape
    x = x + position_encoding(T, D)
    for lp in params['layers']:
        a, f_ = lp['attn'], lp['ffn']
        x = jnp.stack([
            _mha_block(x[b], a['wq'], a['bq'], a['wk'], a['bk'], a['wv'],
                       a['bv'], a['wo'], a['bo'], a['ln_g'], a['ln_b'])
            for b in range(B)])
        x = _ffn_block(x.reshape(B * T, D), f_['w1'], f_['b1'], f_['w2'],
                       f_['b2'], f_['ln_g'], f_['ln_b']).reshape(B, T, D)
    fl = params['final']
    return _linear(x[:, -1, :], fl['w'], fl['b'])


# ---------------------------------------------------------------------------
# Parameter construction (PyTorch Linear layout (out, in) -> pre-transposed).
# ---------------------------------------------------------------------------

def _linear_init(key, fan_in, fan_out):
    kw, kb = jax.random.split(key)
    bound = 1.0 / float(fan_in) ** 0.5
    w = jax.random.uniform(kw, (fan_out, fan_in), jnp.float32, -bound, bound)
    b = jax.random.uniform(kb, (fan_out,), jnp.float32, -bound, bound)
    return w, b


def init_params(key, *, num_layers, num_heads, dim_model, dim_ff, dim_q, dim_k,
                out_dim):
    layers = []
    for _ in range(num_layers):
        key, *hks = jax.random.split(key, 3 * num_heads + 1)
        wq, bq, wk, bk, wv, bv = [], [], [], [], [], []
        for h in range(num_heads):
            w, b = _linear_init(hks[3 * h + 0], dim_model, dim_q)
            wq.append(w.T); bq.append(b.reshape(1, dim_q))
            w, b = _linear_init(hks[3 * h + 1], dim_model, dim_k)
            wk.append(w.T); bk.append(b.reshape(1, dim_k))
            w, b = _linear_init(hks[3 * h + 2], dim_model, dim_k)
            wv.append(w.T); bv.append(b.reshape(1, dim_k))
        key, ko, kg1, kb1, k1, k2, kg2, kb2 = jax.random.split(key, 8)
        wo, bo = _linear_init(ko, num_heads * dim_k, dim_model)
        attn = dict(
            wq=jnp.stack(wq), bq=jnp.stack(bq),
            wk=jnp.stack(wk), bk=jnp.stack(bk),
            wv=jnp.stack(wv), bv=jnp.stack(bv),
            wo=wo.T.reshape(num_heads, dim_k, dim_model),   # per-head (dk, D) blocks
            bo=bo.reshape(1, dim_model),
            ln_g=1.0 + 0.05 * jax.random.normal(kg1, (1, dim_model), jnp.float32),
            ln_b=0.05 * jax.random.normal(kb1, (1, dim_model), jnp.float32))
        w1, b1 = _linear_init(k1, dim_model, dim_ff)
        w2, b2 = _linear_init(k2, dim_ff, dim_model)
        ffn = dict(
            w1=w1.T, b1=b1.reshape(1, dim_ff),
            w2=w2.T, b2=b2.reshape(1, dim_model),
            ln_g=1.0 + 0.05 * jax.random.normal(kg2, (1, dim_model), jnp.float32),
            ln_b=0.05 * jax.random.normal(kb2, (1, dim_model), jnp.float32))
        layers.append({'attn': attn, 'ffn': ffn})
    key, kf = jax.random.split(key)
    wf, bf = _linear_init(kf, dim_model, out_dim)
    return {'layers': layers, 'final': dict(w=wf.T, b=bf.reshape(1, out_dim))}


def cast_matmul_weights(params, dtype=jnp.bfloat16):
    """Pre-cast MXU operands ONCE (biases / LayerNorm params stay fp32)."""
    out_layers = []
    for lp in params['layers']:
        a, f_ = lp['attn'], lp['ffn']
        a = dict(a, wq=a['wq'].astype(dtype), wk=a['wk'].astype(dtype),
                 wv=a['wv'].astype(dtype), wo=a['wo'].astype(dtype))
        f_ = dict(f_, w1=f_['w1'].astype(dtype), w2=f_['w2'].astype(dtype))
        out_layers.append({'attn': a, 'ffn': f_})
    final = dict(params['final'], w=params['final']['w'].astype(dtype))
    return {'layers': out_layers, 'final': final}


# ---------------------------------------------------------------------------
# Demo
# ---------------------------------------------------------------------------

if __name__ == "__main__":
    # Small shapes consistent with origin(input_dim=128, hidden_dim=64, output_dim=16):
    # 4 layers, 6 heads, dim_q = dim_k = hidden//4 = 16, ffn dim = 64.
    num_layers, num_heads = 4, 6
    batch, seq = 2, 32
    input_dim, hidden_dim, output_dim = 128, 64, 16
    dim_q = dim_k = hidden_dim // 4
    dim_ff = hidden_dim

    key = jax.random.PRNGKey(0)
    kx, kp = jax.random.split(key)
    x = jax.random.normal(kx, (batch, seq, input_dim), dtype=jnp.float32)

    params_f32 = init_params(kp, num_layers=num_layers, num_heads=num_heads,
                             dim_model=input_dim, dim_ff=dim_ff, dim_q=dim_q,
                             dim_k=dim_k, out_dim=output_dim)
    params = cast_matmul_weights(params_f32)   # bf16 MXU operands, cast once

    fwd = jax.jit(origin_forward)
    out = fwd(x, params)
    jax.block_until_ready(out)
    assert out.shape == (batch, output_dim)

    # Tight check vs a pure-JAX reference with identical numerics (bf16 MXU path).
    ref = transformer_reference(x, params)
    assert jnp.allclose(out, ref, atol=2e-3, rtol=2e-3), (
        "mismatch vs bf16-matched reference: "
        f"max abs diff {float(jnp.max(jnp.abs(out - ref)))}")

    # Loose sanity check vs full-fp32 ground truth (bounds accumulated bf16 error).
    ref32 = transformer_reference(x, params_f32)
    assert float(jnp.max(jnp.abs(out - ref32))) < 0.5, "bf16 MXU error out of bounds"

    print("KERNEL_OK")
</pallas_src>

<mosaic_0001>
module attributes {stable_mosaic.version = 11 : i64} {
  func.func @add_pe_kernel(%arg0: i32, %arg1: memref<1x32x128xf32, #tpu.memory_space<vmem>>, %arg2: memref<1x32x128xf32, #tpu.memory_space<vmem>>, %arg3: memref<1x32x128xf32, #tpu.memory_space<vmem>>) attributes {dimension_semantics = [#tpu.dimension_semantics<parallel>], iteration_bounds = array<i64: 2>, scalar_prefetch = 0 : i64, scratch_operands = 0 : i64, tpu.core_type = #tpu.core_type<tc>, window_params = [{transform_indices = @transform_0, window_bounds = array<i64: 1, 32, 128>}, {pipeline_mode = #tpu.pipeline_mode<synchronous>, transform_indices = @transform_1, window_bounds = array<i64: 1, 32, 128>}, {transform_indices = @transform_2, window_bounds = array<i64: 1, 32, 128>}]} {
    %c0 = arith.constant 0 : index
    %c0_0 = arith.constant 0 : index
    %c0_1 = arith.constant 0 : index
    %0 = vector.load %arg1[%c0, %c0_0, %c0_1] : memref<1x32x128xf32, #tpu.memory_space<vmem>>, vector<1x32x128xf32>
    %c0_2 = arith.constant 0 : index
    %c0_3 = arith.constant 0 : index
    %c0_4 = arith.constant 0 : index
    %1 = vector.load %arg2[%c0_2, %c0_3, %c0_4] : memref<1x32x128xf32, #tpu.memory_space<vmem>>, vector<1x32x128xf32>
    %2 = arith.addf %0, %1 : vector<1x32x128xf32>
    %c0_5 = arith.constant 0 : index
    %c0_6 = arith.constant 0 : index
    %c0_7 = arith.constant 0 : index
    %3 = vector.load %arg3[%c0_5, %c0_6, %c0_7] : memref<1x32x128xf32, #tpu.memory_space<vmem>>, vector<1x32x128xf32>
    tpu.vector_store %arg3[%c0_5, %c0_6, %c0_7], %2 {strides = array<i32>} : memref<1x32x128xf32, #tpu.memory_space<vmem>>, vector<1x32x128xf32>,
    return
  }
  func.func @transform_0(%arg0: i32) -> (i32, i32, i32) {
    %c0_i32 = arith.constant 0 : i32
    %c0_i32_0 = arith.constant 0 : i32
    %c0_i32_1 = arith.constant 0 : i32
    return %arg0, %c0_i32, %c0_i32_0 : i32, i32, i32
  }
  func.func @transform_1(%arg0: i32) -> (i32, i32, i32) {
    %c0_i32 = arith.constant 0 : i32
    %c0_i32_0 = arith.constant 0 : i32
    %c0_i32_1 = arith.constant 0 : i32
    %c0_i32_2 = arith.constant 0 : i32
    return %c0_i32, %c0_i32_0, %c0_i32_1 : i32, i32, i32
  }
  func.func @transform_2(%arg0: i32) -> (i32, i32, i32) {
    %c0_i32 = arith.constant 0 : i32
    %c0_i32_0 = arith.constant 0 : i32
    %c0_i32_1 = arith.constant 0 : i32
    return %arg0, %c0_i32, %c0_i32_0 : i32, i32, i32
  }
}

module attributes {stable_mosaic.version = 11 : i64} {
  func.func @ffn_residual_kernel(%arg0: i32, %arg1: memref<64x128xf32, #tpu.memory_space<vmem>>, %arg2: memref<128x64xbf16, #tpu.memory_space<vmem>>, %arg3: memref<1x64xf32, #tpu.memory_space<vmem>>, %arg4: memref<64x128xbf16, #tpu.memory_space<vmem>>, %arg5: memref<1x128xf32, #tpu.memory_space<vmem>>, %arg6: memref<1x128xf32, #tpu.memory_space<vmem>>, %arg7: memref<1x128xf32, #tpu.memory_space<vmem>>, %arg8: memref<64x128xf32, #tpu.memory_space<vmem>>) attributes {dimension_semantics = [#tpu.dimension_semantics<parallel>], iteration_bounds = array<i64: 1>, scalar_prefetch = 0 : i64, scratch_operands = 0 : i64, tpu.core_type = #tpu.core_type<tc>, window_params = [{transform_indices = @transform_0, window_bounds = array<i64: 64, 128>}, {pipeline_mode = #tpu.pipeline_mode<synchronous>, transform_indices = @transform_1, window_bounds = array<i64: 128, 64>}, {pipeline_mode = #tpu.pipeline_mode<synchronous>, transform_indices = @transform_2, window_bounds = array<i64: 1, 64>}, {pipeline_mode = #tpu.pipeline_mode<synchronous>, transform_indices = @transform_3, window_bounds = array<i64: 64, 128>}, {pipeline_mode = #tpu.pipeline_mode<synchronous>, transform_indices = @transform_4, window_bounds = array<i64: 1, 128>}, {pipeline_mode = #tpu.pipeline_mode<synchronous>, transform_indices = @transform_5, window_bounds = array<i64: 1, 128>}, {pipeline_mode = #tpu.pipeline_mode<synchronous>, transform_indices = @transform_6, window_bounds = array<i64: 1, 128>}, {transform_indices = @transform_7, window_bounds = array<i64: 64, 128>}]} {
    %c0 = arith.constant 0 : index
    %c0_0 = arith.constant 0 : index
    %0 = vector.load %arg1[%c0, %c0_0] : memref<64x128xf32, #tpu.memory_space<vmem>>, vector<64x128xf32>
    %c0_1 = arith.constant 0 : index
    %c0_2 = arith.constant 0 : index
    %1 = vector.load %arg2[%c0_1, %c0_2] : memref<128x64xbf16, #tpu.memory_space<vmem>>, vector<128x64xbf16>
    %c0_3 = arith.constant 0 : index
    %c0_4 = arith.constant 0 : index
    %2 = vector.load %arg3[%c0_3, %c0_4] : memref<1x64xf32, #tpu.memory_space<vmem>>, vector<1x64xf32>
    %c0_5 = arith.constant 0 : index
    %c0_6 = arith.constant 0 : index
    %3 = vector.load %arg4[%c0_5, %c0_6] : memref<64x128xbf16, #tpu.memory_space<vmem>>, vector<64x128xbf16>
    %c0_7 = arith.constant 0 : index
    %c0_8 = arith.constant 0 : index
    %4 = vector.load %arg5[%c0_7, %c0_8] : memref<1x128xf32, #tpu.memory_space<vmem>>, vector<1x128xf32>
    %c0_9 = arith.constant 0 : index
    %c0_10 = arith.constant 0 : index
    %5 = vector.load %arg6[%c0_9, %c0_10] : memref<1x128xf32, #tpu.memory_space<vmem>>, vector<1x128xf32>
    %c0_11 = arith.constant 0 : index
    %c0_12 = arith.constant 0 : index
    %6 = vector.load %arg7[%c0_11, %c0_12] : memref<1x128xf32, #tpu.memory_space<vmem>>, vector<1x128xf32>
    %7 = arith.truncf %0 : vector<64x128xf32> to vector<64x128xbf16>
    %cst = arith.constant dense<0.000000e+00> : vector<64x64xf32>
    %8 = tpu.matmul %7, %1, %cst {dimension_numbers = #tpu.dot_dimension_numbers<[1], [0], [0], [1], [0, 0, 1, 1], [], []>} : vector<64x128xbf16>, vector<128x64xbf16>, vector<64x64xf32> -> vector<64x64xf32>
    %9 = vector.broadcast %2 : vector<1x64xf32> to vector<64x64xf32>
    %10 = arith.addf %8, %9 : vector<64x64xf32>
    %cst_13 = arith.constant 5.000000e-01 : f32
    %11 = vector.broadcast %cst_13 : f32 to vector<64x64xf32>
    %12 = arith.mulf %11, %10 : vector<64x64xf32>
    %cst_14 = arith.constant 4.471500e-02 : f32
    %13 = vector.broadcast %cst_14 : f32 to vector<64x64xf32>
    %14 = arith.mulf %13, %10 : vector<64x64xf32>
    %15 = arith.mulf %14, %10 : vector<64x64xf32>
    %16 = arith.mulf %15, %10 : vector<64x64xf32>
    %17 = arith.addf %10, %16 : vector<64x64xf32>
    %cst_15 = arith.constant 0.797884583 : f32
    %18 = vector.broadcast %cst_15 : f32 to vector<64x64xf32>
    %19 = arith.mulf %18, %17 : vector<64x64xf32>
    %20 = math.tanh %19 : vector<64x64xf32>
    %cst_16 = arith.constant 1.000000e+00 : f32
    %21 = vector.broadcast %cst_16 : f32 to vector<64x64xf32>
    %22 = arith.addf %21, %20 : vector<64x64xf32>
    %23 = arith.mulf %12, %22 : vector<64x64xf32>
    %24 = arith.truncf %23 : vector<64x64xf32> to vector<64x64xbf16>
    %cst_17 = arith.constant dense<0.000000e+00> : vector<64x128xf32>
    %25 = tpu.matmul %24, %3, %cst_17 {dimension_numbers = #tpu.dot_dimension_numbers<[1], [0], [0], [1], [0, 0, 1, 1], [], []>} : vector<64x64xbf16>, vector<64x128xbf16>, vector<64x128xf32> -> vector<64x128xf32>
    %26 = vector.broadcast %4 : vector<1x128xf32> to vector<64x128xf32>
    %27 = arith.addf %25, %26 : vector<64x128xf32>
    %cst_18 = arith.constant dense<0.000000e+00> : vector<64xf32>
    %28 = vector.multi_reduction <add>, %27, %cst_18 [1] : vector<64x128xf32> to vector<64xf32>
    %29 = vector.shape_cast %28 : vector<64xf32> to vector<64x1xf32>
    %cst_19 = arith.constant 1.280000e+02 : f32
    %30 = vector.broadcast %cst_19 : f32 to vector<64x1xf32>
    %31 = arith.divf %29, %30 : vector<64x1xf32>
    %32 = vector.broadcast %31 : vector<64x1xf32> to vector<64x128xf32>
    %33 = arith.subf %27, %32 : vector<64x128xf32>
    %34 = arith.mulf %33, %33 : vector<64x128xf32>
    %cst_20 = arith.constant dense<0.000000e+00> : vector<64xf32>
    %35 = vector.multi_reduction <add>, %34, %cst_20 [1] : vector<64x128xf32> to vector<64xf32>
    %36 = vector.shape_cast %35 : vector<64xf32> to vector<64x1xf32>
    %cst_21 = arith.constant 1.280000e+02 : f32
    %37 = vector.broadcast %cst_21 : f32 to vector<64x1xf32>
    %38 = arith.divf %36, %37 : vector<64x1xf32>
    %cst_22 = arith.constant 9.99999974E-6 : f32
    %39 = vector.broadcast %cst_22 : f32 to vector<64x1xf32>
    %40 = arith.addf %38, %39 : vector<64x1xf32>
    %41 = math.rsqrt %40 : vector<64x1xf32>
    %42 = vector.broadcast %41 : vector<64x1xf32> to vector<64x128xf32>
    %43 = arith.mulf %33, %42 : vector<64x128xf32>
    %44 = vector.broadcast %5 : vector<1x128xf32> to vector<64x128xf32>
    %45 = arith.mulf %43, %44 : vector<64x128xf32>
    %46 = vector.broadcast %6 : vector<1x128xf32> to vector<64x128xf32>
    %47 = arith.addf %45, %46 : vector<64x128xf32>
    %48 = arith.addf %0, %47 : vector<64x128xf32>
    %c0_23 = arith.constant 0 : index
    %c0_24 = arith.constant 0 : index
    %49 = vector.load %arg8[%c0_23, %c0_24] : memref<64x128xf32, #tpu.memory_space<vmem>>, vector<64x128xf32>
    tpu.vector_store %arg8[%c0_23, %c0_24], %48 {strides = array<i32>} : memref<64x128xf32, #tpu.memory_space<vmem>>, vector<64x128xf32>,
    return
  }
  func.func @transform_0(%arg0: i32) -> (i32, i32) {
    %c0_i32 = arith.constant 0 : i32
    %c0_i32_0 = arith.constant 0 : i32
    return %arg0, %c0_i32 : i32, i32
  }
  func.func @transform_1(%arg0: i32) -> (i32, i32) {
    %c0_i32 = arith.constant 0 : i32
    %c0_i32_0 = arith.constant 0 : i32
    %c0_i32_1 = arith.constant 0 : i32
    return %c0_i32, %c0_i32_0 : i32, i32
  }
  func.func @transform_2(%arg0: i32) -> (i32, i32) {
    %c0_i32 = arith.constant 0 : i32
    %c0_i32_0 = arith.constant 0 : i32
    %c0_i32_1 = arith.constant 0 : i32
    return %c0_i32, %c0_i32_0 : i32, i32
  }
  func.func @transform_3(%arg0: i32) -> (i32, i32) {
    %c0_i32 = arith.constant 0 : i32
    %c0_i32_0 = arith.constant 0 : i32
    %c0_i32_1 = arith.constant 0 : i32
    return %c0_i32, %c0_i32_0 : i32, i32
  }
  func.func @transform_4(%arg0: i32) -> (i32, i32) {
    %c0_i32 = arith.constant 0 : i32
    %c0_i32_0 = arith.constant 0 : i32
    %c0_i32_1 = arith.constant 0 : i32
    return %c0_i32, %c0_i32_0 : i32, i32
  }
  func.func @transform_5(%arg0: i32) -> (i32, i32) {
    %c0_i32 = arith.constant 0 : i32
    %c0_i32_0 = arith.constant 0 : i32
    %c0_i32_1 = arith.constant 0 : i32
    return %c0_i32, %c0_i32_0 : i32, i32
  }
  func.func @transform_6(%arg0: i32) -> (i32, i32) {
    %c0_i32 = arith.constant 0 : i32
    %c0_i32_0 = arith.constant 0 : i32
    %c0_i32_1 = arith.constant 0 : i32
    return %c0_i32, %c0_i32_0 : i32, i32
  }
  func.func @transform_7(%arg0: i32) -> (i32, i32) {
    %c0_i32 = arith.constant 0 : i32
    %c0_i32_0 = arith.constant 0 : i32
    return %arg0, %c0_i32 : i32, i32
  }
}

module attributes {stable_mosaic.version = 11 : i64} {
  func.func @mha_residual_kernel(%arg0: i32, %arg1: memref<1x32x128xf32, #tpu.memory_space<vmem>>, %arg2: memref<6x128x16xbf16, #tpu.memory_space<vmem>>, %arg3: memref<6x1x16xf32, #tpu.memory_space<vmem>>, %arg4: memref<6x128x16xbf16, #tpu.memory_space<vmem>>, %arg5: memref<6x1x16xf32, #tpu.memory_space<vmem>>, %arg6: memref<6x128x16xbf16, #tpu.memory_space<vmem>>, %arg7: memref<6x1x16xf32, #tpu.memory_space<vmem>>, %arg8: memref<6x16x128xbf16, #tpu.memory_space<vmem>>, %arg9: memref<1x128xf32, #tpu.memory_space<vmem>>, %arg10: memref<1x128xf32, #tpu.memory_space<vmem>>, %arg11: memref<1x128xf32, #tpu.memory_space<vmem>>, %arg12: memref<1x32x128xf32, #tpu.memory_space<vmem>>) attributes {dimension_semantics = [#tpu.dimension_semantics<parallel>], iteration_bounds = array<i64: 2>, scalar_prefetch = 0 : i64, scratch_operands = 0 : i64, tpu.core_type = #tpu.core_type<tc>, window_params = [{transform_indices = @transform_0, window_bounds = array<i64: 1, 32, 128>}, {pipeline_mode = #tpu.pipeline_mode<synchronous>, transform_indices = @transform_1, window_bounds = array<i64: 6, 128, 16>}, {pipeline_mode = #tpu.pipeline_mode<synchronous>, transform_indices = @transform_2, window_bounds = array<i64: 6, 1, 16>}, {pipeline_mode = #tpu.pipeline_mode<synchronous>, transform_indices = @transform_3, window_bounds = array<i64: 6, 128, 16>}, {pipeline_mode = #tpu.pipeline_mode<synchronous>, transform_indices = @transform_4, window_bounds = array<i64: 6, 1, 16>}, {pipeline_mode = #tpu.pipeline_mode<synchronous>, transform_indices = @transform_5, window_bounds = array<i64: 6, 128, 16>}, {pipeline_mode = #tpu.pipeline_mode<synchronous>, transform_indices = @transform_6, window_bounds = array<i64: 6, 1, 16>}, {pipeline_mode = #tpu.pipeline_mode<synchronous>, transform_indices = @transform_7, window_bounds = array<i64: 6, 16, 128>}, {pipeline_mode = #tpu.pipeline_mode<synchronous>, transform_indices = @transform_8, window_bounds = array<i64: 1, 128>}, {pipeline_mode = #tpu.pipeline_mode<synchronous>, transform_indices = @transform_9, window_bounds = array<i64: 1, 128>}, {pipeline_mode = #tpu.pipeline_mode<synchronous>, transform_indices = @transform_10, window_bounds = array<i64: 1, 128>}, {transform_indices = @transform_11, window_bounds = array<i64: 1, 32, 128>}]} {
    %c0 = arith.constant 0 : index
    %c0_0 = arith.constant 0 : index
    %c0_1 = arith.constant 0 : index
    %0 = vector.load %arg1[%c0, %c0_0, %c0_1] : memref<1x32x128xf32, #tpu.memory_space<vmem>>, vector<1x32x128xf32>
    %1 = vector.shape_cast %0 : vector<1x32x128xf32> to vector<32x128xf32>
    %c0_2 = arith.constant 0 : index
    %c0_3 = arith.constant 0 : index
    %c0_4 = arith.constant 0 : index
    %2 = vector.load %arg2[%c0_2, %c0_3, %c0_4] : memref<6x128x16xbf16, #tpu.memory_space<vmem>>, vector<6x128x16xbf16>
    %c0_5 = arith.constant 0 : index
    %c0_6 = arith.constant 0 : index
    %c0_7 = arith.constant 0 : index
    %3 = vector.load %arg3[%c0_5, %c0_6, %c0_7] : memref<6x1x16xf32, #tpu.memory_space<vmem>>, vector<6x1x16xf32>
    %c0_8 = arith.constant 0 : index
    %c0_9 = arith.constant 0 : index
    %c0_10 = arith.constant 0 : index
    %4 = vector.load %arg4[%c0_8, %c0_9, %c0_10] : memref<6x128x16xbf16, #tpu.memory_space<vmem>>, vector<6x128x16xbf16>
    %c0_11 = arith.constant 0 : index
    %c0_12 = arith.constant 0 : index
    %c0_13 = arith.constant 0 : index
    %5 = vector.load %arg5[%c0_11, %c0_12, %c0_13] : memref<6x1x16xf32, #tpu.memory_space<vmem>>, vector<6x1x16xf32>
    %c0_14 = arith.constant 0 : index
    %c0_15 = arith.constant 0 : index
    %c0_16 = arith.constant 0 : index
    %6 = vector.load %arg6[%c0_14, %c0_15, %c0_16] : memref<6x128x16xbf16, #tpu.memory_space<vmem>>, vector<6x128x16xbf16>
    %c0_17 = arith.constant 0 : index
    %c0_18 = arith.constant 0 : index
    %c0_19 = arith.constant 0 : index
    %7 = vector.load %arg7[%c0_17, %c0_18, %c0_19] : memref<6x1x16xf32, #tpu.memory_space<vmem>>, vector<6x1x16xf32>
    %c0_20 = arith.constant 0 : index
    %c0_21 = arith.constant 0 : index
    %c0_22 = arith.constant 0 : index
    %8 = vector.load %arg8[%c0_20, %c0_21, %c0_22] : memref<6x16x128xbf16, #tpu.memory_space<vmem>>, vector<6x16x128xbf16>
    %c0_23 = arith.constant 0 : index
    %c0_24 = arith.constant 0 : index
    %9 = vector.load %arg9[%c0_23, %c0_24] : memref<1x128xf32, #tpu.memory_space<vmem>>, vector<1x128xf32>
    %c0_25 = arith.constant 0 : index
    %c0_26 = arith.constant 0 : index
    %10 = vector.load %arg10[%c0_25, %c0_26] : memref<1x128xf32, #tpu.memory_space<vmem>>, vector<1x128xf32>
    %c0_27 = arith.constant 0 : index
    %c0_28 = arith.constant 0 : index
    %11 = vector.load %arg11[%c0_27, %c0_28] : memref<1x128xf32, #tpu.memory_space<vmem>>, vector<1x128xf32>
    %12 = arith.truncf %1 : vector<32x128xf32> to vector<32x128xbf16>
    %cst = arith.constant 0.000000e+00 : f32
    %13 = vector.broadcast %cst : f32 to vector<32x128xf32>
    %14 = vector.extract_strided_slice %2 {offsets = [0, 0, 0], sizes = [1, 128, 16], strides = [1, 1, 1]} : vector<6x128x16xbf16> to vector<1x128x16xbf16>
    %15 = vector.shape_cast %14 : vector<1x128x16xbf16> to vector<128x16xbf16>
    %cst_29 = arith.constant dense<0.000000e+00> : vector<32x16xf32>
    %16 = tpu.matmul %12, %15, %cst_29 {dimension_numbers = #tpu.dot_dimension_numbers<[1], [0], [0], [1], [0, 0, 1, 1], [], []>} : vector<32x128xbf16>, vector<128x16xbf16>, vector<32x16xf32> -> vector<32x16xf32>
    %17 = vector.extract_strided_slice %3 {offsets = [0, 0, 0], sizes = [1, 1, 16], strides = [1, 1, 1]} : vector<6x1x16xf32> to vector<1x1x16xf32>
    %18 = vector.shape_cast %17 : vector<1x1x16xf32> to vector<1x16xf32>
    %19 = vector.broadcast %18 : vector<1x16xf32> to vector<32x16xf32>
    %20 = arith.addf %16, %19 : vector<32x16xf32>
    %21 = vector.extract_strided_slice %4 {offsets = [0, 0, 0], sizes = [1, 128, 16], strides = [1, 1, 1]} : vector<6x128x16xbf16> to vector<1x128x16xbf16>
    %22 = vector.shape_cast %21 : vector<1x128x16xbf16> to vector<128x16xbf16>
    %cst_30 = arith.constant dense<0.000000e+00> : vector<32x16xf32>
    %23 = tpu.matmul %12, %22, %cst_30 {dimension_numbers = #tpu.dot_dimension_numbers<[1], [0], [0], [1], [0, 0, 1, 1], [], []>} : vector<32x128xbf16>, vector<128x16xbf16>, vector<32x16xf32> -> vector<32x16xf32>
    %24 = vector.extract_strided_slice %5 {offsets = [0, 0, 0], sizes = [1, 1, 16], strides = [1, 1, 1]} : vector<6x1x16xf32> to vector<1x1x16xf32>
    %25 = vector.shape_cast %24 : vector<1x1x16xf32> to vector<1x16xf32>
    %26 = vector.broadcast %25 : vector<1x16xf32> to vector<32x16xf32>
    %27 = arith.addf %23, %26 : vector<32x16xf32>
    %28 = vector.extract_strided_slice %6 {offsets = [0, 0, 0], sizes = [1, 128, 16], strides = [1, 1, 1]} : vector<6x128x16xbf16> to vector<1x128x16xbf16>
    %29 = vector.shape_cast %28 : vector<1x128x16xbf16> to vector<128x16xbf16>
    %cst_31 = arith.constant dense<0.000000e+00> : vector<32x16xf32>
    %30 = tpu.matmul %12, %29, %cst_31 {dimension_numbers = #tpu.dot_dimension_numbers<[1], [0], [0], [1], [0, 0, 1, 1], [], []>} : vector<32x128xbf16>, vector<128x16xbf16>, vector<32x16xf32> -> vector<32x16xf32>
    %31 = vector.extract_strided_slice %7 {offsets = [0, 0, 0], sizes = [1, 1, 16], strides = [1, 1, 1]} : vector<6x1x16xf32> to vector<1x1x16xf32>
    %32 = vector.shape_cast %31 : vector<1x1x16xf32> to vector<1x16xf32>
    %33 = vector.broadcast %32 : vector<1x16xf32> to vector<32x16xf32>
    %34 = arith.addf %30, %33 : vector<32x16xf32>
    %35 = arith.truncf %20 : vector<32x16xf32> to vector<32x16xbf16>
    %36 = arith.truncf %27 : vector<32x16xf32> to vector<32x16xbf16>
    %cst_32 = arith.constant dense<0.000000e+00> : vector<32x32xf32>
    %37 = tpu.matmul %35, %36, %cst_32 {dimension_numbers = #tpu.dot_dimension_numbers<[1], [1], [0], [0], [0, 0, 1, 0], [], []>} : vector<32x16xbf16>, vector<32x16xbf16>, vector<32x32xf32> -> vector<32x32xf32>
    %cst_33 = arith.constant 2.500000e-01 : f32
    %38 = vector.broadcast %cst_33 : f32 to vector<32x32xf32>
    %39 = arith.mulf %37, %38 : vector<32x32xf32>
    %cst_34 = arith.constant dense<0xFF800000> : vector<32xf32>
    %40 = vector.multi_reduction <maximumf>, %39, %cst_34 [1] : vector<32x32xf32> to vector<32xf32>
    %41 = vector.shape_cast %40 : vector<32xf32> to vector<32x1xf32>
    %42 = vector.broadcast %41 : vector<32x1xf32> to vector<32x32xf32>
    %43 = arith.subf %39, %42 : vector<32x32xf32>
    %44 = math.exp %43 : vector<32x32xf32>
    %cst_35 = arith.constant dense<0.000000e+00> : vector<32xf32>
    %45 = vector.multi_reduction <add>, %44, %cst_35 [1] : vector<32x32xf32> to vector<32xf32>
    %46 = vector.shape_cast %45 : vector<32xf32> to vector<32x1xf32>
    %47 = vector.broadcast %46 : vector<32x1xf32> to vector<32x32xf32>
    %48 = arith.divf %44, %47 : vector<32x32xf32>
    %49 = arith.truncf %48 : vector<32x32xf32> to vector<32x32xbf16>
    %50 = arith.truncf %34 : vector<32x16xf32> to vector<32x16xbf16>
    %cst_36 = arith.constant dense<0.000000e+00> : vector<32x16xf32>
    %51 = tpu.matmul %49, %50, %cst_36 {dimension_numbers = #tpu.dot_dimension_numbers<[1], [0], [0], [1], [0, 0, 1, 1], [], []>} : vector<32x32xbf16>, vector<32x16xbf16>, vector<32x16xf32> -> vector<32x16xf32>
    %52 = arith.truncf %51 : vector<32x16xf32> to vector<32x16xbf16>
    %53 = vector.extract_strided_slice %8 {offsets = [0, 0, 0], sizes = [1, 16, 128], strides = [1, 1, 1]} : vector<6x16x128xbf16> to vector<1x16x128xbf16>
    %54 = vector.shape_cast %53 : vector<1x16x128xbf16> to vector<16x128xbf16>
    %cst_37 = arith.constant dense<0.000000e+00> : vector<32x128xf32>
    %55 = tpu.matmul %52, %54, %cst_37 {dimension_numbers = #tpu.dot_dimension_numbers<[1], [0], [0], [1], [0, 0, 1, 1], [], []>} : vector<32x16xbf16>, vector<16x128xbf16>, vector<32x128xf32> -> vector<32x128xf32>
    %56 = arith.addf %13, %55 : vector<32x128xf32>
    %57 = vector.extract_strided_slice %2 {offsets = [1, 0, 0], sizes = [1, 128, 16], strides = [1, 1, 1]} : vector<6x128x16xbf16> to vector<1x128x16xbf16>
    %58 = vector.shape_cast %57 : vector<1x128x16xbf16> to vector<128x16xbf16>
    %cst_38 = arith.constant dense<0.000000e+00> : vector<32x16xf32>
    %59 = tpu.matmul %12, %58, %cst_38 {dimension_numbers = #tpu.dot_dimension_numbers<[1], [0], [0], [1], [0, 0, 1, 1], [], []>} : vector<32x128xbf16>, vector<128x16xbf16>, vector<32x16xf32> -> vector<32x16xf32>
    %60 = vector.extract_strided_slice %3 {offsets = [1, 0, 0], sizes = [1, 1, 16], strides = [1, 1, 1]} : vector<6x1x16xf32> to vector<1x1x16xf32>
    %61 = vector.shape_cast %60 : vector<1x1x16xf32> to vector<1x16xf32>
    %62 = vector.broadcast %61 : vector<1x16xf32> to vector<32x16xf32>
    %63 = arith.addf %59, %62 : vector<32x16xf32>
    %64 = vector.extract_strided_slice %4 {offsets = [1, 0, 0], sizes = [1, 128, 16], strides = [1, 1, 1]} : vector<6x128x16xbf16> to vector<1x128x16xbf16>
    %65 = vector.shape_cast %64 : vector<1x128x16xbf16> to vector<128x16xbf16>
    %cst_39 = arith.constant dense<0.000000e+00> : vector<32x16xf32>
    %66 = tpu.matmul %12, %65, %cst_39 {dimension_numbers = #tpu.dot_dimension_numbers<[1], [0], [0], [1], [0, 0, 1, 1], [], []>} : vector<32x128xbf16>, vector<128x16xbf16>, vector<32x16xf32> -> vector<32x16xf32>
    %67 = vector.extract_strided_slice %5 {offsets = [1, 0, 0], sizes = [1, 1, 16], strides = [1, 1, 1]} : vector<6x1x16xf32> to vector<1x1x16xf32>
    %68 = vector.shape_cast %67 : vector<1x1x16xf32> to vector<1x16xf32>
    %69 = vector.broadcast %68 : vector<1x16xf32> to vector<32x16xf32>
    %70 = arith.addf %66, %69 : vector<32x16xf32>
    %71 = vector.extract_strided_slice %6 {offsets = [1, 0, 0], sizes = [1, 128, 16], strides = [1, 1, 1]} : vector<6x128x16xbf16> to vector<1x128x16xbf16>
    %72 = vector.shape_cast %71 : vector<1x128x16xbf16> to vector<128x16xbf16>
    %cst_40 = arith.constant dense<0.000000e+00> : vector<32x16xf32>
    %73 = tpu.matmul %12, %72, %cst_40 {dimension_numbers = #tpu.dot_dimension_numbers<[1], [0], [0], [1], [0, 0, 1, 1], [], []>} : vector<32x128xbf16>, vector<128x16xbf16>, vector<32x16xf32> -> vector<32x16xf32>
    %74 = vector.extract_strided_slice %7 {offsets = [1, 0, 0], sizes = [1, 1, 16], strides = [1, 1, 1]} : vector<6x1x16xf32> to vector<1x1x16xf32>
    %75 = vector.shape_cast %74 : vector<1x1x16xf32> to vector<1x16xf32>
    %76 = vector.broadcast %75 : vector<1x16xf32> to vector<32x16xf32>
    %77 = arith.addf %73, %76 : vector<32x16xf32>
    %78 = arith.truncf %63 : vector<32x16xf32> to vector<32x16xbf16>
    %79 = arith.truncf %70 : vector<32x16xf32> to vector<32x16xbf16>
    %cst_41 = arith.constant dense<0.000000e+00> : vector<32x32xf32>
    %80 = tpu.matmul %78, %79, %cst_41 {dimension_numbers = #tpu.dot_dimension_numbers<[1], [1], [0], [0], [0, 0, 1, 0], [], []>} : vector<32x16xbf16>, vector<32x16xbf16>, vector<32x32xf32> -> vector<32x32xf32>
    %cst_42 = arith.constant 2.500000e-01 : f32
    %81 = vector.broadcast %cst_42 : f32 to vector<32x32xf32>
    %82 = arith.mulf %80, %81 : vector<32x32xf32>
    %cst_43 = arith.constant dense<0xFF800000> : vector<32xf32>
    %83 = vector.multi_reduction <maximumf>, %82, %cst_43 [1] : vector<32x32xf32> to vector<32xf32>
    %84 = vector.shape_cast %83 : vector<32xf32> to vector<32x1xf32>
    %85 = vector.broadcast %84 : vector<32x1xf32> to vector<32x32xf32>
    %86 = arith.subf %82, %85 : vector<32x32xf32>
    %87 = math.exp %86 : vector<32x32xf32>
    %cst_44 = arith.constant dense<0.000000e+00> : vector<32xf32>
    %88 = vector.multi_reduction <add>, %87, %cst_44 [1] : vector<32x32xf32> to vector<32xf32>
    %89 = vector.shape_cast %88 : vector<32xf32> to vector<32x1xf32>
    %90 = vector.broadcast %89 : vector<32x1xf32> to vector<32x32xf32>
    %91 = arith.divf %87, %90 : vector<32x32xf32>
    %92 = arith.truncf %91 : vector<32x32xf32> to vector<32x32xbf16>
    %93 = arith.truncf %77 : vector<32x16xf32> to vector<32x16xbf16>
    %cst_45 = arith.constant dense<0.000000e+00> : vector<32x16xf32>
    %94 = tpu.matmul %92, %93, %cst_45 {dimension_numbers = #tpu.dot_dimension_numbers<[1], [0], [0], [1], [0, 0, 1, 1], [], []>} : vector<32x32xbf16>, vector<32x16xbf16>, vector<32x16xf32> -> vector<32x16xf32>
    %95 = arith.truncf %94 : vector<32x16xf32> to vector<32x16xbf16>
    %96 = vector.extract_strided_slice %8 {offsets = [1, 0, 0], sizes = [1, 16, 128], strides = [1, 1, 1]} : vector<6x16x128xbf16> to vector<1x16x128xbf16>
    %97 = vector.shape_cast %96 : vector<1x16x128xbf16> to vector<16x128xbf16>
    %cst_46 = arith.constant dense<0.000000e+00> : vector<32x128xf32>
    %98 = tpu.matmul %95, %97, %cst_46 {dimension_numbers = #tpu.dot_dimension_numbers<[1], [0], [0], [1], [0, 0, 1, 1], [], []>} : vector<32x16xbf16>, vector<16x128xbf16>, vector<32x128xf32> -> vector<32x128xf32>
    %99 = arith.addf %56, %98 : vector<32x128xf32>
    %100 = vector.extract_strided_slice %2 {offsets = [2, 0, 0], sizes = [1, 128, 16], strides = [1, 1, 1]} : vector<6x128x16xbf16> to vector<1x128x16xbf16>
    %101 = vector.shape_cast %100 : vector<1x128x16xbf16> to vector<128x16xbf16>
    %cst_47 = arith.constant dense<0.000000e+00> : vector<32x16xf32>
    %102 = tpu.matmul %12, %101, %cst_47 {dimension_numbers = #tpu.dot_dimension_numbers<[1], [0], [0], [1], [0, 0, 1, 1], [], []>} : vector<32x128xbf16>, vector<128x16xbf16>, vector<32x16xf32> -> vector<32x16xf32>
    %103 = vector.extract_strided_slice %3 {offsets = [2, 0, 0], sizes = [1, 1, 16], strides = [1, 1, 1]} : vector<6x1x16xf32> to vector<1x1x16xf32>
    %104 = vector.shape_cast %103 : vector<1x1x16xf32> to vector<1x16xf32>
    %105 = vector.broadcast %104 : vector<1x16xf32> to vector<32x16xf32>
    %106 = arith.addf %102, %105 : vector<32x16xf32>
    %107 = vector.extract_strided_slice %4 {offsets = [2, 0, 0], sizes = [1, 128, 16], strides = [1, 1, 1]} : vector<6x128x16xbf16> to vector<1x128x16xbf16>
    %108 = vector.shape_cast %107 : vector<1x128x16xbf16> to vector<128x16xbf16>
    %cst_48 = arith.constant dense<0.000000e+00> : vector<32x16xf32>
    %109 = tpu.matmul %12, %108, %cst_48 {dimension_numbers = #tpu.dot_dimension_numbers<[1], [0], [0], [1], [0, 0, 1, 1], [], []>} : vector<32x128xbf16>, vector<128x16xbf16>, vector<32x16xf32> -> vector<32x16xf32>
    %110 = vector.extract_strided_slice %5 {offsets = [2, 0, 0], sizes = [1, 1, 16], strides = [1, 1, 1]} : vector<6x1x16xf32> to vector<1x1x16xf32>
    %111 = vector.shape_cast %110 : vector<1x1x16xf32> to vector<1x16xf32>
    %112 = vector.broadcast %111 : vector<1x16xf32> to vector<32x16xf32>
    %113 = arith.addf %109, %112 : vector<32x16xf32>
    %114 = vector.extract_strided_slice %6 {offsets = [2, 0, 0], sizes = [1, 128, 16], strides = [1, 1, 1]} : vector<6x128x16xbf16> to vector<1x128x16xbf16>
    %115 = vector.shape_cast %114 : vector<1x128x16xbf16> to vector<128x16xbf16>
    %cst_49 = arith.constant dense<0.000000e+00> : vector<32x16xf32>
    %116 = tpu.matmul %12, %115, %cst_49 {dimension_numbers = #tpu.dot_dimension_numbers<[1], [0], [0], [1], [0, 0, 1, 1], [], []>} : vector<32x128xbf16>, vector<128x16xbf16>, vector<32x16xf32> -> vector<32x16xf32>
    %117 = vector.extract_strided_slice %7 {offsets = [2, 0, 0], sizes = [1, 1, 16], strides = [1, 1, 1]} : vector<6x1x16xf32> to vector<1x1x16xf32>
    %118 = vector.shape_cast %117 : vector<1x1x16xf32> to vector<1x16xf32>
    %119 = vector.broadcast %118 : vector<1x16xf32> to vector<32x16xf32>
    %120 = arith.addf %116, %119 : vector<32x16xf32>
    %121 = arith.truncf %106 : vector<32x16xf32> to vector<32x16xbf16>
    %122 = arith.truncf %113 : vector<32x16xf32> to vector<32x16xbf16>
    %cst_50 = arith.constant dense<0.000000e+00> : vector<32x32xf32>
    %123 = tpu.matmul %121, %122, %cst_50 {dimension_numbers = #tpu.dot_dimension_numbers<[1], [1], [0], [0], [0, 0, 1, 0], [], []>} : vector<32x16xbf16>, vector<32x16xbf16>, vector<32x32xf32> -> vector<32x32xf32>
    %cst_51 = arith.constant 2.500000e-01 : f32
    %124 = vector.broadcast %cst_51 : f32 to vector<32x32xf32>
    %125 = arith.mulf %123, %124 : vector<32x32xf32>
    %cst_52 = arith.constant dense<0xFF800000> : vector<32xf32>
    %126 = vector.multi_reduction <maximumf>, %125, %cst_52 [1] : vector<32x32xf32> to vector<32xf32>
    %127 = vector.shape_cast %126 : vector<32xf32> to vector<32x1xf32>
    %128 = vector.broadcast %127 : vector<32x1xf32> to vector<32x32xf32>
    %129 = arith.subf %125, %128 : vector<32x32xf32>
    %130 = math.exp %129 : vector<32x32xf32>
    %cst_53 = arith.constant dense<0.000000e+00> : vector<32xf32>
    %131 = vector.multi_reduction <add>, %130, %cst_53 [1] : vector<32x32xf32> to vector<32xf32>
    %132 = vector.shape_cast %131 : vector<32xf32> to vector<32x1xf32>
    %133 = vector.broadcast %132 : vector<32x1xf32> to vector<32x32xf32>
    %134 = arith.divf %130, %133 : vector<32x32xf32>
    %135 = arith.truncf %134 : vector<32x32xf32> to vector<32x32xbf16>
    %136 = arith.truncf %120 : vector<32x16xf32> to vector<32x16xbf16>
    %cst_54 = arith.constant dense<0.000000e+00> : vector<32x16xf32>
    %137 = tpu.matmul %135, %136, %cst_54 {dimension_numbers = #tpu.dot_dimension_numbers<[1], [0], [0], [1], [0, 0, 1, 1], [], []>} : vector<32x32xbf16>, vector<32x16xbf16>, vector<32x16xf32> -> vector<32x16xf32>
    %138 = arith.truncf %137 : vector<32x16xf32> to vector<32x16xbf16>
    %139 = vector.extract_strided_slice %8 {offsets = [2, 0, 0], sizes = [1, 16, 128], strides = [1, 1, 1]} : vector<6x16x128xbf16> to vector<1x16x128xbf16>
    %140 = vector.shape_cast %139 : vector<1x16x128xbf16> to vector<16x128xbf16>
    %cst_55 = arith.constant dense<0.000000e+00> : vector<32x128xf32>
    %141 = tpu.matmul %138, %140, %cst_55 {dimension_numbers = #tpu.dot_dimension_numbers<[1], [0], [0], [1], [0, 0, 1, 1], [], []>} : vector<32x16xbf16>, vector<16x128xbf16>, vector<32x128xf32> -> vector<32x128xf32>
    %142 = arith.addf %99, %141 : vector<32x128xf32>
    %143 = vector.extract_strided_slice %2 {offsets = [3, 0, 0], sizes = [1, 128, 16], strides = [1, 1, 1]} : vector<6x128x16xbf16> to vector<1x128x16xbf16>
    %144 = vector.shape_cast %143 : vector<1x128x16xbf16> to vector<128x16xbf16>
    %cst_56 = arith.constant dense<0.000000e+00> : vector<32x16xf32>
    %145 = tpu.matmul %12, %144, %cst_56 {dimension_numbers = #tpu.dot_dimension_numbers<[1], [0], [0], [1], [0, 0, 1, 1], [], []>} : vector<32x128xbf16>, vector<128x16xbf16>, vector<32x16xf32> -> vector<32x16xf32>
    %146 = vector.extract_strided_slice %3 {offsets = [3, 0, 0], sizes = [1, 1, 16], strides = [1, 1, 1]} : vector<6x1x16xf32> to vector<1x1x16xf32>
    %147 = vector.shape_cast %146 : vector<1x1x16xf32> to vector<1x16xf32>
    %148 = vector.broadcast %147 : vector<1x16xf32> to vector<32x16xf32>
    %149 = arith.addf %145, %148 : vector<32x16xf32>
    %150 = vector.extract_strided_slice %4 {offsets = [3, 0, 0], sizes = [1, 128, 16], strides = [1, 1, 1]} : vector<6x128x16xbf16> to vector<1x128x16xbf16>
    %151 = vector.shape_cast %150 : vector<1x128x16xbf16> to vector<128x16xbf16>
    %cst_57 = arith.constant dense<0.000000e+00> : vector<32x16xf32>
    %152 = tpu.matmul %12, %151, %cst_57 {dimension_numbers = #tpu.dot_dimension_numbers<[1], [0], [0], [1], [0, 0, 1, 1], [], []>} : vector<32x128xbf16>, vector<128x16xbf16>, vector<32x16xf32> -> vector<32x16xf32>
    %153 = vector.extract_strided_slice %5 {offsets = [3, 0, 0], sizes = [1, 1, 16], strides = [1, 1, 1]} : vector<6x1x16xf32> to vector<1x1x16xf32>
    %154 = vector.shape_cast %153 : vector<1x1x16xf32> to vector<1x16xf32>
    %155 = vector.broadcast %154 : vector<1x16xf32> to vector<32x16xf32>
    %156 = arith.addf %152, %155 : vector<32x16xf32>
    %157 = vector.extract_strided_slice %6 {offsets = [3, 0, 0], sizes = [1, 128, 16], strides = [1, 1, 1]} : vector<6x128x16xbf16> to vector<1x128x16xbf16>
    %158 = vector.shape_cast %157 : vector<1x128x16xbf16> to vector<128x16xbf16>
    %cst_58 = arith.constant dense<0.000000e+00> : vector<32x16xf32>
    %159 = tpu.matmul %12, %158, %cst_58 {dimension_numbers = #tpu.dot_dimension_numbers<[1], [0], [0], [1], [0, 0, 1, 1], [], []>} : vector<32x128xbf16>, vector<128x16xbf16>, vector<32x16xf32> -> vector<32x16xf32>
    %160 = vector.extract_strided_slice %7 {offsets = [3, 0, 0], sizes = [1, 1, 16], strides = [1, 1, 1]} : vector<6x1x16xf32> to vector<1x1x16xf32>
    %161 = vector.shape_cast %160 : vector<1x1x16xf32> to vector<1x16xf32>
    %162 = vector.broadcast %161 : vector<1x16xf32> to vector<32x16xf32>
    %163 = arith.addf %159, %162 : vector<32x16xf32>
    %164 = arith.truncf %149 : vector<32x16xf32> to vector<32x16xbf16>
    %165 = arith.truncf %156 : vector<32x16xf32> to vector<32x16xbf16>
    %cst_59 = arith.constant dense<0.000000e+00> : vector<32x32xf32>
    %166 = tpu.matmul %164, %165, %cst_59 {dimension_numbers = #tpu.dot_dimension_numbers<[1], [1], [0], [0], [0, 0, 1, 0], [], []>} : vector<32x16xbf16>, vector<32x16xbf16>, vector<32x32xf32> -> vector<32x32xf32>
    %cst_60 = arith.constant 2.500000e-01 : f32
    %167 = vector.broadcast %cst_60 : f32 to vector<32x32xf32>
    %168 = arith.mulf %166, %167 : vector<32x32xf32>
    %cst_61 = arith.constant dense<0xFF800000> : vector<32xf32>
    %169 = vector.multi_reduction <maximumf>, %168, %cst_61 [1] : vector<32x32xf32> to vector<32xf32>
    %170 = vector.shape_cast %169 : vector<32xf32> to vector<32x1xf32>
    %171 = vector.broadcast %170 : vector<32x1xf32> to vector<32x32xf32>
    %172 = arith.subf %168, %171 : vector<32x32xf32>
    %173 = math.exp %172 : vector<32x32xf32>
    %cst_62 = arith.constant dense<0.000000e+00> : vector<32xf32>
    %174 = vector.multi_reduction <add>, %173, %cst_62 [1] : vector<32x32xf32> to vector<32xf32>
    %175 = vector.shape_cast %174 : vector<32xf32> to vector<32x1xf32>
    %176 = vector.broadcast %175 : vector<32x1xf32> to vector<32x32xf32>
    %177 = arith.divf %173, %176 : vector<32x32xf32>
    %178 = arith.truncf %177 : vector<32x32xf32> to vector<32x32xbf16>
    %179 = arith.truncf %163 : vector<32x16xf32> to vector<32x16xbf16>
    %cst_63 = arith.constant dense<0.000000e+00> : vector<32x16xf32>
    %180 = tpu.matmul %178, %179, %cst_63 {dimension_numbers = #tpu.dot_dimension_numbers<[1], [0], [0], [1], [0, 0, 1, 1], [], []>} : vector<32x32xbf16>, vector<32x16xbf16>, vector<32x16xf32> -> vector<32x16xf32>
    %181 = arith.truncf %180 : vector<32x16xf32> to vector<32x16xbf16>
    %182 = vector.extract_strided_slice %8 {offsets = [3, 0, 0], sizes = [1, 16, 128], strides = [1, 1, 1]} : vector<6x16x128xbf16> to vector<1x16x128xbf16>
    %183 = vector.shape_cast %182 : vector<1x16x128xbf16> to vector<16x128xbf16>
    %cst_64 = arith.constant dense<0.000000e+00> : vector<32x128xf32>
    %184 = tpu.matmul %181, %183, %cst_64 {dimension_numbers = #tpu.dot_dimension_numbers<[1], [0], [0], [1], [0, 0, 1, 1], [], []>} : vector<32x16xbf16>, vector<16x128xbf16>, vector<32x128xf32> -> vector<32x128xf32>
    %185 = arith.addf %142, %184 : vector<32x128xf32>
    %186 = vector.extract_strided_slice %2 {offsets = [4, 0, 0], sizes = [1, 128, 16], strides = [1, 1, 1]} : vector<6x128x16xbf16> to vector<1x128x16xbf16>
    %187 = vector.shape_cast %186 : vector<1x128x16xbf16> to vector<128x16xbf16>
    %cst_65 = arith.constant dense<0.000000e+00> : vector<32x16xf32>
    %188 = tpu.matmul %12, %187, %cst_65 {dimension_numbers = #tpu.dot_dimension_numbers<[1], [0], [0], [1], [0, 0, 1, 1], [], []>} : vector<32x128xbf16>, vector<128x16xbf16>, vector<32x16xf32> -> vector<32x16xf32>
    %189 = vector.extract_strided_slice %3 {offsets = [4, 0, 0], sizes = [1, 1, 16], strides = [1, 1, 1]} : vector<6x1x16xf32> to vector<1x1x16xf32>
    %190 = vector.shape_cast %189 : vector<1x1x16xf32> to vector<1x16xf32>
    %191 = vector.broadcast %190 : vector<1x16xf32> to vector<32x16xf32>
    %192 = arith.addf %188, %191 : vector<32x16xf32>
    %193 = vector.extract_strided_slice %4 {offsets = [4, 0, 0], sizes = [1, 128, 16], strides = [1, 1, 1]} : vector<6x128x16xbf16> to vector<1x128x16xbf16>
    %194 = vector.shape_cast %193 : vector<1x128x16xbf16> to vector<128x16xbf16>
    %cst_66 = arith.constant dense<0.000000e+00> : vector<32x16xf32>
    %195 = tpu.matmul %12, %194, %cst_66 {dimension_numbers = #tpu.dot_dimension_numbers<[1], [0], [0], [1], [0, 0, 1, 1], [], []>} : vector<32x128xbf16>, vector<128x16xbf16>, vector<32x16xf32> -> vector<32x16xf32>
    %196 = vector.extract_strided_slice %5 {offsets = [4, 0, 0], sizes = [1, 1, 16], strides = [1, 1, 1]} : vector<6x1x16xf32> to vector<1x1x16xf32>
    %197 = vector.shape_cast %196 : vector<1x1x16xf32> to vector<1x16xf32>
    %198 = vector.broadcast %197 : vector<1x16xf32> to vector<32x16xf32>
    %199 = arith.addf %195, %198 : vector<32x16xf32>
    %200 = vector.extract_strided_slice %6 {offsets = [4, 0, 0], sizes = [1, 128, 16], strides = [1, 1, 1]} : vector<6x128x16xbf16> to vector<1x128x16xbf16>
    %201 = vector.shape_cast %200 : vector<1x128x16xbf16> to vector<128x16xbf16>
    %cst_67 = arith.constant dense<0.000000e+00> : vector<32x16xf32>
    %202 = tpu.matmul %12, %201, %cst_67 {dimension_numbers = #tpu.dot_dimension_numbers<[1], [0], [0], [1], [0, 0, 1, 1], [], []>} : vector<32x128xbf16>, vector<128x16xbf16>, vector<32x16xf32> -> vector<32x16xf32>
    %203 = vector.extract_strided_slice %7 {offsets = [4, 0, 0], sizes = [1, 1, 16], strides = [1, 1, 1]} : vector<6x1x16xf32> to vector<1x1x16xf32>
    %204 = vector.shape_cast %203 : vector<1x1x16xf32> to vector<1x16xf32>
    %205 = vector.broadcast %204 : vector<1x16xf32> to vector<32x16xf32>
    %206 = arith.addf %202, %205 : vector<32x16xf32>
    %207 = arith.truncf %192 : vector<32x16xf32> to vector<32x16xbf16>
    %208 = arith.truncf %199 : vector<32x16xf32> to vector<32x16xbf16>
    %cst_68 = arith.constant dense<0.000000e+00> : vector<32x32xf32>
    %209 = tpu.matmul %207, %208, %cst_68 {dimension_numbers = #tpu.dot_dimension_numbers<[1], [1], [0], [0], [0, 0, 1, 0], [], []>} : vector<32x16xbf16>, vector<32x16xbf16>, vector<32x32xf32> -> vector<32x32xf32>
    %cst_69 = arith.constant 2.500000e-01 : f32
    %210 = vector.broadcast %cst_69 : f32 to vector<32x32xf32>
    %211 = arith.mulf %209, %210 : vector<32x32xf32>
    %cst_70 = arith.constant dense<0xFF800000> : vector<32xf32>
    %212 = vector.multi_reduction <maximumf>, %211, %cst_70 [1] : vector<32x32xf32> to vector<32xf32>
    %213 = vector.shape_cast %212 : vector<32xf32> to vector<32x1xf32>
    %214 = vector.broadcast %213 : vector<32x1xf32> to vector<32x32xf32>
    %215 = arith.subf %211, %214 : vector<32x32xf32>
    %216 = math.exp %215 : vector<32x32xf32>
    %cst_71 = arith.constant dense<0.000000e+00> : vector<32xf32>
    %217 = vector.multi_reduction <add>, %216, %cst_71 [1] : vector<32x32xf32> to vector<32xf32>
    %218 = vector.shape_cast %217 : vector<32xf32> to vector<32x1xf32>
    %219 = vector.broadcast %218 : vector<32x1xf32> to vector<32x32xf32>
    %220 = arith.divf %216, %219 : vector<32x32xf32>
    %221 = arith.truncf %220 : vector<32x32xf32> to vector<32x32xbf16>
    %222 = arith.truncf %206 : vector<32x16xf32> to vector<32x16xbf16>
    %cst_72 = arith.constant dense<0.000000e+00> : vector<32x16xf32>
    %223 = tpu.matmul %221, %222, %cst_72 {dimension_numbers = #tpu.dot_dimension_numbers<[1], [0], [0], [1], [0, 0, 1, 1], [], []>} : vector<32x32xbf16>, vector<32x16xbf16>, vector<32x16xf32> -> vector<32x16xf32>
    %224 = arith.truncf %223 : vector<32x16xf32> to vector<32x16xbf16>
    %225 = vector.extract_strided_slice %8 {offsets = [4, 0, 0], sizes = [1, 16, 128], strides = [1, 1, 1]} : vector<6x16x128xbf16> to vector<1x16x128xbf16>
    %226 = vector.shape_cast %225 : vector<1x16x128xbf16> to vector<16x128xbf16>
    %cst_73 = arith.constant dense<0.000000e+00> : vector<32x128xf32>
    %227 = tpu.matmul %224, %226, %cst_73 {dimension_numbers = #tpu.dot_dimension_numbers<[1], [0], [0], [1], [0, 0, 1, 1], [], []>} : vector<32x16xbf16>, vector<16x128xbf16>, vector<32x128xf32> -> vector<32x128xf32>
    %228 = arith.addf %185, %227 : vector<32x128xf32>
    %229 = vector.extract_strided_slice %2 {offsets = [5, 0, 0], sizes = [1, 128, 16], strides = [1, 1, 1]} : vector<6x128x16xbf16> to vector<1x128x16xbf16>
    %230 = vector.shape_cast %229 : vector<1x128x16xbf16> to vector<128x16xbf16>
    %cst_74 = arith.constant dense<0.000000e+00> : vector<32x16xf32>
    %231 = tpu.matmul %12, %230, %cst_74 {dimension_numbers = #tpu.dot_dimension_numbers<[1], [0], [0], [1], [0, 0, 1, 1], [], []>} : vector<32x128xbf16>, vector<128x16xbf16>, vector<32x16xf32> -> vector<32x16xf32>
    %232 = vector.extract_strided_slice %3 {offsets = [5, 0, 0], sizes = [1, 1, 16], strides = [1, 1, 1]} : vector<6x1x16xf32> to vector<1x1x16xf32>
    %233 = vector.shape_cast %232 : vector<1x1x16xf32> to vector<1x16xf32>
    %234 = vector.broadcast %233 : vector<1x16xf32> to vector<32x16xf32>
    %235 = arith.addf %231, %234 : vector<32x16xf32>
    %236 = vector.extract_strided_slice %4 {offsets = [5, 0, 0], sizes = [1, 128, 16], strides = [1, 1, 1]} : vector<6x128x16xbf16> to vector<1x128x16xbf16>
    %237 = vector.shape_cast %236 : vector<1x128x16xbf16> to vector<128x16xbf16>
    %cst_75 = arith.constant dense<0.000000e+00> : vector<32x16xf32>
    %238 = tpu.matmul %12, %237, %cst_75 {dimension_numbers = #tpu.dot_dimension_numbers<[1], [0], [0], [1], [0, 0, 1, 1], [], []>} : vector<32x128xbf16>, vector<128x16xbf16>, vector<32x16xf32> -> vector<32x16xf32>
    %239 = vector.extract_strided_slice %5 {offsets = [5, 0, 0], sizes = [1, 1, 16], strides = [1, 1, 1]} : vector<6x1x16xf32> to vector<1x1x16xf32>
    %240 = vector.shape_cast %239 : vector<1x1x16xf32> to vector<1x16xf32>
    %241 = vector.broadcast %240 : vector<1x16xf32> to vector<32x16xf32>
    %242 = arith.addf %238, %241 : vector<32x16xf32>
    %243 = vector.extract_strided_slice %6 {offsets = [5, 0, 0], sizes = [1, 128, 16], strides = [1, 1, 1]} : vector<6x128x16xbf16> to vector<1x128x16xbf16>
    %244 = vector.shape_cast %243 : vector<1x128x16xbf16> to vector<128x16xbf16>
    %cst_76 = arith.constant dense<0.000000e+00> : vector<32x16xf32>
    %245 = tpu.matmul %12, %244, %cst_76 {dimension_numbers = #tpu.dot_dimension_numbers<[1], [0], [0], [1], [0, 0, 1, 1], [], []>} : vector<32x128xbf16>, vector<128x16xbf16>, vector<32x16xf32> -> vector<32x16xf32>
    %246 = vector.extract_strided_slice %7 {offsets = [5, 0, 0], sizes = [1, 1, 16], strides = [1, 1, 1]} : vector<6x1x16xf32> to vector<1x1x16xf32>
    %247 = vector.shape_cast %246 : vector<1x1x16xf32> to vector<1x16xf32>
    %248 = vector.broadcast %247 : vector<1x16xf32> to vector<32x16xf32>
    %249 = arith.addf %245, %248 : vector<32x16xf32>
    %250 = arith.truncf %235 : vector<32x16xf32> to vector<32x16xbf16>
    %251 = arith.truncf %242 : vector<32x16xf32> to vector<32x16xbf16>
    %cst_77 = arith.constant dense<0.000000e+00> : vector<32x32xf32>
    %252 = tpu.matmul %250, %251, %cst_77 {dimension_numbers = #tpu.dot_dimension_numbers<[1], [1], [0], [0], [0, 0, 1, 0], [], []>} : vector<32x16xbf16>, vector<32x16xbf16>, vector<32x32xf32> -> vector<32x32xf32>
    %cst_78 = arith.constant 2.500000e-01 : f32
    %253 = vector.broadcast %cst_78 : f32 to vector<32x32xf32>
    %254 = arith.mulf %252, %253 : vector<32x32xf32>
    %cst_79 = arith.constant dense<0xFF800000> : vector<32xf32>
    %255 = vector.multi_reduction <maximumf>, %254, %cst_79 [1] : vector<32x32xf32> to vector<32xf32>
    %256 = vector.shape_cast %255 : vector<32xf32> to vector<32x1xf32>
    %257 = vector.broadcast %256 : vector<32x1xf32> to vector<32x32xf32>
    %258 = arith.subf %254, %257 : vector<32x32xf32>
    %259 = math.exp %258 : vector<32x32xf32>
    %cst_80 = arith.constant dense<0.000000e+00> : vector<32xf32>
    %260 = vector.multi_reduction <add>, %259, %cst_80 [1] : vector<32x32xf32> to vector<32xf32>
    %261 = vector.shape_cast %260 : vector<32xf32> to vector<32x1xf32>
    %262 = vector.broadcast %261 : vector<32x1xf32> to vector<32x32xf32>
    %263 = arith.divf %259, %262 : vector<32x32xf32>
    %264 = arith.truncf %263 : vector<32x32xf32> to vector<32x32xbf16>
    %265 = arith.truncf %249 : vector<32x16xf32> to vector<32x16xbf16>
    %cst_81 = arith.constant dense<0.000000e+00> : vector<32x16xf32>
    %266 = tpu.matmul %264, %265, %cst_81 {dimension_numbers = #tpu.dot_dimension_numbers<[1], [0], [0], [1], [0, 0, 1, 1], [], []>} : vector<32x32xbf16>, vector<32x16xbf16>, vector<32x16xf32> -> vector<32x16xf32>
    %267 = arith.truncf %266 : vector<32x16xf32> to vector<32x16xbf16>
    %268 = vector.extract_strided_slice %8 {offsets = [5, 0, 0], sizes = [1, 16, 128], strides = [1, 1, 1]} : vector<6x16x128xbf16> to vector<1x16x128xbf16>
    %269 = vector.shape_cast %268 : vector<1x16x128xbf16> to vector<16x128xbf16>
    %cst_82 = arith.constant dense<0.000000e+00> : vector<32x128xf32>
    %270 = tpu.matmul %267, %269, %cst_82 {dimension_numbers = #tpu.dot_dimension_numbers<[1], [0], [0], [1], [0, 0, 1, 1], [], []>} : vector<32x16xbf16>, vector<16x128xbf16>, vector<32x128xf32> -> vector<32x128xf32>
    %271 = arith.addf %228, %270 : vector<32x128xf32>
    %272 = vector.broadcast %9 : vector<1x128xf32> to vector<32x128xf32>
    %273 = arith.addf %271, %272 : vector<32x128xf32>
    %cst_83 = arith.constant dense<0.000000e+00> : vector<32xf32>
    %274 = vector.multi_reduction <add>, %273, %cst_83 [1] : vector<32x128xf32> to vector<32xf32>
    %275 = vector.shape_cast %274 : vector<32xf32> to vector<32x1xf32>
    %cst_84 = arith.constant 1.280000e+02 : f32
    %276 = vector.broadcast %cst_84 : f32 to vector<32x1xf32>
    %277 = arith.divf %275, %276 : vector<32x1xf32>
    %278 = vector.broadcast %277 : vector<32x1xf32> to vector<32x128xf32>
    %279 = arith.subf %273, %278 : vector<32x128xf32>
    %280 = arith.mulf %279, %279 : vector<32x128xf32>
    %cst_85 = arith.constant dense<0.000000e+00> : vector<32xf32>
    %281 = vector.multi_reduction <add>, %280, %cst_85 [1] : vector<32x128xf32> to vector<32xf32>
    %282 = vector.shape_cast %281 : vector<32xf32> to vector<32x1xf32>
    %cst_86 = arith.constant 1.280000e+02 : f32
    %283 = vector.broadcast %cst_86 : f32 to vector<32x1xf32>
    %284 = arith.divf %282, %283 : vector<32x1xf32>
    %cst_87 = arith.constant 9.99999974E-6 : f32
    %285 = vector.broadcast %cst_87 : f32 to vector<32x1xf32>
    %286 = arith.addf %284, %285 : vector<32x1xf32>
    %287 = math.rsqrt %286 : vector<32x1xf32>
    %288 = vector.broadcast %287 : vector<32x1xf32> to vector<32x128xf32>
    %289 = arith.mulf %279, %288 : vector<32x128xf32>
    %290 = vector.broadcast %10 : vector<1x128xf32> to vector<32x128xf32>
    %291 = arith.mulf %289, %290 : vector<32x128xf32>
    %292 = vector.broadcast %11 : vector<1x128xf32> to vector<32x128xf32>
    %293 = arith.addf %291, %292 : vector<32x128xf32>
    %294 = arith.addf %1, %293 : vector<32x128xf32>
    %c0_88 = arith.constant 0 : index
    %c0_89 = arith.constant 0 : index
    %c0_90 = arith.constant 0 : index
    %295 = vector.load %arg12[%c0_88, %c0_89, %c0_90] : memref<1x32x128xf32, #tpu.memory_space<vmem>>, vector<1x32x128xf32>
    %296 = vector.shape_cast %295 : vector<1x32x128xf32> to vector<32x128xf32>
    %297 = vector.shape_cast %294 : vector<32x128xf32> to vector<1x32x128xf32>
    tpu.vector_store %arg12[%c0_88, %c0_89, %c0_90], %297 {strides = array<i32>} : memref<1x32x128xf32, #tpu.memory_space<vmem>>, vector<1x32x128xf32>,
    return
  }
  func.func @transform_0(%arg0: i32) -> (i32, i32, i32) {
    %c0_i32 = arith.constant 0 : i32
    %c0_i32_0 = arith.constant 0 : i32
    %c0_i32_1 = arith.constant 0 : i32
    return %arg0, %c0_i32, %c0_i32_0 : i32, i32, i32
  }
  func.func @transform_1(%arg0: i32) -> (i32, i32, i32) {
    %c0_i32 = arith.constant 0 : i32
    %c0_i32_0 = arith.constant 0 : i32
    %c0_i32_1 = arith.constant 0 : i32
    %c0_i32_2 = arith.constant 0 : i32
    return %c0_i32, %c0_i32_0, %c0_i32_1 : i32, i32, i32
  }
  func.func @transform_2(%arg0: i32) -> (i32, i32, i32) {
    %c0_i32 = arith.constant 0 : i32
    %c0_i32_0 = arith.constant 0 : i32
    %c0_i32_1 = arith.constant 0 : i32
    %c0_i32_2 = arith.constant 0 : i32
    return %c0_i32, %c0_i32_0, %c0_i32_1 : i32, i32, i32
  }
  func.func @transform_3(%arg0: i32) -> (i32, i32, i32) {
    %c0_i32 = arith.constant 0 : i32
    %c0_i32_0 = arith.constant 0 : i32
    %c0_i32_1 = arith.constant 0 : i32
    %c0_i32_2 = arith.constant 0 : i32
    return %c0_i32, %c0_i32_0, %c0_i32_1 : i32, i32, i32
  }
  func.func @transform_4(%arg0: i32) -> (i32, i32, i32) {
    %c0_i32 = arith.constant 0 : i32
    %c0_i32_0 = arith.constant 0 : i32
    %c0_i32_1 = arith.constant 0 : i32
    %c0_i32_2 = arith.constant 0 : i32
    return %c0_i32, %c0_i32_0, %c0_i32_1 : i32, i32, i32
  }
  func.func @transform_5(%arg0: i32) -> (i32, i32, i32) {
    %c0_i32 = arith.constant 0 : i32
    %c0_i32_0 = arith.constant 0 : i32
    %c0_i32_1 = arith.constant 0 : i32
    %c0_i32_2 = arith.constant 0 : i32
    return %c0_i32, %c0_i32_0, %c0_i32_1 : i32, i32, i32
  }
  func.func @transform_6(%arg0: i32) -> (i32, i32, i32) {
    %c0_i32 = arith.constant 0 : i32
    %c0_i32_0 = arith.constant 0 : i32
    %c0_i32_1 = arith.constant 0 : i32
    %c0_i32_2 = arith.constant 0 : i32
    return %c0_i32, %c0_i32_0, %c0_i32_1 : i32, i32, i32
  }
  func.func @transform_7(%arg0: i32) -> (i32, i32, i32) {
    %c0_i32 = arith.constant 0 : i32
    %c0_i32_0 = arith.constant 0 : i32
    %c0_i32_1 = arith.constant 0 : i32
    %c0_i32_2 = arith.constant 0 : i32
    return %c0_i32, %c0_i32_0, %c0_i32_1 : i32, i32, i32
  }
  func.func @transform_8(%arg0: i32) -> (i32, i32) {
    %c0_i32 = arith.constant 0 : i32
    %c0_i32_0 = arith.constant 0 : i32
    %c0_i32_1 = arith.constant 0 : i32
    return %c0_i32, %c0_i32_0 : i32, i32
  }
  func.func @transform_9(%arg0: i32) -> (i32, i32) {
    %c0_i32 = arith.constant 0 : i32
    %c0_i32_0 = arith.constant 0 : i32
    %c0_i32_1 = arith.constant 0 : i32
    return %c0_i32, %c0_i32_0 : i32, i32
  }
  func.func @transform_10(%arg0: i32) -> (i32, i32) {
    %c0_i32 = arith.constant 0 : i32
    %c0_i32_0 = arith.constant 0 : i32
    %c0_i32_1 = arith.constant 0 : i32
    return %c0_i32, %c0_i32_0 : i32, i32
  }
  func.func @transform_11(%arg0: i32) -> (i32, i32, i32) {
    %c0_i32 = arith.constant 0 : i32
    %c0_i32_0 = arith.constant 0 : i32
    %c0_i32_1 = arith.constant 0 : i32
    return %arg0, %c0_i32, %c0_i32_0 : i32, i32, i32
  }
}

module attributes {stable_mosaic.version = 11 : i64} {
  func.func @final_linear_kernel(%arg0: i32, %arg1: memref<2x128xf32, #tpu.memory_space<vmem>>, %arg2: memref<128x16xbf16, #tpu.memory_space<vmem>>, %arg3: memref<1x16xf32, #tpu.memory_space<vmem>>, %arg4: memref<2x16xf32, #tpu.memory_space<vmem>>) attributes {dimension_semantics = [#tpu.dimension_semantics<arbitrary>], iteration_bounds = array<i64: 1>, scalar_prefetch = 0 : i64, scratch_operands = 0 : i64, tpu.core_type = #tpu.core_type<tc>, window_params = [{pipeline_mode = #tpu.pipeline_mode<synchronous>, transform_indices = @transform_0, window_bounds = array<i64: 2, 128>}, {pipeline_mode = #tpu.pipeline_mode<synchronous>, transform_indices = @transform_1, window_bounds = array<i64: 128, 16>}, {pipeline_mode = #tpu.pipeline_mode<synchronous>, transform_indices = @transform_2, window_bounds = array<i64: 1, 16>}, {pipeline_mode = #tpu.pipeline_mode<synchronous>, transform_indices = @transform_3, window_bounds = array<i64: 2, 16>}]} {
    %c0 = arith.constant 0 : index
    %c0_0 = arith.constant 0 : index
    %0 = vector.load %arg1[%c0, %c0_0] : memref<2x128xf32, #tpu.memory_space<vmem>>, vector<2x128xf32>
    %c0_1 = arith.constant 0 : index
    %c0_2 = arith.constant 0 : index
    %1 = vector.load %arg2[%c0_1, %c0_2] : memref<128x16xbf16, #tpu.memory_space<vmem>>, vector<128x16xbf16>
    %c0_3 = arith.constant 0 : index
    %c0_4 = arith.constant 0 : index
    %2 = vector.load %arg3[%c0_3, %c0_4] : memref<1x16xf32, #tpu.memory_space<vmem>>, vector<1x16xf32>
    %3 = arith.truncf %0 : vector<2x128xf32> to vector<2x128xbf16>
    %cst = arith.constant dense<0.000000e+00> : vector<2x16xf32>
    %4 = tpu.matmul %3, %1, %cst {dimension_numbers = #tpu.dot_dimension_numbers<[1], [0], [0], [1], [0, 0, 1, 1], [], []>} : vector<2x128xbf16>, vector<128x16xbf16>, vector<2x16xf32> -> vector<2x16xf32>
    %5 = vector.broadcast %2 : vector<1x16xf32> to vector<2x16xf32>
    %6 = arith.addf %4, %5 : vector<2x16xf32>
    %c0_5 = arith.constant 0 : index
    %c0_6 = arith.constant 0 : index
    %7 = vector.load %arg4[%c0_5, %c0_6] : memref<2x16xf32, #tpu.memory_space<vmem>>, vector<2x16xf32>
    tpu.vector_store %arg4[%c0_5, %c0_6], %6 {strides = array<i32>} : memref<2x16xf32, #tpu.memory_space<vmem>>, vector<2x16xf32>,
    return
  }
  func.func @transform_0(%arg0: i32) -> (i32, i32) {
    %c0_i32 = arith.constant 0 : i32
    %c0_i32_0 = arith.constant 0 : i32
    %c0_i32_1 = arith.constant 0 : i32
    return %c0_i32, %c0_i32_0 : i32, i32
  }
  func.func @transform_1(%arg0: i32) -> (i32, i32) {
    %c0_i32 = arith.constant 0 : i32
    %c0_i32_0 = arith.constant 0 : i32
    %c0_i32_1 = arith.constant 0 : i32
    return %c0_i32, %c0_i32_0 : i32, i32
  }
  func.func @transform_2(%arg0: i32) -> (i32, i32) {
    %c0_i32 = arith.constant 0 : i32
    %c0_i32_0 = arith.constant 0 : i32
    %c0_i32_1 = arith.constant 0 : i32
    return %c0_i32, %c0_i32_0 : i32, i32
  }
  func.func @transform_3(%arg0: i32) -> (i32, i32) {
    %c0_i32 = arith.constant 0 : i32
    %c0_i32_0 = arith.constant 0 : i32
    %c0_i32_1 = arith.constant 0 : i32
    return %c0_i32, %c0_i32_0 : i32, i32
  }
}

</mosaic_0001>

<bundles_post_ra>
// kernel: origin_forward.10
= control target key start
LH: loop header
LB: loop body
LE: loop exit
PB: predicated region body
PF: predicated region fallthrough
CT: control target
= control target key end

     0   :  { %7 = vsyncpa [#allocation3], 0  ;;  %s486_s0 = inlined_call_operand.vmem [shape: f32[2,32,128], index: 0, kind: input, shape index: {}]   ;;  %s487_s1 = inlined_call_operand.vmem [shape: f32[1,32,128], index: 1, kind: input, shape index: {}]   ;;  %s488_s2 = inlined_call_operand.hbm [shape: f32[2,32,128], index: 2, kind: output, shape index: {}]  }
   0x1   :  { %9 = vsyncpa [#allocation3 + $0x1], 0  ;;  %s371_s9 = smov 0   ;;  %s373_s10 = smov 0  }
   0x2   :  { %s375_s11 = smov 0   ;;  %s377_s12 = smov 0  }
   0x3 LB: > { %s392_s13 = sadd.s32 4294967295, %s351_s12   ;;  %s234_s14 = sadd.s32 4294967294, %s351_s12   ;;  %s351_s12 = sphi %s377_s12, %s494_s12   ;;  %s347_s11 = sphi %s375_s11, %s493_s11   ;;  %s343_s10 = sphi %s373_s10, %s492_s10   ;;  %s339_s9 = sphi %s371_s9, %s491_s9  }
   0x4   : > { %s396_s15 = sadd.s32 1, %s351_s12   ;;  %s69_s16 = sadd.s32 1, %s347_s11 }
   0x5   : > { %s66_s17 = ssub.s32 %s351_s12, %s396_s15  ;;  %p79_p0 = scmp.ne.s32.totalorder %s347_s11, %s343_s10 }
   0x6   : > { %p67_p1 = scmp.eq.s32.totalorder %s66_s17, 0  ;;  %p80_p2 = scmp.eq.s32.totalorder %s392_s13, 1 }
   0x7   : > { %p85_p3 = scmp.ne.s32.totalorder %s343_s10, %s339_s9  ;;  %p86_p4 = scmp.eq.s32.totalorder %s234_s14, 1 }
   0x8   : > { %s407_s18 = scalar_select %p67_p1, %s347_s11, %s69_s16  }
   0x9   : > { %p409_p5 = por %p80_p2, %p79_p0  ;;  %p413_p6 = por %p86_p4, %p85_p3 }
   0xa   : > { %p237_p7 = scmp.ge.s32.totalorder %s351_s12, 1  ;;  %p115_p8 = scmp.lt.s32.totalorder %s351_s12, 3 }
   0xc   : > { %p116_p9 = pnand %p237_p7, %p115_p8 }
   0xd   : > { %s134_s21 = sand.u32 (!%p116_p9), 1, %s343_s10   ;;  %p137_p10 = scmp.lt.s32.totalorder (!%p116_p9), %s392_s13, 1  ;;  %v146_v0 = vld [vmem:[%s487_s1] sm:$0xff] (!%p116_p9)  ;;  %v147_v1 = vld [vmem:[%s487_s1 + $0x8] sm:$0xff] (!%p116_p9)  ;;  %v148_v2 = vld [vmem:[%s487_s1 + $0x10] sm:$0xff] (!%p116_p9) }
   0xe   : > { %119 = sbr.rel (%p116_p9) target bundleno = 47 (0x2f), region = 28  ;;  %s238_s22 = sshll.u32 (!%p116_p9), %s134_s21, 5  ;;  %v149_v3 = vld [vmem:[%s487_s1 + $0x18] sm:$0xff] (!%p116_p9) }
   0xf   : > { %s247_s24 = sshll.u32 (!%p116_p9), %s392_s13, 9  ;;  %s136_s28 = scalar_lea.vmem (!%p116_p9), [#allocation2], %s238_s22 }
  0x10   : > { %s172_s29 = sshll.u32 (!%p116_p9), %s136_s28, 4  ;;  %s443_s22 = scalar_lea.hbm (!%p116_p9), %s488_s2, %s247_s24  ;;  %s438_s29 = int_to_ptr.vmem [resolvable:$true] %s172_s29 }
  0x11   : > { %s353_s26 = smov (!%p116_p9), [#allocation2]  }
  0x12   : > { %s293_s27 = sshll.u32 (!%p116_p9), %s353_s26, 4  ;;  %s294_s27 = int_to_ptr.vmem [resolvable:$false] %s293_s27 }
  0x13   : > { %s295_s30 = scalar_lea.vmem (!%p116_p9), %s294_s27, 1024  ;;  %p296_p0 = scmp.lt.s32.totalorder (!%p116_p9), %s438_s29, %s294_s27 }
  0x15   : > { %s138_s23 = scalar_select %p137_p10, %s392_s13, 1 }
  0x17   : > { %s246_s25 = sshll.u32 %s138_s23, 5  ;;  %s445_s23 = scalar_lea.sflag [#allocation3], %s134_s21 }
  0x18   : > { %s141_s8 = scalar_lea.vmem %s486_s0, %s246_s25  ;;  %s289_s25 = scalar_lea.vmem %s438_s29, 512 }
  0x19   : > { %v142_v4 = vld [vmem:[%s141_s8] sm:$0xff]  ;;  %v143_v5 = vld [vmem:[%s141_s8 + $0x8] sm:$0xff]  ;;  %v144_v6 = vld [vmem:[%s141_s8 + $0x10] sm:$0xff]  ;;  %p290_p11 = scmp.ne.s32.totalorder %s438_s29, %s289_s25  ;;  %p297_p1 = scmp.lt.s32.totalorder %s295_s30, %s289_s25 }
  0x1a   : > { %v150_v7 = vadd.f32 %v146_v0, %v142_v4  ;;  %v151_v8 = vadd.f32 %v147_v1, %v143_v5  ;;  %v152_v9 = vadd.f32 %v148_v2, %v144_v6  ;;  %v145_v10 = vld [vmem:[%s141_s8 + $0x18] sm:$0xff] }
  0x1b   : > { %v153_v11 = vadd.f32 %v149_v3, %v145_v10  ;;  %p291_p12 = pnand %p290_p11, %p409_p5  ;;  %p298_p2 = por %p297_p1, %p296_p0 }
  0x1c   : > { %154 = vst [vmem:[%s136_s28] sm:$0xff] %v150_v7  ;;  %155 = vst [vmem:[%s136_s28 + $0x8] sm:$0xff] %v151_v8 }
  0x1d   : > { %156 = vst [vmem:[%s136_s28 + $0x10] sm:$0xff] %v152_v9  ;;  %157 = vst [vmem:[%s136_s28 + $0x18] sm:$0xff] %v153_v11  ;;  %p292_p13 = pneg %p291_p12 }
  0x1f   : > { %p299_p3 = pnand %p298_p2, %p292_p13 }
  0x21   : > { %302 = shalt.err (!%p299_p3)
}
  0x22   : > { %s303_s21 = scalar_lea.hbm %s443_s22, 512  ;;  %s307_s3 = scalar_lea.hbm %s488_s2, 1024 }
  0x23   : > { %p304_p4 = scmp.ne.s32.totalorder %s443_s22, %s303_s21  ;;  %p308_p9 = scmp.lt.u32.totalorder %s443_s22, %s488_s2 }
  0x24   : > { %p309_p10 = scmp.lt.u32.totalorder %s307_s3, %s303_s21  ;;  %p311_p12 = scmp.lt.u32.totalorder %s303_s21, %s443_s22 }
  0x25   : > { %p305_p7 = pnand %p304_p4, %p409_p5 }
  0x26   : > { %p310_p11 = por %p309_p10, %p308_p9 }
  0x27   : > { %p306_p8 = pneg %p305_p7 }
  0x28   : > { %p312_p13 = por %p311_p12, %p310_p11 }
  0x2a   : > { %p313_p0 = pnand %p312_p13, %p306_p8 }
  0x2c   : > { %316 = shalt.err (!%p313_p0)
}
  0x2d   : > { %s354_s6 = smov 128   ;;  %s355_s7 = smov 8  }
  0x2e   : > { %248 = dma.vmem_to_hbm [thread:$0]  (%p409_p5), %s438_s29, 512, %s443_s22, %s445_s23, %s354_s6, %s354_s6, %s355_s7  }
  0x2f PF: > { %p254_p1 = scmp.ge.s32.totalorder %s351_s12, 2  ;;  %s187_s8 = sand.u32 1, %s339_s9  }
  0x30   : > { %s188_s13 = scalar_lea.sflag [#allocation3], %s187_s8 }
  0x31   : > { %p251_p2 = pnand %p254_p1, %p413_p6 }
  0x33   : > { %334 = dma.done.wait (!%p251_p2), %s188_s13, 512  }
  0x34   : > { %336 = vsyncadd (!%p251_p2), %s188_s13, 4294966784  ;;  %p12_p3 = scmp.ge.s32.totalorder %s396_s15, 4   ;;  %s491_s9 = smov %s343_s10 }
  0x35   : > { %s492_s10 = smov %s347_s11  ;;  %s493_s11 = smov %s407_s18 }
  0x36   : > { %s494_s12 = smov %s396_s15  ;;  %14 = sbr.rel (!%p12_p3) target bundleno = 3 (0x3), region = 63 }
  0x3d   :  { %193 = vsyncpa [#allocation3], 1 }
  0x3e   :  { %195 = vsyncpa [#allocation3 + $0x1], 1 }

// kernel: origin_forward.12
= control target key start
LH: loop header
LB: loop body
LE: loop exit
PB: predicated region body
PF: predicated region fallthrough
CT: control target
= control target key end

     0   :  { %12 = vsyncpa [#allocation3], 0  ;;  %s1205_s0 = inlined_call_operand.hbm [shape: f32[64,128], index: 0, kind: input, shape index: {}]   ;;  %s1206_s1 = inlined_call_operand.hbm [shape: bf16[128,64], index: 1, kind: input, shape index: {}]   ;;  %s1207_s2 = inlined_call_operand.hbm [shape: f32[1,64], index: 2, kind: input, shape index: {}]   ;;  %s1208_s3 = inlined_call_operand.hbm [shape: bf16[64,128], index: 3, kind: input, shape index: {}]   ;;  %s1209_s4 = inlined_call_operand.hbm [shape: f32[1,128], index: 4, kind: input, shape index: {}]   ;;  %s1210_s5 = inlined_call_operand.hbm [shape: f32[1,128], index: 5, kind: input, shape index: {}]   ;;  %s1211_s6 = inlined_call_operand.hbm [shape: f32[1,128], index: 6, kind: input, shape index: {}]   ;;  %s1212_s7 = inlined_call_operand.hbm [shape: f32[64,128], index: 7, kind: output, shape index: {}]  }
   0x1   :  { %13 = vsyncpa [#allocation6], 0 }
   0x2   :  { %14 = vsyncpa [#allocation9], 0 }
   0x3   :  { %15 = vsyncpa [#allocation12], 0 }
   0x4   :  { %16 = vsyncpa [#allocation4], 0  ;;  %s933_s24 = smov [#allocation5]   ;;  %s747_s28 = scalar_lea.hbm %s1206_s1, 1024 }
   0x5   :  { %s34_s25 = sshll.u32 %s933_s24, 4  ;;  %p748_p0 = scmp.ne.s32.totalorder %s1206_s1, %s747_s28  ;;  %s35_s25 = int_to_ptr.vmem [resolvable:$true] %s34_s25 }
   0x6   :  { %p751_p1 = scmp.lt.u32.totalorder %s747_s28, %s1206_s1 }
   0x8   :  { %p753_p2 = pnand %p751_p1, %p748_p0 }
   0xa   :  { %756 = shalt.err (!%p753_p2)
}
   0xb   :  { %s757_s10 = scalar_lea.vmem %s35_s25, 1024  ;;  %p762_p4 = scmp.lt.s32.totalorder %s35_s25, %s35_s25 }
   0xc   :  { %p758_p3 = scmp.ne.s32.totalorder %s35_s25, %s757_s10  ;;  %p763_p5 = scmp.lt.s32.totalorder %s757_s10, %s757_s10 }
   0xe   :  { %p764_p6 = por %p763_p5, %p762_p4 }
  0x10   :  { %p765_p7 = pnand %p764_p6, %p758_p3 }
  0x12   :  { %768 = shalt.err (!%p765_p7)
}
  0x13   :  { %s934_s11 = smov 64   ;;  %s935_s12 = smov 4  }
  0x14   :  { %40 = dma.hbm_to_vmem [thread:$0]  %s1206_s1, 1024, %s35_s25, [#allocation6], %s934_s11, %s934_s11, %s935_s12  }
  0x15   :  { %s936_s15 = smov [#allocation8]   ;;  %s937_s17 = smov [#allocation11]  }
  0x16   :  { %s56_s16 = sshll.u32 %s936_s15, 4  ;;  %s79_s18 = sshll.u32 %s937_s17, 4  ;;  %s57_s16 = int_to_ptr.vmem [resolvable:$true] %s56_s16  ;;  %s80_s18 = int_to_ptr.vmem [resolvable:$true] %s79_s18 }
  0x17   :  { %s769_s21 = scalar_lea.hbm %s1208_s3, 512 }
  0x18   :  { %p770_p8 = scmp.ne.s32.totalorder %s1208_s3, %s769_s21  ;;  %p773_p9 = scmp.lt.u32.totalorder %s769_s21, %s1208_s3 }
  0x1a   :  { %p775_p10 = pnand %p773_p9, %p770_p8 }
  0x1c   :  { %778 = shalt.err (!%p775_p10)
}
  0x1d   :  { %s779_s1 = scalar_lea.vmem %s57_s16, 512  ;;  %p784_p12 = scmp.lt.s32.totalorder %s57_s16, %s57_s16 }
  0x1e   :  { %p780_p11 = scmp.ne.s32.totalorder %s57_s16, %s779_s1  ;;  %p785_p13 = scmp.lt.s32.totalorder %s779_s1, %s779_s1 }
  0x20   :  { %p786_p0 = por %p785_p13, %p784_p12 }
  0x22   :  { %p787_p1 = pnand %p786_p0, %p780_p11 }
  0x24   :  { %790 = shalt.err (!%p787_p1)
}
  0x25   :  { %62 = dma.hbm_to_vmem [thread:$0]  %s1208_s3, 512, %s57_s16, [#allocation9], %s934_s11, %s934_s11, %s935_s12  }
  0x26   :  { %s791_s30 = scalar_lea.hbm %s1210_s5, 16 }
  0x27   :  { %p792_p2 = scmp.ne.s32.totalorder %s1210_s5, %s791_s30  ;;  %p795_p3 = scmp.lt.u32.totalorder %s791_s30, %s1210_s5 }
  0x29   :  { %p797_p4 = pnand %p795_p3, %p792_p2 }
  0x2b   :  { %800 = shalt.err (!%p797_p4)
}
  0x2c   :  { %s801_s14 = scalar_lea.vmem %s80_s18, 16  ;;  %s805_s15 = scalar_lea.vmem %s80_s18, 32 }
  0x2d   :  { %p802_p5 = scmp.ne.s32.totalorder %s80_s18, %s801_s14  ;;  %p806_p6 = scmp.lt.s32.totalorder %s80_s18, %s80_s18 }
  0x2e   :  { %p807_p7 = scmp.lt.s32.totalorder %s805_s15, %s801_s14 }
  0x30   :  { %p808_p8 = por %p807_p7, %p806_p6 }
  0x32   :  { %p809_p9 = pnand %p808_p8, %p802_p5 }
  0x34   :  { %812 = shalt.err (!%p809_p9)
}
  0x35   :  { %82 = dma.hbm_to_vmem [thread:$0]  %s1210_s5, 16, %s80_s18, [#allocation12]  }
  0x36   :  { %s938_s12 = smov [#allocation2]   ;;  %s813_s20 = scalar_lea.hbm %s1205_s0, 1024 }
  0x37   :  { %s22_s16 = sshll.u32 %s938_s12, 4  ;;  %p814_p10 = scmp.ne.s32.totalorder %s1205_s0, %s813_s20  ;;  %s23_s16 = int_to_ptr.vmem [resolvable:$true] %s22_s16 }
  0x38   :  { %p817_p11 = scmp.lt.u32.totalorder %s813_s20, %s1205_s0 }
  0x3a   :  { %p819_p12 = pnand %p817_p11, %p814_p10 }
  0x3c   :  { %822 = shalt.err (!%p819_p12)
}
  0x3d   :  { %s823_s26 = scalar_lea.vmem %s23_s16, 1024  ;;  %p828_p0 = scmp.lt.s32.totalorder %s23_s16, %s23_s16 }
  0x3e   :  { %p824_p13 = scmp.ne.s32.totalorder %s23_s16, %s823_s26  ;;  %p829_p1 = scmp.lt.s32.totalorder %s823_s26, %s823_s26 }
  0x40   :  { %p830_p2 = por %p829_p1, %p828_p0 }
  0x42   :  { %p831_p3 = pnand %p830_p2, %p824_p13 }
  0x44   :  { %834 = shalt.err (!%p831_p3)
}
  0x45   :  { %s939_s5 = smov 128   ;;  %s940_s18 = smov 8  }
  0x46   :  { %28 = dma.hbm_to_vmem [thread:$0]  %s1205_s0, 1024, %s23_s16, [#allocation3], %s939_s5, %s939_s5, %s940_s18  }
  0x47   :  { %s941_s27 = smov [#allocation7]   ;;  %s942_s29 = smov [#allocation10]  }
  0x48   :  { %s47_s28 = sshll.u32 %s941_s27, 4  ;;  %s69_s30 = sshll.u32 %s942_s29, 4  ;;  %s48_s28 = int_to_ptr.vmem [resolvable:$true] %s47_s28  ;;  %s70_s30 = int_to_ptr.vmem [resolvable:$true] %s69_s30 }
  0x49   :  { %s835_s10 = scalar_lea.hbm %s1207_s2, 16 }
  0x4a   :  { %p836_p4 = scmp.ne.s32.totalorder %s1207_s2, %s835_s10  ;;  %p839_p5 = scmp.lt.u32.totalorder %s835_s10, %s1207_s2 }
  0x4c   :  { %p841_p6 = pnand %p839_p5, %p836_p4 }
  0x4e   :  { %844 = shalt.err (!%p841_p6)
}
  0x4f   :  { %s845_s0 = scalar_lea.vmem %s48_s28, 16  ;;  %s849_s11 = scalar_lea.vmem %s48_s28, 32 }
  0x50   :  { %p846_p7 = scmp.ne.s32.totalorder %s48_s28, %s845_s0  ;;  %p850_p8 = scmp.lt.s32.totalorder %s48_s28, %s48_s28 }
  0x51   :  { %p851_p9 = scmp.lt.s32.totalorder %s849_s11, %s845_s0 }
  0x53   :  { %p852_p10 = por %p851_p9, %p850_p8 }
  0x55   :  { %p853_p11 = pnand %p852_p10, %p846_p7 }
  0x57   :  { %856 = shalt.err (!%p853_p11)
}
  0x58   :  { %50 = dma.hbm_to_vmem [thread:$0]  %s1207_s2, 16, %s48_s28, [#allocation6]  }
  0x59   :  { %s857_s20 = scalar_lea.hbm %s1209_s4, 16 }
  0x5a   :  { %p858_p12 = scmp.ne.s32.totalorder %s1209_s4, %s857_s20  ;;  %p861_p13 = scmp.lt.u32.totalorder %s857_s20, %s1209_s4 }
  0x5c   :  { %p863_p0 = pnand %p861_p13, %p858_p12 }
  0x5e   :  { %866 = shalt.err (!%p863_p0)
}
  0x5f   :  { %s867_s26 = scalar_lea.vmem %s70_s30, 16  ;;  %s871_s1 = scalar_lea.vmem %s70_s30, 32 }
  0x60   :  { %p868_p1 = scmp.ne.s32.totalorder %s70_s30, %s867_s26  ;;  %p872_p2 = scmp.lt.s32.totalorder %s70_s30, %s70_s30 }
  0x61   :  { %p873_p3 = scmp.lt.s32.totalorder %s871_s1, %s867_s26 }
  0x63   :  { %p874_p4 = por %p873_p3, %p872_p2 }
  0x65   :  { %p875_p5 = pnand %p874_p4, %p868_p1 }
  0x67   :  { %878 = shalt.err (!%p875_p5)
}
  0x68   :  { %72 = dma.hbm_to_vmem [thread:$0]  %s1209_s4, 16, %s70_s30, [#allocation9]  }
  0x69   :  { %s943_s27 = smov [#allocation13]   ;;  %s879_s9 = scalar_lea.hbm %s1211_s6, 16 }
  0x6a   :  { %s89_s28 = sshll.u32 %s943_s27, 4  ;;  %p880_p6 = scmp.ne.s32.totalorder %s1211_s6, %s879_s9  ;;  %s90_s28 = int_to_ptr.vmem [resolvable:$true] %s89_s28 }
  0x6b   :  { %p883_p7 = scmp.lt.u32.totalorder %s879_s9, %s1211_s6 }
  0x6d   :  { %p885_p8 = pnand %p883_p7, %p880_p6 }
  0x6f   :  { %888 = shalt.err (!%p885_p8)
}
  0x70   :  { %s889_s3 = scalar_lea.vmem %s90_s28, 16  ;;  %s893_s4 = scalar_lea.vmem %s90_s28, 32 }
  0x71   :  { %p890_p9 = scmp.ne.s32.totalorder %s90_s28, %s889_s3  ;;  %p894_p10 = scmp.lt.s32.totalorder %s90_s28, %s90_s28 }
  0x72   :  { %p895_p11 = scmp.lt.s32.totalorder %s893_s4, %s889_s3 }
  0x74   :  { %p896_p12 = por %p895_p11, %p894_p10 }
  0x76   :  { %p897_p13 = pnand %p896_p12, %p890_p9 }
  0x78   :  { %900 = shalt.err (!%p897_p13)
}
  0x79   :  { %92 = dma.hbm_to_vmem [thread:$0]  %s1211_s6, 16, %s90_s28, [#allocation12]  }
  0x7a   :  { %923 = dma.done.wait [#allocation3], 1024  }
  0x7b   :  { %924 = vsyncadd [#allocation3], 4294966272 }
  0x7c   :  { %925 = dma.done.wait [#allocation6], 1040  }
  0x7d   :  { %926 = vsyncadd [#allocation6], 4294966256 }
  0x7e   :  { %927 = dma.done.wait [#allocation9], 528  }
  0x7f   :  { %928 = vsyncadd [#allocation9], 4294966768 }
  0x80   :  { %929 = dma.done.wait [#allocation12], 32  }
  0x81   :  { %930 = vsyncadd [#allocation12], 4294967264  ;;  %v703_v0 = vld [vmem:[#allocation5] sm:$0xff]   ;;  %v704_v1 = vld [vmem:[#allocation5 + $0x8] sm:$0xff]   ;;  %vm380_vm0 = vcmask 523264   ;;  %s944_s6 = smov [#allocation14]  }
  0x82   :  { %651 = vmatprep.subr.bf16.mxu0 %v703_v0  ;;  %v705_v2 = vld [vmem:[#allocation5 + $0x10] sm:$0xff]   ;;  %v706_v3 = vld [vmem:[#allocation5 + $0x18] sm:$0xff]   ;;  %v1072_v4 = vld [vmem:[#allocation2] sm:$0xff]  ;;  %s596_s11 = sshll.u32 %s944_s6, 4  ;;  %s597_s11 = int_to_ptr.vmem [resolvable:$true] %s596_s11 }
  0x83   :  { %652 = vmatpush3.bf16.msra.mxu0 %v703_v0  ;;  %v1074_v5 = vld [vmem:[#allocation2 + $0x8] sm:$0xff]  ;;  %v707_v7 = vld [vmem:[#allocation5 + $0x20] sm:$0xff]   ;;  %v709_v9 = vld [vmem:[#allocation5 + $0x30] sm:$0xff]   ;;  %s901_s12 = scalar_lea.vmem %s597_s11, 1024  ;;  %p906_p1 = scmp.lt.s32.totalorder %s597_s11, %s597_s11 }
  0x84   :  { %653 = vmatprep.subr.bf16.mxu0 %v704_v1  ;;  %v151_v6 = vpack.c.bf16 %v1074_v5, %v1072_v4  ;;  %v708_v8 = vld [vmem:[#allocation5 + $0x28] sm:$0xff]   ;;  %v710_v10 = vld [vmem:[#allocation5 + $0x38] sm:$0xff]   ;;  %v1078_v11 = vld [vmem:[#allocation2 + $0x10] sm:$0xff]  ;;  %p902_p0 = scmp.ne.s32.totalorder %s597_s11, %s901_s12  ;;  %p907_p2 = scmp.lt.s32.totalorder %s901_s12, %s901_s12 }
  0x85   :  { %v1080_v12 = vld [vmem:[#allocation2 + $0x18] sm:$0xff]  ;;  %v1082_v13 = vld [vmem:[#allocation2 + $0x20] sm:$0xff]  ;;  %v1084_v14 = vld [vmem:[#allocation2 + $0x28] sm:$0xff] }
  0x86   :  { %667 = vmatprep.mubr.bf16.mxu0 %v151_v6  ;;  %v152_v15 = vpack.c.bf16 %v1080_v12, %v1078_v11  ;;  %v153_v16 = vpack.c.bf16 %v1084_v14, %v1082_v13  ;;  %v1090_v17 = vld [vmem:[#allocation2 + $0x30] sm:$0xff]  ;;  %v1092_v18 = vld [vmem:[#allocation2 + $0x38] sm:$0xff]  ;;  %v711_v20 = vld [vmem:[#allocation8] sm:$0xff]   ;;  %p908_p3 = por %p907_p2, %p906_p1 }
  0x87   :  { %654 = vmatpush3.bf16.msra.mxu0 %v704_v1  ;;  %v154_v19 = vpack.c.bf16 %v1092_v18, %v1090_v17  ;;  %675 = vmatprep.subr.bf16.mxu1 %v711_v20  ;;  %v712_v21 = vld [vmem:[#allocation8 + $0x8] sm:$0xff]   ;;  %v713_v22 = vld [vmem:[#allocation8 + $0x10] sm:$0xff]   ;;  %v714_v23 = vld [vmem:[#allocation8 + $0x18] sm:$0xff]  }
  0x88   :  { %655 = vmatprep.subr.bf16.mxu0 %v705_v2  ;;  %676 = vmatpush3.bf16.msra.mxu1 %v711_v20  ;;  %v611_v24 = vld [vmem:[#allocation7] ss:$0 sm:$0xff]  ;;  %p909_p4 = pnand %p908_p3, %p902_p0 }
  0x89   :  { %677 = vmatprep.subr.bf16.mxu1 %v712_v21 }
  0x8b   :  { %656 = vmatpush3.bf16.msra.mxu0 %v705_v2 }
  0x8c   :  { %657 = vmatprep.subr.bf16.mxu0 %v706_v3  ;;  %678 = vmatpush3.bf16.msra.mxu1 %v712_v21 }
  0x8d   :  { %679 = vmatprep.subr.bf16.mxu1 %v713_v22 }
  0x8f   :  { %658 = vmatpush3.bf16.msra.mxu0 %v706_v3 }
  0x90   :  { %659 = vmatprep.subr.bf16.mxu0 %v707_v7  ;;  %680 = vmatpush3.bf16.msra.mxu1 %v713_v22 }
  0x91   :  { %681 = vmatprep.subr.bf16.mxu1 %v714_v23 }
  0x93   :  { %660 = vmatpush3.bf16.msra.mxu0 %v707_v7 }
  0x94   :  { %661 = vmatprep.subr.bf16.mxu0 %v708_v8  ;;  %682 = vmatpush3.bf16.msra.mxu1 %v714_v23 }
  0x97   :  { %662 = vmatpush3.bf16.msra.mxu0 %v708_v8 }
  0x98   :  { %663 = vmatprep.subr.bf16.mxu0 %v709_v9 }
  0x9b   :  { %664 = vmatpush3.bf16.msra.mxu0 %v709_v9 }
  0x9c   :  { %665 = vmatprep.subr.bf16.mxu0 %v710_v10 }
  0x9f   :  { %666 = vmatpush3.bf16.msra.mxu0 %v710_v10 }
  0xa2   :  { %668 = vmatmul.mubr.bf16.vlgmr.msra.gmra.mrb[0].mxu0 %v152_v15 }
  0xa3   :  { %671 = vmatprep.mubr.bf16.mxu0 %v153_v16 }
  0xaa   :  { %672 = vmatmul.mubr.bf16.gmra.mrb[4].mxu0 %v154_v19 }
 0x175   :  { %v669_v25 = vpop.f32.mrb[0].mxu0 }
 0x176   :  { %v1096_v26 = vadd.f32 %v669_v25, %v611_v24  ;;  %v243_v27 = vpop.f32.mrb[1].mxu0 }
 0x177   :  { %v1098_v28 = vadd.f32 %v611_v24, %v243_v27  ;;  %v670_v29 = vpop.f32.mrb[2].mxu0 }
 0x178   :  { %v284_v30 = vmul.f32 0.044715, %v1096_v26  ;;  %v1101_v31 = vadd.f32 %v670_v29, %v611_v24  ;;  %v246_v32 = vpop.f32.mrb[3].mxu0 }
 0x179   :  { %v282_v33 = vmul.f32 0.044715, %v1098_v28  ;;  %v1104_v34 = vadd.f32 %v611_v24, %v246_v32 }
 0x17a   :  { %v292_v35 = vmul.f32 %v284_v30, %v1096_v26  ;;  %v285_v36 = vmul.f32 0.044715, %v1101_v31 }
 0x17b   :  { %v290_v37 = vmul.f32 %v282_v33, %v1098_v28  ;;  %v283_v38 = vmul.f32 0.044715, %v1104_v34 }
 0x17c   :  { %v300_v39 = vmul.f32 %v292_v35, %v1096_v26  ;;  %v293_v40 = vmul.f32 %v285_v36, %v1101_v31  ;;  %v276_v35 = vmul.f32 0.5, %v1096_v26  ;;  %v277_v36 = vmul.f32 0.5, %v1101_v31 }
 0x17d   :  { %v291_v41 = vmul.f32 %v283_v38, %v1104_v34  ;;  %v673_v42 = vpop.f32.mrb[4].mxu0  ;;  %v298_v43 = vmul.f32 %v290_v37, %v1098_v28  ;;  %v274_v38 = vmul.f32 0.5, %v1098_v28 }
 0x17e   :  { %v308_v44 = vadd.f32 %v300_v39, %v1096_v26  ;;  %v301_v45 = vmul.f32 %v293_v40, %v1101_v31  ;;  %v1116_v46 = vadd.f32 %v673_v42, %v611_v24  ;;  %v259_v47 = vpop.f32.mrb[5].mxu0  ;;  %v275_v39 = vmul.f32 0.5, %v1104_v34 }
 0x17f   :  { %v1118_v48 = vadd.f32 %v611_v24, %v259_v47  ;;  %v674_v49 = vpop.f32.mrb[6].mxu0  ;;  %v299_v50 = vmul.f32 %v291_v41, %v1104_v34  ;;  %v306_v51 = vadd.f32 %v298_v43, %v1098_v28 }
 0x180   :  { %v316_v52 = vmul.f32 0.7978846, %v308_v44  ;;  %v309_v53 = vadd.f32 %v301_v45, %v1101_v31  ;;  %v288_v54 = vmul.f32 0.044715, %v1116_v46  ;;  %v271_v55 = vadd.f32 %v674_v49, %v611_v24  ;;  %v262_v56 = vpop.f32.mrb[7].mxu0 }
 0x181   :  { %v286_v57 = vmul.f32 0.044715, %v1118_v48  ;;  %v263_v58 = vadd.f32 %v611_v24, %v262_v56  ;;  %v307_v59 = vadd.f32 %v299_v50, %v1104_v34  ;;  %v314_v60 = vmul.f32 0.7978846, %v306_v51 }
 0x182   :  { %715 = vtanh.f32 %v316_v52  ;;  %v317_v61 = vmul.f32 0.7978846, %v309_v53  ;;  %v296_v62 = vmul.f32 %v288_v54, %v1116_v46  ;;  %v289_v63 = vmul.f32 0.044715, %v271_v55 }
 0x183   :  { %v294_v0 = vmul.f32 %v286_v57, %v1118_v48  ;;  %v287_v1 = vmul.f32 0.044715, %v263_v58  ;;  %v315_v2 = vmul.f32 0.7978846, %v307_v59  ;;  %717 = vtanh.f32 %v314_v60 }
 0x184   :  { %719 = vtanh.f32 %v317_v61  ;;  %v304_v3 = vmul.f32 %v296_v62, %v1116_v46  ;;  %v297_v6 = vmul.f32 %v289_v63, %v271_v55  ;;  %v280_v28 = vmul.f32 0.5, %v1116_v46 }
 0x185   :  { %v302_v7 = vmul.f32 %v294_v0, %v1118_v48  ;;  %v295_v8 = vmul.f32 %v287_v1, %v263_v58  ;;  %721 = vtanh.f32 %v315_v2  ;;  %v281_v34 = vmul.f32 0.5, %v271_v55  ;;  %v620_v1 = vld [vmem:[#allocation10] ss:$0 sm:$0xff] }
 0x186   :  { %v312_v9 = vadd.f32 %v304_v3, %v1116_v46  ;;  %v305_v10 = vmul.f32 %v297_v6, %v271_v55  ;;  %v278_v54 = vmul.f32 0.5, %v1118_v48  ;;  %v279_v56 = vmul.f32 0.5, %v263_v58 }
 0x187   :  { %v310_v15 = vadd.f32 %v302_v7, %v1118_v48  ;;  %v303_v16 = vmul.f32 %v295_v8, %v263_v58 }
 0x188   :  { %v320_v19 = vmul.f32 0.7978846, %v312_v9  ;;  %v313_v20 = vadd.f32 %v305_v10, %v271_v55 }
 0x189   :  { %v318_v21 = vmul.f32 0.7978846, %v310_v15  ;;  %v311_v22 = vadd.f32 %v303_v16, %v263_v58 }
 0x18a   :  { %723 = vtanh.f32 %v320_v19  ;;  %v321_v23 = vmul.f32 0.7978846, %v313_v20 }
 0x18b   :  { %725 = vtanh.f32 %v318_v21  ;;  %v319_v24 = vmul.f32 0.7978846, %v311_v22 }
 0x18c   :  { %v716_v25 = vpop.eup %715  ;;  %727 = vtanh.f32 %v321_v23 }
 0x18d   :  { %v718_v27 = vpop.eup %717  ;;  %729 = vtanh.f32 %v319_v24  ;;  %v332_v29 = vadd.f32 1.0, %v716_v25 }
 0x18e   :  { %v720_v30 = vpop.eup %719  ;;  %v330_v32 = vadd.f32 1.0, %v718_v27 }
 0x18f   :  { %v722_v33 = vpop.eup %721  ;;  %v333_v37 = vadd.f32 1.0, %v720_v30  ;;  %v340_v41 = vmul.f32 %v332_v29, %v276_v35 }
 0x190   :  { %v331_v40 = vadd.f32 1.0, %v722_v33  ;;  %v338_v43 = vmul.f32 %v330_v32, %v274_v38 }
 0x191   :  { %v341_v42 = vmul.f32 %v333_v37, %v277_v36 }
 0x192   :  { %v339_v44 = vmul.f32 %v331_v40, %v275_v39 }
 0x193   :  { %v347_v45 = vpack.c.bf16 %v341_v42, %v340_v41 }
 0x194   :  { %v724_v47 = vpop.eup %723  ;;  %v346_v49 = vpack.c.bf16 %v339_v44, %v338_v43 }
 0x195   :  { %v726_v50 = vpop.eup %725  ;;  %v336_v51 = vadd.f32 1.0, %v724_v47 }
 0x196   :  { %v728_v52 = vpop.eup %727  ;;  %683 = vmatprep.mubr.msk.bf16.mxu1 %vm380_vm0, %v346_v49  ;;  %v334_v26 = vadd.f32 1.0, %v726_v50 }
 0x197   :  { %v730_v31 = vpop.eup %729  ;;  %684 = vmatmul.mubr.msk.bf16.vlgmr.msra.gmra.mrb[0].mxu1 %vm380_vm0, %v347_v45  ;;  %v337_v53 = vadd.f32 1.0, %v728_v52  ;;  %v344_v59 = vmul.f32 %v336_v51, %v280_v28 }
 0x198   :  { %v335_v57 = vadd.f32 1.0, %v730_v31  ;;  %v342_v61 = vmul.f32 %v334_v26, %v278_v54 }
 0x199   :  { %v345_v60 = vmul.f32 %v337_v53, %v281_v34 }
 0x19a   :  { %v343_v62 = vmul.f32 %v335_v57, %v279_v56 }
 0x19b   :  { %v349_v63 = vpack.c.bf16 %v345_v60, %v344_v59 }
 0x19c   :  { %v348_v0 = vpack.c.bf16 %v343_v62, %v342_v61 }
 0x19e   :  { %687 = vmatprep.mubr.msk.bf16.mxu1 %vm380_vm0, %v348_v0 }
 0x19f   :  { %688 = vmatmul.mubr.msk.bf16.gmra.mrb[4].mxu1 %vm380_vm0, %v349_v63 }
 0x26a   :  { %v685_v2 = vpop.f32.mrb[0].mxu1 }
 0x26b   :  { %v436_v3 = vadd.f32 %v685_v2, %v620_v1  ;;  %v427_v46 = vpop.f32.mrb[1].mxu1 }
 0x26c   :  { %v428_v55 = vadd.f32 %v620_v1, %v427_v46  ;;  %v686_v6 = vpop.f32.mrb[2].mxu1 }
 0x26d   :  { %462 = vadd.xlane.f32.xlu1 %v436_v3  ;;  %v430_v48 = vpop.f32.mrb[3].mxu1  ;;  %v439_v58 = vadd.f32 %v686_v6, %v620_v1 }
 0x26e   :  { %458 = vadd.xlane.f32.xlu0 %v428_v55  ;;  %v431_v7 = vadd.f32 %v620_v1, %v430_v48 }
 0x271   :  { %464 = vadd.xlane.f32.xlu1 %v439_v58 }
 0x272   :  { %v689_v8 = vpop.f32.mrb[4].mxu1  ;;  %460 = vadd.xlane.f32.xlu0 %v431_v7 }
 0x273   :  { %v443_v9 = vpop.f32.mrb[5].mxu1  ;;  %v452_v20 = vadd.f32 %v689_v8, %v620_v1 }
 0x274   :  { %v444_v10 = vadd.f32 %v620_v1, %v443_v9  ;;  %v690_v15 = vpop.f32.mrb[6].mxu1 }
 0x275   :  { %v446_v16 = vpop.f32.mrb[7].mxu1  ;;  %v455_v21 = vadd.f32 %v690_v15, %v620_v1 }
 0x276   :  { %v447_v19 = vadd.f32 %v620_v1, %v446_v16  ;;  %466 = vadd.xlane.f32.xlu0 %v444_v10  ;;  %v629_v16 = vld [vmem:[#allocation11] ss:$0 sm:$0xff] }
 0x278   :  { %468 = vadd.xlane.f32.xlu1 %v447_v19 }
 0x27a   :  { %470 = vadd.xlane.f32.xlu0 %v452_v20 }
 0x27c   :  { %472 = vadd.xlane.f32.xlu1 %v455_v21 }
 0x2fa   :  { %v463_v22 = vpop.xlane.xlu1 %462 }
 0x2fb   :  { %v477_v23 = vmul.f32 0.0078125, %v463_v22  ;;  %v459_v24 = vpop.xlane.xlu0 %458 }
 0x2fc   :  { %v475_v25 = vmul.f32 0.0078125, %v459_v24 }
 0x2fd   :  { %v1142_v27 = vsub.f32 %v436_v3, %v477_v23  ;;  %v630_v23 = vld [vmem:[#allocation13] ss:$0 sm:$0xff] }
 0x2fe   :  { %v465_v29 = vpop.xlane.xlu1 %464  ;;  %v1144_v30 = vsub.f32 %v428_v55, %v475_v25 }
 0x2ff   :  { %v478_v32 = vmul.f32 0.0078125, %v465_v29  ;;  %v461_v33 = vpop.xlane.xlu0 %460  ;;  %v493_v35 = vmul.f32 %v1142_v27, %v1142_v27 }
 0x300   :  { %v476_v36 = vmul.f32 0.0078125, %v461_v33  ;;  %v491_v41 = vmul.f32 %v1144_v30, %v1144_v30 }
 0x301   :  { %v1148_v37 = vsub.f32 %v439_v58, %v478_v32  ;;  %503 = vadd.xlane.f32.xlu0 %v493_v35 }
 0x302   :  { %v1150_v38 = vsub.f32 %v431_v7, %v476_v36 }
 0x303   :  { %v467_v39 = vpop.xlane.xlu0 %466  ;;  %v494_v40 = vmul.f32 %v1148_v37, %v1148_v37 }
 0x304   :  { %v479_v42 = vmul.f32 0.0078125, %v467_v39  ;;  %v492_v49 = vmul.f32 %v1150_v38, %v1150_v38 }
 0x305   :  { %505 = vadd.xlane.f32.xlu1 %v494_v40  ;;  %v469_v43 = vpop.xlane.xlu1 %468  ;;  %499 = vadd.xlane.f32.xlu0 %v491_v41 }
 0x306   :  { %v1156_v44 = vsub.f32 %v444_v10, %v479_v42  ;;  %v480_v45 = vmul.f32 0.0078125, %v469_v43 }
 0x307   :  { %v471_v47 = vpop.xlane.xlu0 %470 }
 0x308   :  { %v1160_v50 = vsub.f32 %v447_v19, %v480_v45  ;;  %v481_v51 = vmul.f32 0.0078125, %v471_v47  ;;  %v495_v52 = vmul.f32 %v1156_v44, %v1156_v44 }
 0x309   :  { %v473_v26 = vpop.xlane.xlu1 %472  ;;  %501 = vadd.xlane.f32.xlu1 %v492_v49 }
 0x30a   :  { %v1164_v31 = vsub.f32 %v452_v20, %v481_v51  ;;  %v482_v28 = vmul.f32 0.0078125, %v473_v26  ;;  %507 = vadd.xlane.f32.xlu0 %v495_v52  ;;  %v496_v34 = vmul.f32 %v1160_v50, %v1160_v50 }
 0x30c   :  { %v1168_v53 = vsub.f32 %v455_v21, %v482_v28  ;;  %v497_v54 = vmul.f32 %v1164_v31, %v1164_v31 }
 0x30d   :  { %509 = vadd.xlane.f32.xlu1 %v496_v34 }
 0x30e   :  { %511 = vadd.xlane.f32.xlu0 %v497_v54  ;;  %v498_v56 = vmul.f32 %v1168_v53, %v1168_v53 }
 0x311   :  { %513 = vadd.xlane.f32.xlu1 %v498_v56 }
 0x38e   :  { %v504_v57 = vpop.xlane.xlu0 %503 }
 0x38f   :  { %v517_v59 = vmul.f32 0.0078125, %v504_v57 }
 0x391   :  { %v525_v60 = vadd.f32 1e-05, %v517_v59 }
 0x392   :  { %v506_v61 = vpop.xlane.xlu1 %505  ;;  %v500_v62 = vpop.xlane.xlu0 %499 }
 0x393   :  { %731 = vrsqrt.f32 %v525_v60  ;;  %v518_v63 = vmul.f32 0.0078125, %v506_v61  ;;  %v515_v0 = vmul.f32 0.0078125, %v500_v62 }
 0x395   :  { %v526_v1 = vadd.f32 1e-05, %v518_v63  ;;  %v523_v2 = vadd.f32 1e-05, %v515_v0 }
 0x396   :  { %v502_v3 = vpop.xlane.xlu1 %501 }
 0x397   :  { %733 = vrsqrt.f32 %v526_v1  ;;  %v516_v46 = vmul.f32 0.0078125, %v502_v3  ;;  %v508_v55 = vpop.xlane.xlu0 %507 }
 0x398   :  { %735 = vrsqrt.f32 %v523_v2  ;;  %v519_v6 = vmul.f32 0.0078125, %v508_v55 }
 0x399   :  { %v524_v48 = vadd.f32 1e-05, %v516_v46 }
 0x39a   :  { %v527_v58 = vadd.f32 1e-05, %v519_v6  ;;  %v510_v7 = vpop.xlane.xlu1 %509 }
 0x39b   :  { %737 = vrsqrt.f32 %v524_v48  ;;  %v520_v8 = vmul.f32 0.0078125, %v510_v7  ;;  %v512_v9 = vpop.xlane.xlu0 %511 }
 0x39c   :  { %739 = vrsqrt.f32 %v527_v58  ;;  %v521_v10 = vmul.f32 0.0078125, %v512_v9 }
 0x39d   :  { %v732_v15 = vpop.eup %731  ;;  %v528_v19 = vadd.f32 1e-05, %v520_v8 }
 0x39e   :  { %v541_v20 = vmul.f32 %v732_v15, %v1142_v27  ;;  %v529_v21 = vadd.f32 1e-05, %v521_v10  ;;  %v514_v22 = vpop.xlane.xlu1 %513 }
 0x39f   :  { %741 = vrsqrt.f32 %v528_v19  ;;  %v522_v24 = vmul.f32 0.0078125, %v514_v22 }
 0x3a0   :  { %v555_v25 = vmul.f32 %v629_v16, %v541_v20  ;;  %743 = vrsqrt.f32 %v529_v21 }
 0x3a1   :  { %v734_v29 = vpop.eup %733  ;;  %v530_v32 = vadd.f32 1e-05, %v522_v24 }
 0x3a2   :  { %v736_v33 = vpop.eup %735  ;;  %v569_v35 = vadd.f32 %v630_v23, %v555_v25  ;;  %v542_v36 = vmul.f32 %v734_v29, %v1148_v37 }
 0x3a3   :  { %v539_v39 = vmul.f32 %v736_v33, %v1144_v30  ;;  %745 = vrsqrt.f32 %v530_v32 }
 0x3a4   :  { %v577_v40 = vadd.f32 %v569_v35, %v1078_v11  ;;  %v556_v41 = vmul.f32 %v629_v16, %v542_v36 }
 0x3a5   :  { %v738_v27 = vpop.eup %737  ;;  %v553_v42 = vmul.f32 %v629_v16, %v539_v39 }
 0x3a6   :  { %v740_v43 = vpop.eup %739  ;;  %585 = vst [vmem:[#allocation14 + $0x10] sm:$0xff] %v577_v40  ;;  %v570_v45 = vadd.f32 %v630_v23, %v556_v41  ;;  %v540_v47 = vmul.f32 %v738_v27, %v1150_v38 }
 0x3a7   :  { %v567_v49 = vadd.f32 %v630_v23, %v553_v42  ;;  %v543_v51 = vmul.f32 %v740_v43, %v1156_v44 }
 0x3a8   :  { %v578_v52 = vadd.f32 %v570_v45, %v1080_v12  ;;  %v554_v26 = vmul.f32 %v629_v16, %v540_v47 }
 0x3a9   :  { %v742_v37 = vpop.eup %741  ;;  %v575_v30 = vadd.f32 %v567_v49, %v1072_v4  ;;  %v557_v28 = vmul.f32 %v629_v16, %v543_v51 }
 0x3aa   :  { %v744_v34 = vpop.eup %743  ;;  %586 = vst [vmem:[#allocation14 + $0x18] sm:$0xff] %v578_v52  ;;  %v568_v11 = vadd.f32 %v630_v23, %v554_v26  ;;  %v544_v54 = vmul.f32 %v742_v37, %v1160_v50 }
 0x3ab   :  { %583 = vst [vmem:[#allocation14] sm:$0xff] %v575_v30  ;;  %v571_v56 = vadd.f32 %v630_v23, %v557_v28  ;;  %v545_v57 = vmul.f32 %v744_v34, %v1164_v31 }
 0x3ac   :  { %v576_v38 = vadd.f32 %v568_v11, %v1074_v5  ;;  %v558_v59 = vmul.f32 %v629_v16, %v544_v54 }
 0x3ad   :  { %v746_v44 = vpop.eup %745  ;;  %v579_v12 = vadd.f32 %v571_v56, %v1082_v13  ;;  %v559_v60 = vmul.f32 %v629_v16, %v545_v57 }
 0x3ae   :  { %584 = vst [vmem:[#allocation14 + $0x8] sm:$0xff] %v576_v38  ;;  %v572_v61 = vadd.f32 %v630_v23, %v558_v59  ;;  %v546_v4 = vmul.f32 %v746_v44, %v1168_v53 }
 0x3af   :  { %587 = vst [vmem:[#allocation14 + $0x20] sm:$0xff] %v579_v12  ;;  %v573_v62 = vadd.f32 %v630_v23, %v559_v60 }
 0x3b0   :  { %v580_v63 = vadd.f32 %v572_v61, %v1084_v14  ;;  %v560_v50 = vmul.f32 %v629_v16, %v546_v4 }
 0x3b1   :  { %v581_v0 = vadd.f32 %v573_v62, %v1090_v17 }
 0x3b2   :  { %588 = vst [vmem:[#allocation14 + $0x28] sm:$0xff] %v580_v63  ;;  %v574_v5 = vadd.f32 %v630_v23, %v560_v50 }
 0x3b3   :  { %589 = vst [vmem:[#allocation14 + $0x30] sm:$0xff] %v581_v0 }
 0x3b4   :  { %v582_v31 = vadd.f32 %v574_v5, %v1092_v18 }
 0x3b6   :  { %590 = vst [vmem:[#allocation14 + $0x38] sm:$0xff] %v582_v31 }
 0x3b7   :  { %912 = shalt.err (!%p909_p4)
}
 0x3b8   :  { %s913_s19 = scalar_lea.hbm %s1212_s7, 1024 }
 0x3b9   :  { %p914_p5 = scmp.ne.s32.totalorder %s1212_s7, %s913_s19  ;;  %p917_p6 = scmp.lt.u32.totalorder %s913_s19, %s1212_s7 }
 0x3bb   :  { %p919_p7 = pnand %p917_p6, %p914_p5 }
 0x3bd   :  { %922 = shalt.err (!%p919_p7)
}
 0x3be   :  { %602 = dma.vmem_to_hbm [thread:$0]  %s597_s11, 1024, %s1212_s7, [#allocation4], %s939_s5, %s939_s5, %s940_s18  }
 0x3bf   :  { %931 = dma.done.wait [#allocation4], 1024  }
 0x3c0   :  { %932 = vsyncadd [#allocation4], 4294966272 }
 0x3c1   :  { %606 = vsyncpa [#allocation3], 1 }
 0x3c2   :  { %607 = vsyncpa [#allocation6], 1 }
 0x3c3   :  { %608 = vsyncpa [#allocation9], 1 }
 0x3c4   :  { %609 = vsyncpa [#allocation12], 1 }
 0x3c5   :  { %610 = vsyncpa [#allocation4], 1 }

// kernel: origin_forward.19
= control target key start
LH: loop header
LB: loop body
LE: loop exit
PB: predicated region body
PF: predicated region fallthrough
CT: control target
= control target key end

     0   :  { %v218_v1 = vmov 0.0   ;;  %vm219_vm0 = vmmov 0   ;;  %s283_s0 = inlined_call_operand.vmem [shape: f32[2,128], index: 0, kind: input, shape index: {}]   ;;  %s284_s1 = inlined_call_operand.vmem [shape: bf16[128,16], index: 1, kind: input, shape index: {}]   ;;  %s285_s2 = inlined_call_operand.vmem [shape: f32[1,16], index: 2, kind: input, shape index: {}]   ;;  %s286_s3 = inlined_call_operand.hbm [shape: f32[2,16], index: 3, kind: output, shape index: {}]  }
   0x1   :  { %v186_v0 = vld [vmem:[%s284_s1] sm:$0xff]   ;;  %163 = vmatprep.subr.bf16.mxu0 %v218_v1  ;;  %v187_v2 = vld [vmem:[%s284_s1 + $0x8] sm:$0xff]   ;;  %179 = vmatprep.mubr.msk.bf16.mxu0 %vm219_vm0, %v218_v1  ;;  %v188_v3 = vld [vmem:[%s284_s1 + $0x10] sm:$0xff]  }
   0x2   :  { %164 = vmatpush3.bf16.msra.mxu0 %v186_v0 }
   0x3   :  { %165 = vmatprep.subr.bf16.mxu0 %v218_v1 }
   0x6   :  { %166 = vmatpush3.bf16.msra.mxu0 %v187_v2 }
   0x7   :  { %167 = vmatprep.subr.bf16.mxu0 %v218_v1 }
   0x8   :  { %8 = vsyncpa [#allocation3], 0  ;;  %v189_v4 = vld [vmem:[%s284_s1 + $0x18] sm:$0xff]   ;;  %v190_v5 = vld [vmem:[%s284_s1 + $0x20] sm:$0xff]   ;;  %s220_s5 = smov [#allocation2]   ;;  %vm129_vm1 = vcmask 123904  }
   0x9   :  { %v191_v6 = vld [vmem:[%s284_s1 + $0x28] sm:$0xff]   ;;  %v192_v7 = vld [vmem:[%s284_s1 + $0x30] sm:$0xff]   ;;  %v193_v8 = vld [vmem:[%s284_s1 + $0x38] sm:$0xff]   ;;  %s137_s6 = sshll.u32 %s220_s5, 4  ;;  %s138_s6 = int_to_ptr.vmem [resolvable:$true] %s137_s6 }
   0xa   :  { %168 = vmatpush3.bf16.msra.mxu0 %v188_v3  ;;  %v16_v9 = vld [vmem:[%s283_s0] sm:$0x3]  ;;  %s194_s1 = scalar_lea.vmem %s138_s6, 32  ;;  %p199_p1 = scmp.lt.s32.totalorder %s138_s6, %s138_s6 }
   0xb   :  { %169 = vmatprep.subr.bf16.mxu0 %v218_v1  ;;  %v34_v10 = vpack.c.bf16 %v16_v9, %v16_v9  ;;  %v145_v11 = vld [vmem:[%s285_s2] ss:$0 sm:$0xff]  ;;  %p195_p0 = scmp.ne.s32.totalorder %s138_s6, %s194_s1  ;;  %p200_p2 = scmp.lt.s32.totalorder %s194_s1, %s194_s1 }
   0xd   :  { %p201_p3 = por %p200_p2, %p199_p1 }
   0xe   :  { %170 = vmatpush3.bf16.msra.mxu0 %v189_v4 }
   0xf   :  { %171 = vmatprep.subr.bf16.mxu0 %v218_v1  ;;  %p202_p4 = pnand %p201_p3, %p195_p0 }
  0x12   :  { %172 = vmatpush3.bf16.msra.mxu0 %v190_v5 }
  0x13   :  { %173 = vmatprep.subr.bf16.mxu0 %v218_v1 }
  0x16   :  { %174 = vmatpush3.bf16.msra.mxu0 %v191_v6 }
  0x17   :  { %175 = vmatprep.subr.bf16.mxu0 %v218_v1 }
  0x1a   :  { %176 = vmatpush3.bf16.msra.mxu0 %v192_v7 }
  0x1b   :  { %177 = vmatprep.subr.bf16.mxu0 %v218_v1 }
  0x1e   :  { %178 = vmatpush3.bf16.msra.mxu0 %v193_v8 }
  0x21   :  { %180 = vmatmul.mubr.bf16.vlgmr.msra.gmra.mrb[0].mxu0 %v34_v10 }
  0xf4   :  { %v123_v12 = vpop.f32.mrb[0].mxu0 }
  0xf5   :  { %v124_v13 = vadd.f32 %v145_v11, %v123_v12  ;;  %v181_v14 = vpop.f32.mrb[1].mxu0 }
  0xf6   :  { %v126_v15 = vpop.f32.mrb[2].mxu0 }
  0xf7   :  { %v182_v16 = vpop.f32.mrb[3].mxu0  ;;  %130 = vst.msk [vmem:[#allocation2] sm:$0x3] %vm129_vm1, %v124_v13 }
  0xf8   :  { %205 = shalt.err (!%p202_p4)
}
  0xf9   :  { %s206_s2 = scalar_lea.hbm %s286_s3, 32 }
  0xfa   :  { %p207_p5 = scmp.ne.s32.totalorder %s286_s3, %s206_s2  ;;  %p210_p6 = scmp.lt.u32.totalorder %s206_s2, %s286_s3 }
  0xfc   :  { %p212_p7 = pnand %p210_p6, %p207_p5 }
  0xfe   :  { %215 = shalt.err (!%p212_p7)
}
  0xff   :  { %140 = dma.vmem_to_hbm [thread:$0]  %s138_s6, 32, %s286_s3, [#allocation3]  }
 0x100   :  { %216 = dma.done.wait [#allocation3], 32  }
 0x101   :  { %217 = vsyncadd [#allocation3], 4294967264 }
 0x102   :  { %144 = vsyncpa [#allocation3], 1 }

// kernel: origin_forward.11
= control target key start
LH: loop header
LB: loop body
LE: loop exit
PB: predicated region body
PF: predicated region fallthrough
CT: control target
= control target key end

     0   :  { %s6944_s0 = inlined_call_operand.hbm [shape: f32[2,32,128], index: 0, kind: input, shape index: {}]   ;;  %s6945_s1 = inlined_call_operand.hbm [shape: bf16[6,128,16], index: 1, kind: input, shape index: {}]   ;;  %s6946_s2 = inlined_call_operand.hbm [shape: f32[6,1,16], index: 2, kind: input, shape index: {}]   ;;  %s6947_s3 = inlined_call_operand.hbm [shape: bf16[6,128,16], index: 3, kind: input, shape index: {}]   ;;  %s6948_s4 = inlined_call_operand.hbm [shape: f32[6,1,16], index: 4, kind: input, shape index: {}]   ;;  %s6949_s5 = inlined_call_operand.hbm [shape: bf16[6,128,16], index: 5, kind: input, shape index: {}]   ;;  %s6950_s6 = inlined_call_operand.hbm [shape: f32[6,1,16], index: 6, kind: input, shape index: {}]   ;;  %s6951_s7 = inlined_call_operand.hbm [shape: bf16[6,16,128], index: 7, kind: input, shape index: {}]   ;;  %s6952_s8 = inlined_call_operand.hbm [shape: f32[1,128], index: 8, kind: input, shape index: {}]   ;;  %s6953_s9 = inlined_call_operand.hbm [shape: f32[1,128], index: 9, kind: input, shape index: {}]   ;;  %s6954_s10 = inlined_call_operand.hbm [shape: f32[1,128], index: 10, kind: input, shape index: {}]   ;;  %s6955_s11 = inlined_call_operand.hbm [shape: f32[2,32,128], index: 11, kind: output, shape index: {}]  }
   0x1   :  { %6962 = sst [smem:[#allocation29_spill]] %s6944_s0 }
   0x2   :  { %6963 = sst [smem:[#allocation30_spill]] %s6945_s1 }
   0x3   :  { %6964 = sst [smem:[#allocation31_spill]] %s6955_s11 }
   0x4   :  { %16 = vsyncpa [#allocation3], 0 }
   0x5   :  { %18 = vsyncpa [#allocation3 + $0x1], 0 }
   0x6   :  { %19 = vsyncpa [#allocation6], 0 }
   0x7   :  { %20 = vsyncpa [#allocation9], 0 }
   0x8   :  { %21 = vsyncpa [#allocation12], 0 }
   0x9   :  { %22 = vsyncpa [#allocation15], 0 }
   0xa   :  { %23 = vsyncpa [#allocation18], 0 }
   0xb   :  { %24 = vsyncpa [#allocation4], 0 }
   0xc   :  { %26 = vsyncpa [#allocation4 + $0x1], 0  ;;  %s6323_s17 = smov 0   ;;  %s6325_s18 = smov 0  }
   0xd   :  { %s6327_s19 = smov 0   ;;  %s6329_s20 = smov 0  }
   0xe LB: > { %s6243_s21 = smov [#allocation5]   ;;  %s6344_s23 = sadd.s32 4294967295, %s6241_s20   ;;  %s6241_s20 = sphi %s6329_s20, %s6996_s20   ;;  %s6237_s19 = sphi %s6327_s19, %s6995_s19   ;;  %s6233_s18 = sphi %s6325_s18, %s6994_s18   ;;  %s6229_s17 = sphi %s6323_s17, %s6993_s17  }
   0xf   : > { %s311_s22 = sshll.u32 %s6243_s21, 4  ;;  %p4420_p0 = scmp.ge.s32.totalorder %s6241_s20, 1  ;;  %s6349_s22 = int_to_ptr.vmem [resolvable:$true] %s311_s22 }
  0x10   : > { %p6959_p1 = scmp.eq.s32.totalorder %s6344_s23, 0  ;;  %p299_p2 = scmp.lt.s32.totalorder %s6241_s20, 3 }
  0x11   : > { %s6244_s25 = smov [#allocation8]   ;;  %s6245_s28 = smov [#allocation11]  }
  0x12   : > { %p6351_p3 = pnand %p4420_p0, %p299_p2  ;;  %s337_s26 = sshll.u32 %s6244_s25, 4  ;;  %s6364_s26 = int_to_ptr.vmem [resolvable:$true] %s337_s26 }
  0x13   : > { %s363_s29 = sshll.u32 %s6245_s28, 4  ;;  %s6968_s1 = sld [smem:[#allocation30_spill]]  ;;  %s6366_s29 = int_to_ptr.vmem [resolvable:$true] %s363_s29 }
  0x14   : > { %s6965_s24 = scalar_select %p6351_p3, 1, 0 }
  0x15   : > { %p5476_p5 = pneg %p6351_p3 }
  0x16   : > { %6966 = sst [smem:[#allocation28_spill]] %s6965_s24 }
  0x17   : > { %p6360_p6 = pnand %p5476_p5, %p6959_p1 }
  0x19   : > { %s5845_s13 = scalar_lea.hbm %s6968_s1, 6144  ;;  %p6376_p8 = pneg %p6360_p6 }
  0x1a   : > { %p5846_p7 = scmp.ne.s32.totalorder %s6968_s1, %s5845_s13  ;;  %p5852_p11 = scmp.lt.u32.totalorder %s5845_s13, %s6968_s1 }
  0x1c   : > { %p5848_p9 = pnand %p6376_p8, %p5846_p7 }
  0x1e   : > { %p5849_p10 = pneg %p5848_p9 }
  0x20   : > { %p5854_p12 = pnand %p5852_p11, %p5849_p10 }
  0x22   : > { %5857 = shalt.err (!%p5854_p12)
}
  0x23   : > { %s5858_s28 = scalar_lea.vmem %s6349_s22, 6144  ;;  %p5866_p5 = scmp.lt.s32.totalorder %s6349_s22, %s6349_s22 }
  0x24   : > { %p5859_p13 = scmp.ne.s32.totalorder %s6349_s22, %s5858_s28  ;;  %p5867_p4 = scmp.lt.s32.totalorder %s5858_s28, %s5858_s28 }
  0x26   : > { %p5861_p0 = pnand %p5859_p13, %p6376_p8  ;;  %p5868_p7 = por %p5867_p4, %p5866_p5 }
  0x28   : > { %p5862_p2 = pneg %p5861_p0 }
  0x2a   : > { %p5869_p9 = pnand %p5868_p7, %p5862_p2 }
  0x2c   : > { %5872 = shalt.err (!%p5869_p9)
}
  0x2d   : > { %s6246_s30 = smov 64   ;;  %s6247_s12 = smov 4  }
  0x2e   : > { %5479 = dma.hbm_to_vmem [thread:$0]  (!%p6360_p6), %s6968_s1, 6144, %s6349_s22, [#allocation6], %s6246_s30, %s6246_s30, %s6247_s12  }
  0x2f   : > { %s5873_s25 = scalar_lea.hbm %s6947_s3, 6144 }
  0x30   : > { %p5874_p4 = scmp.ne.s32.totalorder %s6947_s3, %s5873_s25  ;;  %p5880_p12 = scmp.lt.u32.totalorder %s5873_s25, %s6947_s3 }
  0x32   : > { %p5876_p10 = pnand %p5874_p4, %p6376_p8 }
  0x34   : > { %p5877_p11 = pneg %p5876_p10 }
  0x36   : > { %p5882_p13 = pnand %p5880_p12, %p5877_p11 }
  0x38   : > { %5885 = shalt.err (!%p5882_p13)
}
  0x39   : > { %s5886_s22 = scalar_lea.vmem %s6364_s26, 6144  ;;  %p5894_p7 = scmp.lt.s32.totalorder %s6364_s26, %s6364_s26 }
  0x3a   : > { %p5887_p0 = scmp.ne.s32.totalorder %s6364_s26, %s5886_s22  ;;  %p5895_p9 = scmp.lt.s32.totalorder %s5886_s22, %s5886_s22 }
  0x3c   : > { %p5889_p2 = pnand %p5887_p0, %p6376_p8  ;;  %p5896_p4 = por %p5895_p9, %p5894_p7 }
  0x3e   : > { %p5890_p5 = pneg %p5889_p2 }
  0x40   : > { %p5897_p10 = pnand %p5896_p4, %p5890_p5 }
  0x42   : > { %5900 = shalt.err (!%p5897_p10)
}
  0x43   : > { %5485 = dma.hbm_to_vmem [thread:$0]  (!%p6360_p6), %s6947_s3, 6144, %s6364_s26, [#allocation9], %s6246_s30, %s6246_s30, %s6247_s12  }
  0x44   : > { %s5901_s14 = scalar_lea.hbm %s6949_s5, 6144 }
  0x45   : > { %p5902_p11 = scmp.ne.s32.totalorder %s6949_s5, %s5901_s14  ;;  %p5908_p0 = scmp.lt.u32.totalorder %s5901_s14, %s6949_s5 }
  0x47   : > { %p5904_p12 = pnand %p5902_p11, %p6376_p8 }
  0x49   : > { %p5905_p13 = pneg %p5904_p12 }
  0x4b   : > { %p5910_p2 = pnand %p5908_p0, %p5905_p13 }
  0x4d   : > { %5913 = shalt.err (!%p5910_p2)
}
  0x4e   : > { %s5914_s26 = scalar_lea.vmem %s6366_s29, 6144  ;;  %p5922_p4 = scmp.lt.s32.totalorder %s6366_s29, %s6366_s29 }
  0x4f   : > { %p5915_p5 = scmp.ne.s32.totalorder %s6366_s29, %s5914_s26  ;;  %p5923_p10 = scmp.lt.s32.totalorder %s5914_s26, %s5914_s26 }
  0x51   : > { %p5917_p7 = pnand %p5915_p5, %p6376_p8  ;;  %p5924_p11 = por %p5923_p10, %p5922_p4 }
  0x53   : > { %p5918_p9 = pneg %p5917_p7 }
  0x55   : > { %p5925_p12 = pnand %p5924_p11, %p5918_p9 }
  0x57   : > { %5928 = shalt.err (!%p5925_p12)
}
  0x58   : > { %5491 = dma.hbm_to_vmem [thread:$0]  (!%p6360_p6), %s6949_s5, 6144, %s6366_s29, [#allocation12], %s6246_s30, %s6246_s30, %s6247_s12  }
  0x59   : > { %s6248_s11 = smov [#allocation14]   ;;  %s6249_s13 = smov [#allocation17]  }
  0x5a   : > { %s389_s24 = sshll.u32 %s6248_s11, 4  ;;  %s414_s14 = sshll.u32 %s6249_s13, 4  ;;  %s390_s24 = int_to_ptr.vmem [resolvable:$true] %s389_s24  ;;  %s415_s14 = int_to_ptr.vmem [resolvable:$true] %s414_s14 }
  0x5b   : > { %s5929_s25 = scalar_lea.hbm %s6951_s7, 768 }
  0x5c   : > { %p5930_p13 = scmp.ne.s32.totalorder %s6951_s7, %s5929_s25  ;;  %p5936_p5 = scmp.lt.u32.totalorder %s5929_s25, %s6951_s7 }
  0x5e   : > { %p5932_p0 = pnand %p5930_p13, %p6376_p8 }
  0x60   : > { %p5933_p2 = pneg %p5932_p0 }
  0x62   : > { %p5938_p7 = pnand %p5936_p5, %p5933_p2 }
  0x64   : > { %5941 = shalt.err (!%p5938_p7)
}
  0x65   : > { %s5942_s29 = scalar_lea.vmem %s390_s24, 768  ;;  %p5950_p11 = scmp.lt.s32.totalorder %s390_s24, %s390_s24 }
  0x66   : > { %p5943_p9 = scmp.ne.s32.totalorder %s390_s24, %s5942_s29  ;;  %p5951_p12 = scmp.lt.s32.totalorder %s5942_s29, %s5942_s29 }
  0x68   : > { %p5945_p4 = pnand %p5943_p9, %p6376_p8  ;;  %p5952_p1 = por %p5951_p12, %p5950_p11 }
  0x6a   : > { %p5946_p10 = pneg %p5945_p4 }
  0x6c   : > { %p5953_p3 = pnand %p5952_p1, %p5946_p10 }
  0x6e   : > { %5956 = shalt.err (!%p5953_p3)
}
  0x6f   : > { %5497 = dma.hbm_to_vmem [thread:$0]  (!%p6360_p6), %s6951_s7, 768, %s390_s24, [#allocation15], %s6246_s30, %s6246_s30, %s6247_s12  }
  0x70   : > { %s5957_s15 = scalar_lea.hbm %s6953_s9, 16 }
  0x71   : > { %p5958_p1 = scmp.ne.s32.totalorder %s6953_s9, %s5957_s15  ;;  %p5964_p0 = scmp.lt.u32.totalorder %s5957_s15, %s6953_s9 }
  0x73   : > { %p5960_p3 = pnand %p5958_p1, %p6376_p8 }
  0x75   : > { %p5961_p13 = pneg %p5960_p3 }
  0x77   : > { %p5966_p2 = pnand %p5964_p0, %p5961_p13 }
  0x79   : > { %5969 = shalt.err (!%p5966_p2)
}
  0x7a   : > { %s5970_s22 = scalar_lea.vmem %s415_s14, 16  ;;  %s5977_s30 = scalar_lea.vmem %s415_s14, 32 }
  0x7b   : > { %p5971_p5 = scmp.ne.s32.totalorder %s415_s14, %s5970_s22  ;;  %p5978_p4 = scmp.lt.s32.totalorder %s415_s14, %s415_s14 }
  0x7c   : > { %p5979_p10 = scmp.lt.s32.totalorder %s5977_s30, %s5970_s22 }
  0x7d   : > { %p5973_p7 = pnand %p5971_p5, %p6376_p8 }
  0x7e   : > { %p5980_p11 = por %p5979_p10, %p5978_p4 }
  0x7f   : > { %p5974_p9 = pneg %p5973_p7 }
  0x81   : > { %p5981_p12 = pnand %p5980_p11, %p5974_p9 }
  0x83   : > { %5984 = shalt.err (!%p5981_p12)
}
  0x84   : > { %5503 = dma.hbm_to_vmem [thread:$0]  (!%p6360_p6), %s6953_s9, 16, %s415_s14, [#allocation18]  }
  0x85   : > { %s6250_s29 = smov [#allocation7]   ;;  %s5985_s13 = scalar_lea.hbm %s6946_s2, 96 }
  0x86   : > { %s324_s1 = sshll.u32 %s6250_s29, 4  ;;  %p5986_p1 = scmp.ne.s32.totalorder %s6946_s2, %s5985_s13  ;;  %s325_s1 = int_to_ptr.vmem [resolvable:$true] %s324_s1 }
  0x87   : > { %p5992_p0 = scmp.lt.u32.totalorder %s5985_s13, %s6946_s2 }
  0x88   : > { %p5988_p3 = pnand %p5986_p1, %p6376_p8 }
  0x8a   : > { %p5989_p13 = pneg %p5988_p3 }
  0x8c   : > { %p5994_p2 = pnand %p5992_p0, %p5989_p13 }
  0x8e   : > { %5997 = shalt.err (!%p5994_p2)
}
  0x8f   : > { %s5998_s14 = scalar_lea.vmem %s325_s1, 96  ;;  %p6006_p4 = scmp.lt.s32.totalorder %s325_s1, %s325_s1 }
  0x90   : > { %p5999_p5 = scmp.ne.s32.totalorder %s325_s1, %s5998_s14  ;;  %p6007_p10 = scmp.lt.s32.totalorder %s5998_s14, %s5998_s14 }
  0x92   : > { %p6001_p7 = pnand %p5999_p5, %p6376_p8  ;;  %p6008_p11 = por %p6007_p10, %p6006_p4 }
  0x94   : > { %p6002_p9 = pneg %p6001_p7 }
  0x96   : > { %p6009_p12 = pnand %p6008_p11, %p6002_p9 }
  0x98   : > { %6012 = shalt.err (!%p6009_p12)
}
  0x99   : > { %s6251_s26 = smov 16   ;;  %s6252_s22 = smov 1  }
  0x9a   : > { %5482 = dma.hbm_to_vmem [thread:$0]  (!%p6360_p6), %s6946_s2, 96, %s325_s1, [#allocation6], %s6251_s26, %s6251_s26, %s6252_s22  }
  0x9b   : > { %s6253_s24 = smov [#allocation10]   ;;  %s6254_s0 = smov [#allocation13]  }
  0x9c   : > { %s350_s29 = sshll.u32 %s6253_s24, 4  ;;  %s376_s11 = sshll.u32 %s6254_s0, 4  ;;  %s351_s29 = int_to_ptr.vmem [resolvable:$true] %s350_s29  ;;  %s6512_s11 = int_to_ptr.vmem [resolvable:$true] %s376_s11 }
  0x9d   : > { %s6013_s21 = scalar_lea.hbm %s6948_s4, 96 }
  0x9e   : > { %p6014_p1 = scmp.ne.s32.totalorder %s6948_s4, %s6013_s21  ;;  %p6020_p0 = scmp.lt.u32.totalorder %s6013_s21, %s6948_s4 }
  0xa0   : > { %p6016_p3 = pnand %p6014_p1, %p6376_p8 }
  0xa2   : > { %p6017_p13 = pneg %p6016_p3 }
  0xa4   : > { %p6022_p2 = pnand %p6020_p0, %p6017_p13 }
  0xa6   : > { %6025 = shalt.err (!%p6022_p2)
}
  0xa7   : > { %s6026_s30 = scalar_lea.vmem %s351_s29, 96  ;;  %p6034_p4 = scmp.lt.s32.totalorder %s351_s29, %s351_s29 }
  0xa8   : > { %p6027_p5 = scmp.ne.s32.totalorder %s351_s29, %s6026_s30  ;;  %p6035_p10 = scmp.lt.s32.totalorder %s6026_s30, %s6026_s30 }
  0xaa   : > { %p6029_p7 = pnand %p6027_p5, %p6376_p8  ;;  %p6036_p11 = por %p6035_p10, %p6034_p4 }
  0xac   : > { %p6030_p9 = pneg %p6029_p7 }
  0xae   : > { %p6037_p12 = pnand %p6036_p11, %p6030_p9 }
  0xb0   : > { %6040 = shalt.err (!%p6037_p12)
}
  0xb1   : > { %5488 = dma.hbm_to_vmem [thread:$0]  (!%p6360_p6), %s6948_s4, 96, %s351_s29, [#allocation9], %s6251_s26, %s6251_s26, %s6252_s22  }
  0xb2   : > { %s6041_s15 = scalar_lea.hbm %s6950_s6, 96 }
  0xb3   : > { %p6042_p1 = scmp.ne.s32.totalorder %s6950_s6, %s6041_s15  ;;  %p6048_p0 = scmp.lt.u32.totalorder %s6041_s15, %s6950_s6 }
  0xb5   : > { %p6044_p3 = pnand %p6042_p1, %p6376_p8 }
  0xb7   : > { %p6045_p13 = pneg %p6044_p3 }
  0xb9   : > { %p6050_p2 = pnand %p6048_p0, %p6045_p13 }
  0xbb   : > { %6053 = shalt.err (!%p6050_p2)
}
  0xbc   : > { %s6054_s29 = scalar_lea.vmem %s6512_s11, 96  ;;  %p6062_p4 = scmp.lt.s32.totalorder %s6512_s11, %s6512_s11 }
  0xbd   : > { %p6055_p5 = scmp.ne.s32.totalorder %s6512_s11, %s6054_s29  ;;  %p6063_p10 = scmp.lt.s32.totalorder %s6054_s29, %s6054_s29 }
  0xbf   : > { %p6057_p7 = pnand %p6055_p5, %p6376_p8  ;;  %p6064_p11 = por %p6063_p10, %p6062_p4 }
  0xc1   : > { %p6058_p9 = pneg %p6057_p7 }
  0xc3   : > { %p6065_p12 = pnand %p6064_p11, %p6058_p9 }
  0xc5   : > { %6068 = shalt.err (!%p6065_p12)
}
  0xc6   : > { %5494 = dma.hbm_to_vmem [thread:$0]  (!%p6360_p6), %s6950_s6, 96, %s6512_s11, [#allocation12], %s6251_s26, %s6251_s26, %s6252_s22  }
  0xc7   : > { %s6255_s12 = smov [#allocation16]   ;;  %s6256_s0 = smov [#allocation19]  }
  0xc8   : > { %s403_s24 = sshll.u32 %s6255_s12, 4  ;;  %s425_s13 = sshll.u32 %s6256_s0, 4  ;;  %s404_s24 = int_to_ptr.vmem [resolvable:$true] %s403_s24  ;;  %s6561_s13 = int_to_ptr.vmem [resolvable:$true] %s425_s13 }
  0xc9   : > { %s6069_s25 = scalar_lea.hbm %s6952_s8, 16 }
  0xca   : > { %p6070_p1 = scmp.ne.s32.totalorder %s6952_s8, %s6069_s25  ;;  %p6076_p0 = scmp.lt.u32.totalorder %s6069_s25, %s6952_s8 }
  0xcc   : > { %p6072_p3 = pnand %p6070_p1, %p6376_p8 }
  0xce   : > { %p6073_p13 = pneg %p6072_p3 }
  0xd0   : > { %p6078_p2 = pnand %p6076_p0, %p6073_p13 }
  0xd2   : > { %6081 = shalt.err (!%p6078_p2)
}
  0xd3   : > { %s6082_s22 = scalar_lea.vmem %s404_s24, 16  ;;  %s6089_s11 = scalar_lea.vmem %s404_s24, 32 }
  0xd4   : > { %p6083_p5 = scmp.ne.s32.totalorder %s404_s24, %s6082_s22  ;;  %p6090_p4 = scmp.lt.s32.totalorder %s404_s24, %s404_s24 }
  0xd5   : > { %p6091_p10 = scmp.lt.s32.totalorder %s6089_s11, %s6082_s22 }
  0xd6   : > { %p6085_p7 = pnand %p6083_p5, %p6376_p8 }
  0xd7   : > { %p6092_p11 = por %p6091_p10, %p6090_p4 }
  0xd8   : > { %p6086_p9 = pneg %p6085_p7 }
  0xda   : > { %p6093_p12 = pnand %p6092_p11, %p6086_p9 }
  0xdc   : > { %6096 = shalt.err (!%p6093_p12)
}
  0xdd   : > { %5500 = dma.hbm_to_vmem [thread:$0]  (!%p6360_p6), %s6952_s8, 16, %s404_s24, [#allocation15]  }
  0xde   : > { %s6097_s15 = scalar_lea.hbm %s6954_s10, 16 }
  0xdf   : > { %p6098_p1 = scmp.ne.s32.totalorder %s6954_s10, %s6097_s15  ;;  %p6104_p0 = scmp.lt.u32.totalorder %s6097_s15, %s6954_s10 }
  0xe1   : > { %p6100_p3 = pnand %p6098_p1, %p6376_p8 }
  0xe3   : > { %p6101_p13 = pneg %p6100_p3 }
  0xe5   : > { %p6106_p2 = pnand %p6104_p0, %p6101_p13 }
  0xe7   : > { %6109 = shalt.err (!%p6106_p2)
}
  0xe8   : > { %s6110_s24 = scalar_lea.vmem %s6561_s13, 16  ;;  %s6117_s29 = scalar_lea.vmem %s6561_s13, 32 }
  0xe9   : > { %p6111_p5 = scmp.ne.s32.totalorder %s6561_s13, %s6110_s24  ;;  %p6118_p4 = scmp.lt.s32.totalorder %s6561_s13, %s6561_s13 }
  0xea   : > { %p6119_p10 = scmp.lt.s32.totalorder %s6117_s29, %s6110_s24 }
  0xeb   : > { %p6113_p7 = pnand %p6111_p5, %p6376_p8 }
  0xec   : > { %p6120_p11 = por %p6119_p10, %p6118_p4 }
  0xed   : > { %p6114_p9 = pneg %p6113_p7 }
  0xef   : > { %p6121_p12 = pnand %p6120_p11, %p6114_p9 }
  0xf1   : > { %6124 = shalt.err (!%p6121_p12)
}
  0xf2   : > { %5506 = dma.hbm_to_vmem [thread:$0]  (!%p6360_p6), %s6954_s10, 16, %s6561_s13, [#allocation18]  }
  0xf3   : > { %s4419_s27 = sadd.s32 4294967294, %s6241_s20   ;;  %s6607_s16 = sadd.s32 1, %s6241_s20  }
  0xf4   : > { %s36_s11 = ssub.s32 %s6241_s20, %s6607_s16  ;;  %s39_s1 = sadd.s32 1, %s6237_s19 }
  0xf5   : > { %p37_p8 = scmp.eq.s32.totalorder %s36_s11, 0  ;;  %p46_p1 = scmp.ne.s32.totalorder %s6237_s19, %s6233_s18 }
  0xf6   : > { %p47_p3 = scmp.eq.s32.totalorder %s6241_s20, 0  ;;  %p52_p13 = scmp.ne.s32.totalorder %s6233_s18, %s6229_s17 }
  0xf7   : > { %s6618_s30 = scalar_select %p37_p8, %s6237_s19, %s39_s1  }
  0xf8   : > { %p6620_p0 = por %p47_p3, %p46_p1  ;;  %p6971_p2 = scmp.eq.s32.totalorder %s6344_s23, 0 }
  0xf9   : > { %p286_p5 = scmp.eq.s32.totalorder %s6344_s23, 1  ;;  %p292_p7 = scmp.eq.s32.totalorder %s4419_s27, 1 }
  0xfa   : > { %p6626_p6 = por %p6971_p2, %p52_p13  ;;  %p5525_p9 = scmp.lt.s32.totalorder %s6241_s20, 2 }
  0xfb   : > { %s436_s0 = sand.u32 1, %s6237_s19   ;;  %p6633_p4 = por %p286_p5, %p46_p1 }
  0xfc   : > { %p6637_p10 = por %p292_p7, %p52_p13  ;;  %s4432_s25 = sshll.u32 %s436_s0, 5 }
  0xfd   : > { %s6973_s15 = scalar_select %p6633_p4, 1, 0 }
  0xfe   : > { %s6974_s21 = scalar_select %p6637_p10, 1, 0 }
  0xff   : > { %s4660_s28 = sshll.u32 %s6241_s20, 9  ;;  %s6975_s29 = sld [smem:[#allocation29_spill]] }
 0x100   : > { %s440_s22 = scalar_lea.vmem [#allocation2], %s4432_s25  ;;  %p6651_p11 = pnand %p5525_p9, %p6620_p0 }
 0x101   : > { %s447_s27 = sshll.u32 %s440_s22, 4  ;;  %s6655_s1 = scalar_lea.sflag [#allocation3], %s436_s0  ;;  %s6647_s27 = int_to_ptr.vmem [resolvable:$true] %s447_s27 }
 0x102   : > { %p6127_p8 = pneg %p6651_p11 }
 0x105   : > { %s6645_s26 = scalar_lea.hbm %s6975_s29, %s4660_s28  ;;  %s6130_s12 = scalar_lea.hbm %s6975_s29, 1024 }
 0x106   : > { %s6125_s14 = scalar_lea.hbm %s6645_s26, 512  ;;  %p6131_p13 = scmp.lt.u32.totalorder %s6645_s26, %s6975_s29 }
 0x107   : > { %p6126_p12 = scmp.ne.s32.totalorder %s6645_s26, %s6125_s14  ;;  %p6132_p0 = scmp.lt.u32.totalorder %s6130_s12, %s6125_s14 }
 0x108   : > { %p6134_p5 = scmp.lt.u32.totalorder %s6125_s14, %s6645_s26 }
 0x109   : > { %p6128_p1 = pnand %p6127_p8, %p6126_p12  ;;  %p6133_p2 = por %p6132_p0, %p6131_p13 }
 0x10b   : > { %p6129_p3 = pneg %p6128_p1  ;;  %p6135_p7 = por %p6134_p5, %p6133_p2 }
 0x10d   : > { %p6136_p9 = pnand %p6135_p7, %p6129_p3 }
 0x10f   : > { %6139 = shalt.err (!%p6136_p9)
}
 0x110   : > { %s6140_s0 = scalar_lea.vmem %s6647_s27, 512  ;;  %s6257_s25 = smov [#allocation2]  }
 0x111   : > { %p6141_p12 = scmp.ne.s32.totalorder %s6647_s27, %s6140_s0  ;;  %s6145_s28 = sshll.u32 %s6257_s25, 4  ;;  %s6146_s28 = int_to_ptr.vmem [resolvable:$false] %s6145_s28 }
 0x112   : > { %s6147_s24 = scalar_lea.vmem %s6146_s28, 1024  ;;  %p6148_p4 = scmp.lt.s32.totalorder %s6647_s27, %s6146_s28 }
 0x113   : > { %p6143_p1 = pnand %p6141_p12, %p6127_p8  ;;  %p6149_p13 = scmp.lt.s32.totalorder %s6147_s24, %s6140_s0 }
 0x115   : > { %p6144_p10 = pneg %p6143_p1  ;;  %p6150_p0 = por %p6149_p13, %p6148_p4 }
 0x117   : > { %p6151_p2 = pnand %p6150_p0, %p6144_p10 }
 0x119   : > { %6154 = shalt.err (!%p6151_p2)
}
 0x11a   : > { %s6258_s14 = smov 128   ;;  %s6259_s12 = smov 8  }
 0x11b   : > { %5510 = dma.hbm_to_vmem [thread:$0]  (!%p6651_p11), %s6645_s26, 512, %s6647_s27, %s6655_s1, %s6258_s14, %s6258_s14, %s6259_s12  }
 0x11c   : > { %s6977_s22 = sld [smem:[#allocation28_spill]] }
 0x122   : > { %p6978_p8 = scmp.ne.s32.totalorder %s6977_s22, 0 }
 0x123   : > { %s6686_s25 = sand.u32 (!%p6978_p8), 1, %s6233_s18  }
 0x124   : > { %459 = sbr.rel (%p6978_p8) target bundleno = 6779 (0x1a7b), region = 64  ;;  %s4436_s0 = sshll.u32 (!%p6978_p8), %s6686_s25, 5 }
 0x125   : > { %s462_s28 = scalar_lea.sflag (!%p6978_p8), [#allocation3], %s6686_s25  ;;  %s6692_s24 = scalar_lea.vmem (!%p6978_p8), [#allocation2], %s4436_s0 }
 0x12b   : > { %6200 = dma.done.wait (%p6626_p6), %s462_s28, 512  }
 0x12c   : > { %6202 = vsyncadd (%p6626_p6), %s462_s28, 4294966784  ;;  %p6979_p4 = scmp.eq.s32.totalorder %s6344_s23, 0 }
 0x12e   : > { %6204 = dma.done.wait (%p6979_p4), [#allocation6], 6240   ;;  %p6980_p10 = pmov %p6979_p4 }
 0x12f   : > { %p6981_p11 = pmov %p6979_p4 }
 0x130   : > { %6206 = vsyncadd (%p6980_p10), [#allocation6], 4294961056 }
 0x131   : > { %6208 = dma.done.wait (%p6981_p11), [#allocation9], 6240   ;;  %p6982_p3 = pmov %p6979_p4 }
 0x133   : > { %6210 = vsyncadd (%p6982_p3), [#allocation9], 4294961056  ;;  %p6983_p5 = pmov %p6982_p3 }
 0x134   : > { %p6984_p7 = pmov %p6982_p3 }
 0x135   : > { %6212 = dma.done.wait (%p6983_p5), [#allocation12], 6240  }
 0x136   : > { %6214 = vsyncadd (%p6984_p7), [#allocation12], 4294961056  ;;  %p6985_p6 = pmov %p6982_p3 }
 0x137   : > { %p6986_p9 = pmov %p6982_p3 }
 0x138   : > { %6216 = dma.done.wait (%p6985_p6), [#allocation15], 784  }
 0x139   : > { %6218 = vsyncadd (%p6986_p9), [#allocation15], 4294966512  ;;  %p6987_p12 = pmov %p6982_p3 }
 0x13a   : > { %p6988_p1 = pmov %p6982_p3 }
 0x13b   : > { %6220 = dma.done.wait (%p6987_p12), [#allocation18], 32  }
 0x13c   : > { %6222 = vsyncadd (%p6988_p1), [#allocation18], 4294967264  ;;  %v5587_v0 = vld [vmem:[#allocation8] sm:$0xff]   ;;  %v5588_v1 = vld [vmem:[#allocation8 + $0x8] sm:$0xff]   ;;  %vm1185_vm0 = vcmask 130048   ;;  %vm1251_vm1 = vcmask 261120  }
 0x13d   : > { %4928 = vmatprep.subr.bf16.mxu1 %v5587_v0  ;;  %v5590_v2 = vld [vmem:[#allocation5] sm:$0xff]   ;;  %v5589_v3 = vld [vmem:[#allocation8 + $0x10] sm:$0xff]   ;;  %v5592_v4 = vld [vmem:[#allocation5 + $0x8] sm:$0xff]   ;;  %s543_s13 = scalar_lea.vmem [#allocation20], %s4436_s0  ;;  %s4661_s26 = sshll.u32 %s6344_s23, 9 }
 0x13e   : > { %4929 = vmatpush3.bf16.msra.mxu1 %v5587_v0  ;;  %4908 = vmatprep.subr.bf16.mxu0 %v5590_v2  ;;  %v5594_v5 = vld [vmem:[#allocation5 + $0x10] sm:$0xff]   ;;  %v5591_v6 = vld [vmem:[#allocation8 + $0x18] sm:$0xff]   ;;  %v5593_v8 = vld [vmem:[#allocation8 + $0x20] sm:$0xff]   ;;  %s4251_s27 = sshll.u32 %s543_s13, 4  ;;  %s6989_s14 = sld [smem:[#allocation31_spill]]  ;;  %s6899_s27 = int_to_ptr.vmem [resolvable:$true] %s4251_s27 }
 0x13f   : > { %4930 = vmatprep.subr.bf16.mxu1 %v5588_v1  ;;  %4909 = vmatpush3.bf16.msra.mxu0 %v5590_v2  ;;  %v5596_v7 = vld [vmem:[#allocation5 + $0x18] sm:$0xff]   ;;  %v545_v9 = vld [vmem:[%s6692_s24] sm:$0xff]  ;;  %v546_v10 = vld [vmem:[%s6692_s24 + $0x8] sm:$0xff]  ;;  %s4238_s23 = scalar_lea.sflag [#allocation4], %s6686_s25  ;;  %s6155_s22 = scalar_lea.vmem %s6899_s27, 512 }
 0x140   : > { %4910 = vmatprep.subr.bf16.mxu0 %v5592_v4  ;;  %v6720_v11 = vpack.c.bf16 %v546_v10, %v545_v9  ;;  %v5598_v12 = vld [vmem:[#allocation5 + $0x20] sm:$0xff]   ;;  %v5595_v13 = vld [vmem:[#allocation8 + $0x28] sm:$0xff]   ;;  %v5597_v15 = vld [vmem:[#allocation8 + $0x30] sm:$0xff]   ;;  %p6156_p13 = scmp.ne.s32.totalorder %s6899_s27, %s6155_s22  ;;  %p6990_p0 = scmp.ne.s32.totalorder %s6973_s15, 0 }
 0x141   : > { %v5600_v14 = vld [vmem:[#allocation5 + $0x28] sm:$0xff]   ;;  %v5601_v16 = vld [vmem:[#allocation5 + $0x30] sm:$0xff]   ;;  %v5599_v17 = vld [vmem:[#allocation8 + $0x38] sm:$0xff]   ;;  %s6260_s0 = smov [#allocation20]  }
 0x142   : > { %4931 = vmatpush3.bf16.msra.mxu1 %v5588_v1  ;;  %4944 = vmatprep.mubr.bf16.mxu1 %v6720_v11  ;;  %v547_v18 = vld [vmem:[%s6692_s24 + $0x10] sm:$0xff]  ;;  %v548_v19 = vld [vmem:[%s6692_s24 + $0x18] sm:$0xff]  ;;  %v4457_v23 = vld [vmem:[#allocation10] ss:$0 sm:$0xff]  ;;  %p6157_p2 = pnand %p6156_p13, %p6990_p0  ;;  %s6159_s28 = sshll.u32 %s6260_s0, 4  ;;  %s6160_s28 = int_to_ptr.vmem [resolvable:$false] %s6159_s28 }
 0x143   : > { %4932 = vmatprep.subr.bf16.mxu1 %v5589_v3  ;;  %4911 = vmatpush3.bf16.msra.mxu0 %v5592_v4  ;;  %v5602_v20 = vld [vmem:[#allocation5 + $0x38] sm:$0xff]   ;;  %v6726_v21 = vpack.c.bf16 %v548_v19, %v547_v18  ;;  %v4448_v25 = vld [vmem:[#allocation7] ss:$0 sm:$0xff]  ;;  %v5603_v46 = vld [vmem:[#allocation11] sm:$0xff]   ;;  %p6162_p4 = scmp.lt.s32.totalorder %s6899_s27, %s6160_s28 }
 0x144   : > { %4912 = vmatprep.subr.bf16.mxu0 %v5594_v5  ;;  %4924 = vmatprep.mubr.bf16.mxu0 %v6720_v11  ;;  %v5604_v47 = vld [vmem:[#allocation11 + $0x8] sm:$0xff]   ;;  %v5605_v48 = vld [vmem:[#allocation11 + $0x10] sm:$0xff]   ;;  %v5606_v49 = vld [vmem:[#allocation11 + $0x18] sm:$0xff]   ;;  %s6897_s12 = scalar_lea.hbm %s6989_s14, %s4661_s26  ;;  %p6158_p8 = pneg %p6157_p2 }
 0x145   : > { %v5607_v50 = vld [vmem:[#allocation11 + $0x20] sm:$0xff]   ;;  %v5608_v51 = vld [vmem:[#allocation11 + $0x28] sm:$0xff]   ;;  %v5609_v52 = vld [vmem:[#allocation11 + $0x30] sm:$0xff]   ;;  %s6161_s26 = scalar_lea.vmem %s6160_s28, 1024 }
 0x146   : > { %4933 = vmatpush3.bf16.msra.mxu1 %v5589_v3  ;;  %v5610_v53 = vld [vmem:[#allocation11 + $0x38] sm:$0xff]   ;;  %p6163_p10 = scmp.lt.s32.totalorder %s6161_s26, %s6155_s22 }
 0x147   : > { %4934 = vmatprep.subr.bf16.mxu1 %v5591_v6  ;;  %4913 = vmatpush3.bf16.msra.mxu0 %v5594_v5  ;;  %v5611_v2 = vld [vmem:[#allocation8 + $0x40] sm:$0xff]  }
 0x148   : > { %4914 = vmatprep.subr.bf16.mxu0 %v5596_v7  ;;  %p6164_p11 = por %p6163_p10, %p6162_p4 }
 0x14a   : > { %4935 = vmatpush3.bf16.msra.mxu1 %v5591_v6  ;;  %p6165_p3 = pnand %p6164_p11, %p6158_p8 }
 0x14b   : > { %4936 = vmatprep.subr.bf16.mxu1 %v5593_v8  ;;  %4915 = vmatpush3.bf16.msra.mxu0 %v5596_v7 }
 0x14c   : > { %4916 = vmatprep.subr.bf16.mxu0 %v5598_v12 }
 0x14e   : > { %4937 = vmatpush3.bf16.msra.mxu1 %v5593_v8 }
 0x14f   : > { %4938 = vmatprep.subr.bf16.mxu1 %v5595_v13  ;;  %4917 = vmatpush3.bf16.msra.mxu0 %v5598_v12 }
 0x150   : > { %4918 = vmatprep.subr.bf16.mxu0 %v5600_v14 }
 0x152   : > { %4939 = vmatpush3.bf16.msra.mxu1 %v5595_v13 }
 0x153   : > { %4940 = vmatprep.subr.bf16.mxu1 %v5597_v15  ;;  %4919 = vmatpush3.bf16.msra.mxu0 %v5600_v14 }
 0x154   : > { %4920 = vmatprep.subr.bf16.mxu0 %v5601_v16 }
 0x156   : > { %4941 = vmatpush3.bf16.msra.mxu1 %v5597_v15 }
 0x157   : > { %4942 = vmatprep.subr.bf16.mxu1 %v5599_v17  ;;  %4921 = vmatpush3.bf16.msra.mxu0 %v5601_v16 }
 0x158   : > { %4922 = vmatprep.subr.bf16.mxu0 %v5602_v20 }
 0x15a   : > { %4943 = vmatpush3.bf16.msra.mxu1 %v5599_v17 }
 0x15b   : > { %4923 = vmatpush3.bf16.msra.mxu0 %v5602_v20 }
 0x15c   : > { %4948 = vmatprep.subr.bf16.mxu0 %v5603_v46 }
 0x15d   : > { %4945 = vmatmul.mubr.bf16.vlgmr.msra.gmra.mrb[0].mxu1 %v6726_v21 }
 0x15e   : > { %4925 = vmatmul.mubr.bf16.vlgmr.msra.gmra.mrb[0].mxu0 %v6726_v21 }
 0x15f   : > { %4964 = vmatprep.mubr.bf16.mxu0 %v6720_v11  ;;  %4949 = vmatpush3.bf16.msra.mxu0 %v5603_v46 }
 0x160   : > { %4950 = vmatprep.subr.bf16.mxu0 %v5604_v47 }
 0x163   : > { %4951 = vmatpush3.bf16.msra.mxu0 %v5604_v47 }
 0x164   : > { %4952 = vmatprep.subr.bf16.mxu0 %v5605_v48 }
 0x167   : > { %4953 = vmatpush3.bf16.msra.mxu0 %v5605_v48 }
 0x168   : > { %4954 = vmatprep.subr.bf16.mxu0 %v5606_v49 }
 0x16b   : > { %4955 = vmatpush3.bf16.msra.mxu0 %v5606_v49 }
 0x16c   : > { %4956 = vmatprep.subr.bf16.mxu0 %v5607_v50 }
 0x16f   : > { %4957 = vmatpush3.bf16.msra.mxu0 %v5607_v50 }
 0x170   : > { %4958 = vmatprep.subr.bf16.mxu0 %v5608_v51 }
 0x173   : > { %4959 = vmatpush3.bf16.msra.mxu0 %v5608_v51 }
 0x174   : > { %4960 = vmatprep.subr.bf16.mxu0 %v5609_v52 }
 0x177   : > { %4961 = vmatpush3.bf16.msra.mxu0 %v5609_v52 }
 0x178   : > { %4962 = vmatprep.subr.bf16.mxu0 %v5610_v53 }
 0x17b   : > { %4963 = vmatpush3.bf16.msra.mxu0 %v5610_v53 }
 0x17c   : > { %5004 = vmatprep.subr.bf16.mxu0 %v5611_v2 }
 0x17e   : > { %4965 = vmatmul.mubr.bf16.vlgmr.msra.gmra.mrb[4].mxu0 %v6726_v21 }
 0x17f   : > { %5020 = vmatprep.mubr.bf16.mxu0 %v6720_v11  ;;  %5005 = vmatpush3.bf16.msra.mxu0 %v5611_v2 }
 0x230   : > { %v4946_v22 = vpop.f32.mrb[0].mxu1 }
 0x231   : > { %v1063_v24 = vpop.f32.mrb[1].mxu1  ;;  %v1072_v27 = vadd.f32 %v4946_v22, %v4457_v23  ;;  %v4926_v30 = vpop.f32.mrb[0].mxu0 }
 0x232   : > { %v4947_v26 = vpop.f32.mrb[2].mxu1  ;;  %v1064_v31 = vadd.f32 %v4457_v23, %v1063_v24  ;;  %v969_v33 = vadd.f32 %v4926_v30, %v4448_v25  ;;  %v960_v34 = vpop.f32.mrb[1].mxu0 }
 0x233   : > { %v1075_v28 = vadd.f32 %v4947_v26, %v4457_v23  ;;  %v1066_v29 = vpop.f32.mrb[3].mxu1  ;;  %v961_v36 = vadd.f32 %v4448_v25, %v960_v34  ;;  %v4927_v37 = vpop.f32.mrb[2].mxu0 }
 0x234   : > { %v1067_v32 = vadd.f32 %v4457_v23, %v1066_v29  ;;  %v972_v39 = vadd.f32 %v4927_v37, %v4448_v25  ;;  %v963_v40 = vpop.f32.mrb[3].mxu0 }
 0x235   : > { %v1184_v35 = vpack.c.bf16 %v1075_v28, %v1072_v27  ;;  %v964_v41 = vadd.f32 %v4448_v25, %v963_v40  ;;  %v4466_v27 = vld [vmem:[#allocation13] ss:$0 sm:$0xff]  ;;  %v5612_v28 = vld [vmem:[#allocation8 + $0x48] sm:$0xff]  }
 0x236   : > { %v1183_v38 = vpack.c.bf16 %v1067_v32, %v1064_v31  ;;  %v1182_v43 = vpack.c.bf16 %v972_v39, %v969_v33  ;;  %5006 = vmatprep.subr.bf16.mxu0 %v5612_v28  ;;  %v5615_v39 = vld [vmem:[#allocation8 + $0x60] sm:$0xff]   ;;  %v5616_v40 = vld [vmem:[#allocation8 + $0x68] sm:$0xff]  }
 0x237   : > { %v1181_v44 = vpack.c.bf16 %v964_v41, %v961_v36  ;;  %v1196_v45 = vsel %vm1185_vm0, %v1184_v35, 0  ;;  %5007 = vmatpush3.bf16.msra.mxu0 %v5612_v28  ;;  %v5613_v36 = vld [vmem:[#allocation8 + $0x50] sm:$0xff]  }
 0x238   : > { %5420 = vmatprep.subr.msk.bf16.mxu1 %vm1185_vm0, %v1183_v38  ;;  %v1193_v42 = vsel %vm1185_vm0, %v1183_v38, 0  ;;  %5008 = vmatprep.subr.bf16.mxu0 %v5613_v36  ;;  %v5614_v38 = vld [vmem:[#allocation8 + $0x58] sm:$0xff]   ;;  %v5617_v41 = vld [vmem:[#allocation8 + $0x70] sm:$0xff]  }
 0x239   : > { %4969 = vmatpush3.bf16.xpose.msra.mxu1 %v1193_v42  ;;  %4972 = vmatprep.mubr.msk.bf16.mxu1 %vm1185_vm0, %v1181_v44  ;;  %v5618_v42 = vld [vmem:[#allocation5 + $0x40] sm:$0xff]  }
 0x23a   : > { %5421 = vmatprep.subr.msk.bf16.mxu1 %vm1185_vm0, %v1184_v35 }
 0x23b   : > { %5009 = vmatpush3.bf16.msra.mxu0 %v5613_v36  ;;  %v5630_v36 = vld [vmem:[#allocation11 + $0x58] sm:$0xff]  }
 0x23c   : > { %5010 = vmatprep.subr.bf16.mxu0 %v5614_v38 }
 0x23f   : > { %5011 = vmatpush3.bf16.msra.mxu0 %v5614_v38  ;;  %v5632_v38 = vld [vmem:[#allocation11 + $0x68] sm:$0xff]  }
 0x240   : > { %5012 = vmatprep.subr.bf16.mxu0 %v5615_v39 }
 0x241   : > { %4971 = vmatpush3.bf16.xpose.msra.mxu1 %v1196_v45 }
 0x243   : > { %5013 = vmatpush3.bf16.msra.mxu0 %v5615_v39  ;;  %v5633_v39 = vld [vmem:[#allocation11 + $0x70] sm:$0xff]  }
 0x244   : > { %5014 = vmatprep.subr.bf16.mxu0 %v5616_v40 }
 0x247   : > { %5015 = vmatpush3.bf16.msra.mxu0 %v5616_v40  ;;  %v5634_v40 = vld [vmem:[#allocation11 + $0x78] sm:$0xff]  }
 0x248   : > { %4973 = vmatmul.mubr.msk.bf16.vlgmr.msra.gmra.mrb[4].mxu1 %vm1185_vm0, %v1182_v43  ;;  %5016 = vmatprep.subr.bf16.mxu0 %v5617_v41  ;;  %v5619_v43 = vld [vmem:[#allocation8 + $0x78] sm:$0xff]  }
 0x24b   : > { %5017 = vmatpush3.bf16.msra.mxu0 %v5617_v41 }
 0x24c   : > { %5018 = vmatprep.subr.bf16.mxu0 %v5619_v43 }
 0x24f   : > { %5019 = vmatpush3.bf16.msra.mxu0 %v5619_v43 }
 0x251   : > { %v4966_v3 = vpop.f32.mrb[4].mxu0 }
 0x252   : > { %v1166_v4 = vpop.f32.mrb[5].mxu0  ;;  %v1175_v29 = vadd.f32 %v4966_v3, %v4466_v27  ;;  %5021 = vmatmul.mubr.bf16.vlgmr.msra.gmra.mrb[8].mxu0 %v6726_v21 }
 0x253   : > { %v1167_v30 = vadd.f32 %v4466_v27, %v1166_v4  ;;  %v4967_v31 = vpop.f32.mrb[6].mxu0 }
 0x254   : > { %v1178_v32 = vadd.f32 %v4967_v31, %v4466_v27  ;;  %v1169_v33 = vpop.f32.mrb[7].mxu0 }
 0x255   : > { %v1170_v34 = vadd.f32 %v4466_v27, %v1169_v33  ;;  %v5627_v33 = vld [vmem:[#allocation11 + $0x40] sm:$0xff]  }
 0x256   : > { %v1299_v35 = vpack.c.bf16 %v1178_v32, %v1175_v29 }
 0x257   : > { %v1298_v37 = vpack.c.bf16 %v1170_v34, %v1167_v30  ;;  %v5628_v34 = vld [vmem:[#allocation11 + $0x48] sm:$0xff]  }
 0x259   : > { %4976 = vmatprep.subr.bf16.mxu1 %v1298_v37 }
 0x25a   : > { %4977 = vmatpush3.bf16.msra.mxu1 %v1298_v37  ;;  %v5631_v37 = vld [vmem:[#allocation11 + $0x60] sm:$0xff]  }
 0x25b   : > { %4978 = vmatprep.subr.bf16.mxu1 %v1299_v35 }
 0x25e   : > { %4979 = vmatpush3.bf16.msra.mxu1 %v1299_v35  ;;  %v5629_v35 = vld [vmem:[#allocation11 + $0x50] sm:$0xff]  }
 0x25f   : > { %4984 = vmatprep.subr.bf16.mxu1 %v5618_v42 }
 0x31b   : > { %v4974_v54 = vpop.f32.mrb[4].mxu1 }
 0x31c   : > { %v1249_v55 = vmul.f32 0.25, %v4974_v54  ;;  %v1232_v56 = vpop.f32.mrb[5].mxu1 }
 0x31d   : > { %v1247_v57 = vmul.f32 0.25, %v1232_v56  ;;  %v4975_v58 = vpop.f32.mrb[6].mxu1 }
 0x31e   : > { %v1250_v59 = vmul.f32 0.25, %v4975_v58  ;;  %v1235_v60 = vpop.f32.mrb[7].mxu1  ;;  %v1258_v61 = vsel %vm1251_vm1, %v1249_v55, -inf  ;;  %v5620_v58 = vld [vmem:[#allocation5 + $0x48] sm:$0xff]  }
 0x31f   : > { %v1248_v62 = vmul.f32 0.25, %v1235_v60  ;;  %1259 = vmax.xlane.f32.xlu1 %v1258_v61  ;;  %v1252_v63 = vsel %vm1251_vm1, %v1247_v57, -inf  ;;  %v5622_v60 = vld [vmem:[#allocation5 + $0x58] sm:$0xff]   ;;  %v5623_v61 = vld [vmem:[#allocation5 + $0x60] sm:$0xff]  }
 0x320   : > { %1253 = vmax.xlane.f32.xlu0 %v1252_v63  ;;  %v1261_v0 = vsel %vm1251_vm1, %v1250_v59, -inf  ;;  %v5625_v63 = vld [vmem:[#allocation5 + $0x70] sm:$0xff]  }
 0x321   : > { %v1255_v1 = vsel %vm1251_vm1, %v1248_v62, -inf }
 0x323   : > { %1262 = vmax.xlane.f32.xlu1 %v1261_v0  ;;  %v5626_v0 = vld [vmem:[#allocation5 + $0x78] sm:$0xff]  }
 0x324   : > { %1256 = vmax.xlane.f32.xlu0 %v1255_v1  ;;  %v4488_v1 = vld [vmem:[#allocation10 + $0x1] ss:$0 sm:$0xff] }
 0x325   : > { %v5022_v2 = vpop.f32.mrb[8].mxu0 }
 0x326   : > { %v1557_v3 = vadd.f32 %v5022_v2, %v4488_v1  ;;  %v1548_v4 = vpop.f32.mrb[9].mxu0 }
 0x3ac   : > { %v1260_v5 = vpop.xlane.xlu1 %1259 }
 0x3ad   : > { %v1266_v6 = vsub.f32 %v1249_v55, %v1260_v5  ;;  %v1254_v7 = vpop.xlane.xlu0 %1253  ;;  %v1549_v5 = vadd.f32 %v4488_v1, %v1548_v4 }
 0x3ae   : > { %v1264_v8 = vsub.f32 %v1247_v57, %v1254_v7 }
 0x3af   : > { %v1272_v9 = vmul.f32 1.442695, %v1266_v6  ;;  %v5023_v6 = vpop.f32.mrb[10].mxu0 }
 0x3b0   : > { %v1268_v10 = vmul.f32 1.442695, %v1264_v8  ;;  %v1263_v12 = vpop.xlane.xlu1 %1262  ;;  %v1560_v7 = vadd.f32 %v5023_v6, %v4488_v1  ;;  %v1551_v8 = vpop.f32.mrb[11].mxu0 }
 0x3b1   : > { %v1267_v13 = vsub.f32 %v1250_v59, %v1263_v12  ;;  %v1257_v14 = vpop.xlane.xlu0 %1256  ;;  %v5621_v59 = vld [vmem:[#allocation5 + $0x50] sm:$0xff]  }
 0x3b2   : > { %5737 = vpow2.f32 %v1268_v10  ;;  %v1265_v15 = vsub.f32 %v1248_v62, %v1257_v14  ;;  %v5624_v62 = vld [vmem:[#allocation5 + $0x68] sm:$0xff]   ;;  %v1669_v10 = vpack.c.bf16 %v1560_v7, %v1557_v3 }
 0x3b3   : > { %5739 = vpow2.f32 %v1272_v9  ;;  %v1274_v16 = vmul.f32 1.442695, %v1267_v13  ;;  %v1552_v9 = vadd.f32 %v4488_v1, %v1551_v8 }
 0x3b4   : > { %v1270_v17 = vmul.f32 1.442695, %v1265_v15  ;;  %v1680_v14 = vsel %vm1185_vm0, %v1669_v10, 0 }
 0x3b5   : > { %v1668_v12 = vpack.c.bf16 %v1552_v9, %v1549_v5 }
 0x3b6   : > { %5741 = vpow2.f32 %v1270_v17 }
 0x3b7   : > { %5743 = vpow2.f32 %v1274_v16  ;;  %5422 = vmatprep.subr.msk.bf16.mxu0 %vm1185_vm0, %v1668_v12  ;;  %v1677_v13 = vsel %vm1185_vm0, %v1668_v12, 0 }
 0x3b8   : > { %5045 = vmatpush3.bf16.xpose.msra.mxu0 %v1677_v13 }
 0x3b9   : > { %5423 = vmatprep.subr.msk.bf16.mxu0 %vm1185_vm0, %v1669_v10 }
 0x3bc   : > { %v5738_v18 = vpop.eup %5737 }
 0x3bd   : > { %v1276_v19 = vsel %vm1251_vm1, %v5738_v18, 0.0  ;;  %v5740_v20 = vpop.eup %5739 }
 0x3be   : > { %1277 = vadd.xlane.f32.xlu0 %v1276_v19  ;;  %v1282_v23 = vsel %vm1251_vm1, %v5740_v20, 0.0 }
 0x3c0   : > { %v5742_v22 = vpop.eup %5741  ;;  %5047 = vmatpush3.bf16.xpose.msra.mxu0 %v1680_v14 }
 0x3c1   : > { %v1279_v24 = vsel %vm1251_vm1, %v5742_v22, 0.0  ;;  %v5744_v25 = vpop.eup %5743 }
 0x3c2   : > { %1283 = vadd.xlane.f32.xlu0 %v1282_v23  ;;  %1280 = vadd.xlane.f32.xlu1 %v1279_v24  ;;  %v1285_v26 = vsel %vm1251_vm1, %v5744_v25, 0.0  ;;  %v4479_v23 = vld [vmem:[#allocation7 + $0x1] ss:$0 sm:$0xff] }
 0x3c6   : > { %1286 = vadd.xlane.f32.xlu1 %v1285_v26 }
 0x44b   : > { %v1278_v44 = vpop.xlane.xlu0 %1277 }
 0x44c   : > { %5745 = vrcp.f32 %v1278_v44 }
 0x44f   : > { %v1281_v45 = vpop.xlane.xlu1 %1280  ;;  %v1284_v46 = vpop.xlane.xlu0 %1283 }
 0x450   : > { %5747 = vrcp.f32 %v1281_v45 }
 0x451   : > { %5749 = vrcp.f32 %v1284_v46 }
 0x453   : > { %v1287_v47 = vpop.xlane.xlu1 %1286 }
 0x454   : > { %5751 = vrcp.f32 %v1287_v47 }
 0x456   : > { %v5746_v48 = vpop.eup %5745 }
 0x457   : > { %v1289_v50 = vmul.f32 %v5746_v48, %v5738_v18 }
 0x45a   : > { %v5748_v49 = vpop.eup %5747 }
 0x45b   : > { %v1291_v51 = vmul.f32 %v5748_v49, %v5742_v22  ;;  %v5750_v52 = vpop.eup %5749 }
 0x45c   : > { %v1293_v55 = vmul.f32 %v5750_v52, %v5740_v20 }
 0x45d   : > { %v1296_v53 = vpack.c.bf16 %v1291_v51, %v1289_v50 }
 0x45e   : > { %v5752_v54 = vpop.eup %5751 }
 0x45f   : > { %v1295_v56 = vmul.f32 %v5752_v54, %v5744_v25  ;;  %4980 = vmatprep.mubr.msk.bf16.mxu1 %vm1251_vm1, %v1296_v53  ;;  %v4497_v53 = vld [vmem:[#allocation13 + $0x1] ss:$0 sm:$0xff] }
 0x461   : > { %v1297_v57 = vpack.c.bf16 %v1295_v56, %v1293_v55 }
 0x463   : > { %4981 = vmatmul.mubr.msk.bf16.vlgmr.msra.gmra.mrb[8].mxu1 %vm1251_vm1, %v1297_v57 }
 0x464   : > { %4985 = vmatpush3.bf16.msra.mxu1 %v5618_v42  ;;  %5000 = vmatprep.mubr.bf16.mxu1 %v6720_v11 }
 0x465   : > { %4986 = vmatprep.subr.bf16.mxu1 %v5620_v58 }
 0x468   : > { %4987 = vmatpush3.bf16.msra.mxu1 %v5620_v58 }
 0x469   : > { %4988 = vmatprep.subr.bf16.mxu1 %v5621_v59 }
 0x46c   : > { %4989 = vmatpush3.bf16.msra.mxu1 %v5621_v59 }
 0x46d   : > { %4990 = vmatprep.subr.bf16.mxu1 %v5622_v60 }
 0x470   : > { %4991 = vmatpush3.bf16.msra.mxu1 %v5622_v60 }
 0x471   : > { %4992 = vmatprep.subr.bf16.mxu1 %v5623_v61 }
 0x474   : > { %4993 = vmatpush3.bf16.msra.mxu1 %v5623_v61 }
 0x475   : > { %4994 = vmatprep.subr.bf16.mxu1 %v5624_v62 }
 0x478   : > { %4995 = vmatpush3.bf16.msra.mxu1 %v5624_v62 }
 0x479   : > { %4996 = vmatprep.subr.bf16.mxu1 %v5625_v63 }
 0x47c   : > { %4997 = vmatpush3.bf16.msra.mxu1 %v5625_v63 }
 0x47d   : > { %4998 = vmatprep.subr.bf16.mxu1 %v5626_v0 }
 0x480   : > { %4999 = vmatpush3.bf16.msra.mxu1 %v5626_v0 }
 0x481   : > { %5024 = vmatprep.subr.bf16.mxu1 %v5627_v33 }
 0x483   : > { %5001 = vmatmul.mubr.bf16.vlgmr.msra.gmra.mrb[12].mxu1 %v6726_v21 }
 0x484   : > { %5040 = vmatprep.mubr.bf16.mxu1 %v6720_v11  ;;  %5025 = vmatpush3.bf16.msra.mxu1 %v5627_v33 }
 0x485   : > { %5026 = vmatprep.subr.bf16.mxu1 %v5628_v34 }
 0x488   : > { %5027 = vmatpush3.bf16.msra.mxu1 %v5628_v34 }
 0x489   : > { %5028 = vmatprep.subr.bf16.mxu1 %v5629_v35 }
 0x48c   : > { %5029 = vmatpush3.bf16.msra.mxu1 %v5629_v35 }
 0x48d   : > { %5030 = vmatprep.subr.bf16.mxu1 %v5630_v36 }
 0x490   : > { %5031 = vmatpush3.bf16.msra.mxu1 %v5630_v36 }
 0x491   : > { %5032 = vmatprep.subr.bf16.mxu1 %v5631_v37 }
 0x494   : > { %5033 = vmatpush3.bf16.msra.mxu1 %v5631_v37 }
 0x495   : > { %5034 = vmatprep.subr.bf16.mxu1 %v5632_v38 }
 0x498   : > { %5035 = vmatpush3.bf16.msra.mxu1 %v5632_v38 }
 0x499   : > { %5036 = vmatprep.subr.bf16.mxu1 %v5633_v39 }
 0x49c   : > { %5037 = vmatpush3.bf16.msra.mxu1 %v5633_v39 }
 0x49d   : > { %5038 = vmatprep.subr.bf16.mxu1 %v5634_v40 }
 0x4a0   : > { %5039 = vmatpush3.bf16.msra.mxu1 %v5634_v40 }
 0x4a3   : > { %5041 = vmatmul.mubr.bf16.vlgmr.msra.gmra.mrb[16].mxu1 %v6726_v21 }
 0x536   : > { %v6757_v15 = vpop.f32.mrb[8].mxu1 }
 0x537   : > { %v6759_v16 = vpop.f32.mrb[9].mxu1 }
 0x538   : > { %v6761_v17 = vpop.f32.mrb[10].mxu1 }
 0x539   : > { %v1356_v18 = vpack.c.bf16 %v6761_v17, %v6757_v15  ;;  %v6765_v19 = vpop.f32.mrb[11].mxu1  ;;  %v5649_v15 = vld [vmem:[#allocation8 + $0xb8] sm:$0xff]  }
 0x53a   : > { %v1355_v20 = vpack.c.bf16 %v6765_v19, %v6759_v16  ;;  %v5643_v16 = vld [vmem:[#allocation8 + $0xa0] sm:$0xff]   ;;  %v5645_v19 = vld [vmem:[#allocation8 + $0xa8] sm:$0xff]   ;;  %v4516_v17 = vld [vmem:[#allocation7 + $0x2] ss:$0 sm:$0xff] }
 0x556   : > { %v5002_v22 = vpop.f32.mrb[12].mxu1 }
 0x557   : > { %v1445_v24 = vpop.f32.mrb[13].mxu1  ;;  %v1454_v26 = vadd.f32 %v5002_v22, %v4479_v23 }
 0x558   : > { %v5003_v25 = vpop.f32.mrb[14].mxu1  ;;  %v1446_v29 = vadd.f32 %v4479_v23, %v1445_v24 }
 0x559   : > { %v1457_v27 = vadd.f32 %v5003_v25, %v4479_v23  ;;  %v1448_v28 = vpop.f32.mrb[15].mxu1 }
 0x55a   : > { %v1449_v30 = vadd.f32 %v4479_v23, %v1448_v28  ;;  %v5635_v28 = vld [vmem:[#allocation14 + $0x8] sm:$0xff]  }
 0x55b   : > { %v1667_v31 = vpack.c.bf16 %v1457_v27, %v1454_v26  ;;  %5060 = vmatprep.subr.bf16.mxu0 %v5635_v28 }
 0x55c   : > { %v1666_v32 = vpack.c.bf16 %v1449_v30, %v1446_v29 }
 0x55e   : > { %5048 = vmatprep.mubr.msk.bf16.mxu0 %vm1185_vm0, %v1666_v32 }
 0x55f   : > { %5049 = vmatmul.mubr.msk.bf16.vlgmr.msra.gmra.mrb[12].mxu0 %vm1185_vm0, %v1667_v31 }
 0x560   : > { %5061 = vmatpush3.bf16.msra.mxu0 %v5635_v28  ;;  %v5653_v28 = vld [vmem:[#allocation11 + $0x80] sm:$0xff]  }
 0x576   : > { %v5042_v54 = vpop.f32.mrb[16].mxu1 }
 0x577   : > { %v1660_v55 = vadd.f32 %v5042_v54, %v4497_v53  ;;  %v1651_v56 = vpop.f32.mrb[17].mxu1 }
 0x578   : > { %v1652_v57 = vadd.f32 %v4497_v53, %v1651_v56  ;;  %v5043_v58 = vpop.f32.mrb[18].mxu1 }
 0x579   : > { %v1663_v59 = vadd.f32 %v5043_v58, %v4497_v53  ;;  %v1654_v60 = vpop.f32.mrb[19].mxu1  ;;  %v5637_v58 = vld [vmem:[#allocation8 + $0x80] sm:$0xff]  }
 0x57a   : > { %v1655_v61 = vadd.f32 %v4497_v53, %v1654_v60  ;;  %v5639_v60 = vld [vmem:[#allocation8 + $0x90] sm:$0xff]  }
 0x57b   : > { %v1782_v62 = vpack.c.bf16 %v1663_v59, %v1660_v55  ;;  %v5638_v59 = vld [vmem:[#allocation8 + $0x88] sm:$0xff]  }
 0x57c   : > { %v1781_v63 = vpack.c.bf16 %v1655_v61, %v1652_v57  ;;  %v5641_v61 = vld [vmem:[#allocation8 + $0x98] sm:$0xff]  }
 0x57e   : > { %5052 = vmatprep.subr.bf16.mxu1 %v1781_v63 }
 0x57f   : > { %5053 = vmatpush3.bf16.msra.mxu1 %v1781_v63 }
 0x580   : > { %5054 = vmatprep.subr.bf16.mxu1 %v1782_v62 }
 0x583   : > { %5055 = vmatpush3.bf16.msra.mxu1 %v1782_v62 }
 0x632   : > { %v5050_v41 = vpop.f32.mrb[12].mxu0 }
 0x633   : > { %v1716_v42 = vpop.f32.mrb[13].mxu0  ;;  %v1733_v46 = vmul.f32 0.25, %v5050_v41 }
 0x634   : > { %v1731_v43 = vmul.f32 0.25, %v1716_v42  ;;  %v5051_v44 = vpop.f32.mrb[14].mxu0 }
 0x635   : > { %v1719_v45 = vpop.f32.mrb[15].mxu0  ;;  %v1734_v49 = vmul.f32 0.25, %v5051_v44  ;;  %v1741_v51 = vsel %vm1251_vm1, %v1733_v46, -inf  ;;  %v5640_v44 = vld [vmem:[#allocation5 + $0x80] sm:$0xff]  }
 0x636   : > { %v1732_v47 = vmul.f32 0.25, %v1719_v45  ;;  %v1735_v48 = vsel %vm1251_vm1, %v1731_v43, -inf  ;;  %5072 = vmatprep.subr.bf16.mxu1 %v5640_v44  ;;  %v5642_v45 = vld [vmem:[#allocation5 + $0x88] sm:$0xff]  }
 0x637   : > { %1736 = vmax.xlane.f32.xlu0 %v1735_v48  ;;  %v1744_v52 = vsel %vm1251_vm1, %v1734_v49, -inf  ;;  %v5648_v48 = vld [vmem:[#allocation5 + $0xa0] sm:$0xff]  }
 0x638   : > { %v1738_v50 = vsel %vm1251_vm1, %v1732_v47, -inf }
 0x639   : > { %1739 = vmax.xlane.f32.xlu1 %v1738_v50  ;;  %v5651_v50 = vld [vmem:[#allocation5 + $0xb0] sm:$0xff]  }
 0x63b   : > { %1742 = vmax.xlane.f32.xlu0 %v1741_v51  ;;  %v5652_v51 = vld [vmem:[#allocation5 + $0xb8] sm:$0xff]  }
 0x63d   : > { %1745 = vmax.xlane.f32.xlu1 %v1744_v52 }
 0x6c4   : > { %v1737_v0 = vpop.xlane.xlu0 %1736 }
 0x6c5   : > { %v1747_v1 = vsub.f32 %v1731_v43, %v1737_v0  ;;  %v5636_v43 = vld [vmem:[#allocation14] sm:$0xff]  }
 0x6c6   : > { %v1740_v2 = vpop.xlane.xlu1 %1739  ;;  %5066 = vmatprep.subr.bf16.mxu0 %v5636_v43 }
 0x6c7   : > { %v1751_v3 = vmul.f32 1.442695, %v1747_v1  ;;  %v1748_v4 = vsub.f32 %v1732_v47, %v1740_v2  ;;  %v5646_v47 = vld [vmem:[#allocation5 + $0x98] sm:$0xff]  }
 0x6c8   : > { %v1743_v5 = vpop.xlane.xlu0 %1742 }
 0x6c9   : > { %5753 = vpow2.f32 %v1751_v3  ;;  %v1753_v6 = vmul.f32 1.442695, %v1748_v4  ;;  %v1749_v7 = vsub.f32 %v1733_v46, %v1743_v5  ;;  %v5644_v46 = vld [vmem:[#allocation5 + $0x90] sm:$0xff]  }
 0x6ca   : > { %v1746_v8 = vpop.xlane.xlu1 %1745 }
 0x6cb   : > { %5755 = vpow2.f32 %v1753_v6  ;;  %v1755_v9 = vmul.f32 1.442695, %v1749_v7  ;;  %v1750_v10 = vsub.f32 %v1734_v49, %v1746_v8  ;;  %v5650_v49 = vld [vmem:[#allocation5 + $0xa8] sm:$0xff]  }
 0x6cc   : > { %v4525_v8 = vld [vmem:[#allocation10 + $0x2] ss:$0 sm:$0xff] }
 0x6cd   : > { %5757 = vpow2.f32 %v1755_v9  ;;  %v1757_v12 = vmul.f32 1.442695, %v1750_v10 }
 0x6cf   : > { %5759 = vpow2.f32 %v1757_v12 }
 0x6d3   : > { %v5754_v13 = vpop.eup %5753 }
 0x6d4   : > { %v1759_v14 = vsel %vm1251_vm1, %v5754_v13, 0.0 }
 0x6d5   : > { %v5756_v22 = vpop.eup %5755  ;;  %1760 = vadd.xlane.f32.xlu0 %v1759_v14 }
 0x6d6   : > { %v1762_v23 = vsel %vm1251_vm1, %v5756_v22, 0.0 }
 0x6d7   : > { %v5758_v24 = vpop.eup %5757  ;;  %1763 = vadd.xlane.f32.xlu1 %v1762_v23 }
 0x6d8   : > { %v1765_v25 = vsel %vm1251_vm1, %v5758_v24, 0.0 }
 0x6d9   : > { %v5760_v26 = vpop.eup %5759  ;;  %1766 = vadd.xlane.f32.xlu0 %v1765_v25 }
 0x6da   : > { %v1768_v27 = vsel %vm1251_vm1, %v5760_v26, 0.0 }
 0x6db   : > { %1769 = vadd.xlane.f32.xlu1 %v1768_v27 }
 0x762   : > { %v1761_v29 = vpop.xlane.xlu0 %1760 }
 0x763   : > { %5761 = vrcp.f32 %v1761_v29  ;;  %v5654_v29 = vld [vmem:[#allocation11 + $0x88] sm:$0xff]  }
 0x764   : > { %v1764_v30 = vpop.xlane.xlu1 %1763 }
 0x765   : > { %5763 = vrcp.f32 %v1764_v30  ;;  %v5655_v30 = vld [vmem:[#allocation11 + $0x90] sm:$0xff]  }
 0x766   : > { %v1767_v31 = vpop.xlane.xlu0 %1766 }
 0x767   : > { %5765 = vrcp.f32 %v1767_v31  ;;  %v5656_v31 = vld [vmem:[#allocation11 + $0x98] sm:$0xff]  }
 0x768   : > { %v1770_v32 = vpop.xlane.xlu1 %1769 }
 0x769   : > { %5767 = vrcp.f32 %v1770_v32  ;;  %v5657_v32 = vld [vmem:[#allocation11 + $0xa0] sm:$0xff]  }
 0x76d   : > { %v5762_v33 = vpop.eup %5761 }
 0x76e   : > { %v1772_v35 = vmul.f32 %v5762_v33, %v5754_v13  ;;  %v5658_v33 = vld [vmem:[#allocation11 + $0xa8] sm:$0xff]  }
 0x76f   : > { %v5764_v34 = vpop.eup %5763 }
 0x770   : > { %v1774_v36 = vmul.f32 %v5764_v34, %v5756_v22  ;;  %v5659_v34 = vld [vmem:[#allocation11 + $0xb0] sm:$0xff]  }
 0x771   : > { %v5766_v37 = vpop.eup %5765 }
 0x772   : > { %v1779_v38 = vpack.c.bf16 %v1774_v36, %v1772_v35  ;;  %v1776_v40 = vmul.f32 %v5766_v37, %v5758_v24  ;;  %v5660_v35 = vld [vmem:[#allocation11 + $0xb8] sm:$0xff]  }
 0x773   : > { %v5768_v39 = vpop.eup %5767 }
 0x774   : > { %v1778_v41 = vmul.f32 %v5768_v39, %v5760_v26  ;;  %5056 = vmatprep.mubr.msk.bf16.mxu1 %vm1251_vm1, %v1779_v38 }
 0x776   : > { %v1780_v42 = vpack.c.bf16 %v1778_v41, %v1776_v40 }
 0x778   : > { %5057 = vmatmul.mubr.msk.bf16.vlgmr.msra.gmra.mrb[20].mxu1 %vm1251_vm1, %v1780_v42 }
 0x779   : > { %5088 = vmatprep.mubr.bf16.mxu1 %v6720_v11  ;;  %5073 = vmatpush3.bf16.msra.mxu1 %v5640_v44 }
 0x77a   : > { %5074 = vmatprep.subr.bf16.mxu1 %v5642_v45 }
 0x77d   : > { %5075 = vmatpush3.bf16.msra.mxu1 %v5642_v45 }
 0x77e   : > { %5076 = vmatprep.subr.bf16.mxu1 %v5644_v46 }
 0x781   : > { %5077 = vmatpush3.bf16.msra.mxu1 %v5644_v46 }
 0x782   : > { %5078 = vmatprep.subr.bf16.mxu1 %v5646_v47 }
 0x785   : > { %5079 = vmatpush3.bf16.msra.mxu1 %v5646_v47 }
 0x786   : > { %5080 = vmatprep.subr.bf16.mxu1 %v5648_v48 }
 0x789   : > { %5081 = vmatpush3.bf16.msra.mxu1 %v5648_v48  ;;  %v4534_v48 = vld [vmem:[#allocation13 + $0x2] ss:$0 sm:$0xff] }
 0x78a   : > { %5082 = vmatprep.subr.bf16.mxu1 %v5650_v49 }
 0x78d   : > { %5083 = vmatpush3.bf16.msra.mxu1 %v5650_v49 }
 0x78e   : > { %5084 = vmatprep.subr.bf16.mxu1 %v5651_v50 }
 0x791   : > { %5085 = vmatpush3.bf16.msra.mxu1 %v5651_v50 }
 0x792   : > { %5086 = vmatprep.subr.bf16.mxu1 %v5652_v51 }
 0x795   : > { %5087 = vmatpush3.bf16.msra.mxu1 %v5652_v51 }
 0x796   : > { %5112 = vmatprep.subr.bf16.mxu1 %v5653_v28 }
 0x798   : > { %5089 = vmatmul.mubr.bf16.vlgmr.msra.gmra.mrb[24].mxu1 %v6726_v21 }
 0x799   : > { %5128 = vmatprep.mubr.bf16.mxu1 %v6720_v11  ;;  %5113 = vmatpush3.bf16.msra.mxu1 %v5653_v28 }
 0x79a   : > { %5114 = vmatprep.subr.bf16.mxu1 %v5654_v29 }
 0x79d   : > { %5115 = vmatpush3.bf16.msra.mxu1 %v5654_v29 }
 0x79e   : > { %5116 = vmatprep.subr.bf16.mxu1 %v5655_v30 }
 0x7a1   : > { %5117 = vmatpush3.bf16.msra.mxu1 %v5655_v30 }
 0x7a2   : > { %5118 = vmatprep.subr.bf16.mxu1 %v5656_v31 }
 0x7a5   : > { %5119 = vmatpush3.bf16.msra.mxu1 %v5656_v31 }
 0x7a6   : > { %5120 = vmatprep.subr.bf16.mxu1 %v5657_v32 }
 0x7a9   : > { %5121 = vmatpush3.bf16.msra.mxu1 %v5657_v32  ;;  %v5662_v32 = vld [vmem:[#allocation8 + $0xc0] sm:$0xff]  }
 0x7aa   : > { %5122 = vmatprep.subr.bf16.mxu1 %v5658_v33 }
 0x7ad   : > { %5123 = vmatpush3.bf16.msra.mxu1 %v5658_v33  ;;  %v5665_v33 = vld [vmem:[#allocation5 + $0xc0] sm:$0xff]  }
 0x7ae   : > { %5124 = vmatprep.subr.bf16.mxu1 %v5659_v34 }
 0x7b1   : > { %5125 = vmatpush3.bf16.msra.mxu1 %v5659_v34  ;;  %v5667_v34 = vld [vmem:[#allocation5 + $0xc8] sm:$0xff]  }
 0x7b2   : > { %5126 = vmatprep.subr.bf16.mxu1 %v5660_v35 }
 0x7b5   : > { %5127 = vmatpush3.bf16.msra.mxu1 %v5660_v35  ;;  %v5669_v35 = vld [vmem:[#allocation5 + $0xd0] sm:$0xff]  }
 0x7b6   : > { %5154 = vmatprep.subr.bf16.mxu1 %v5665_v33 }
 0x7b8   : > { %5129 = vmatmul.mubr.bf16.vlgmr.msra.gmra.mrb[28].mxu1 %v6726_v21 }
 0x7b9   : > { %5170 = vmatprep.mubr.bf16.mxu1 %v6720_v11  ;;  %5155 = vmatpush3.bf16.msra.mxu1 %v5665_v33 }
 0x7ba   : > { %5156 = vmatprep.subr.bf16.mxu1 %v5667_v34 }
 0x7bd   : > { %5157 = vmatpush3.bf16.msra.mxu1 %v5667_v34 }
 0x7be   : > { %5158 = vmatprep.subr.bf16.mxu1 %v5669_v35 }
 0x7c1   : > { %5159 = vmatpush3.bf16.msra.mxu1 %v5669_v35 }
 0x84b   : > { %v5058_v52 = vpop.f32.mrb[20].mxu1 }
 0x84c   : > { %v1823_v53 = vpop.f32.mrb[21].mxu1 }
 0x84d   : > { %v5059_v54 = vpop.f32.mrb[22].mxu1 }
 0x84e   : > { %v1839_v55 = vpack.c.bf16 %v5059_v54, %v5058_v52  ;;  %v1826_v56 = vpop.f32.mrb[23].mxu1 }
 0x84f   : > { %v1838_v57 = vpack.c.bf16 %v1826_v56, %v1823_v53 }
 0x851   : > { %5062 = vmatprep.mubr.msk.bf16.mxu0 %vm1185_vm0, %v1838_v57 }
 0x852   : > { %5063 = vmatmul.mubr.msk.bf16.vlgmr.msra.gmra.mrb[16].mxu0 %vm1185_vm0, %v1839_v55 }
 0x853   : > { %5067 = vmatpush3.bf16.msra.mxu0 %v5636_v43  ;;  %5068 = vmatprep.mubr.msk.bf16.mxu0 %vm1185_vm0, %v1355_v20  ;;  %v5647_v20 = vld [vmem:[#allocation8 + $0xb0] sm:$0xff]  }
 0x854   : > { %5092 = vmatprep.subr.bf16.mxu0 %v5637_v58 }
 0x85e   : > { %5069 = vmatmul.mubr.msk.bf16.vlgmr.msra.gmra.mrb[16].mxu0 %vm1185_vm0, %v1356_v18 }
 0x85f   : > { %5093 = vmatpush3.bf16.msra.mxu0 %v5637_v58  ;;  %5108 = vmatprep.mubr.bf16.mxu0 %v6720_v11 }
 0x860   : > { %5094 = vmatprep.subr.bf16.mxu0 %v5638_v59 }
 0x863   : > { %5095 = vmatpush3.bf16.msra.mxu0 %v5638_v59 }
 0x864   : > { %5096 = vmatprep.subr.bf16.mxu0 %v5639_v60 }
 0x867   : > { %5097 = vmatpush3.bf16.msra.mxu0 %v5639_v60 }
 0x868   : > { %5098 = vmatprep.subr.bf16.mxu0 %v5641_v61 }
 0x86b   : > { %5099 = vmatpush3.bf16.msra.mxu0 %v5641_v61  ;;  %v5090_v18 = vpop.f32.mrb[24].mxu1 }
 0x86c   : > { %5100 = vmatprep.subr.bf16.mxu0 %v5643_v16  ;;  %v2059_v62 = vadd.f32 %v5090_v18, %v4516_v17  ;;  %v2050_v63 = vpop.f32.mrb[25].mxu1 }
 0x86d   : > { %v2051_v0 = vadd.f32 %v4516_v17, %v2050_v63  ;;  %v5091_v1 = vpop.f32.mrb[26].mxu1 }
 0x86e   : > { %v2062_v2 = vadd.f32 %v5091_v1, %v4516_v17  ;;  %v2053_v3 = vpop.f32.mrb[27].mxu1 }
 0x86f   : > { %5101 = vmatpush3.bf16.msra.mxu0 %v5643_v16  ;;  %v2054_v4 = vadd.f32 %v4516_v17, %v2053_v3 }
 0x870   : > { %5102 = vmatprep.subr.bf16.mxu0 %v5645_v19  ;;  %v2272_v5 = vpack.c.bf16 %v2062_v2, %v2059_v62 }
 0x871   : > { %v2271_v6 = vpack.c.bf16 %v2054_v4, %v2051_v0 }
 0x873   : > { %5103 = vmatpush3.bf16.msra.mxu0 %v5645_v19 }
 0x874   : > { %5104 = vmatprep.subr.bf16.mxu0 %v5647_v20 }
 0x877   : > { %5105 = vmatpush3.bf16.msra.mxu0 %v5647_v20 }
 0x878   : > { %5106 = vmatprep.subr.bf16.mxu0 %v5649_v15 }
 0x87b   : > { %5107 = vmatpush3.bf16.msra.mxu0 %v5649_v15 }
 0x87e   : > { %5109 = vmatmul.mubr.bf16.vlgmr.msra.gmra.mrb[20].mxu0 %v6726_v21 }
 0x87f   : > { %5136 = vmatprep.mubr.msk.bf16.mxu0 %vm1185_vm0, %v2271_v6 }
 0x88b   : > { %v5130_v49 = vpop.f32.mrb[28].mxu1 }
 0x88c   : > { %v2265_v50 = vadd.f32 %v5130_v49, %v4534_v48  ;;  %v2256_v51 = vpop.f32.mrb[29].mxu1  ;;  %v5666_v49 = vld [vmem:[#allocation8 + $0xd8] sm:$0xff]  }
 0x88d   : > { %v2257_v52 = vadd.f32 %v4534_v48, %v2256_v51  ;;  %v5131_v53 = vpop.f32.mrb[30].mxu1  ;;  %v5670_v51 = vld [vmem:[#allocation8 + $0xe8] sm:$0xff]  }
 0x88e   : > { %v2268_v54 = vadd.f32 %v5131_v53, %v4534_v48  ;;  %v2259_v55 = vpop.f32.mrb[31].mxu1  ;;  %v5674_v53 = vld [vmem:[#allocation8 + $0xf8] sm:$0xff]  }
 0x88f   : > { %v2260_v56 = vadd.f32 %v4534_v48, %v2259_v55  ;;  %v5664_v48 = vld [vmem:[#allocation8 + $0xd0] sm:$0xff]  }
 0x890   : > { %v2387_v57 = vpack.c.bf16 %v2268_v54, %v2265_v50  ;;  %v5668_v50 = vld [vmem:[#allocation8 + $0xe0] sm:$0xff]   ;;  %v4550_v54 = vld [vmem:[#allocation7 + $0x3] ss:$0 sm:$0xff] }
 0x891   : > { %v2386_v58 = vpack.c.bf16 %v2260_v56, %v2257_v52  ;;  %v5672_v52 = vld [vmem:[#allocation8 + $0xf0] sm:$0xff]  }
 0x951   : > { %v5110_v7 = vpop.f32.mrb[20].mxu0 }
 0x952   : > { %v2153_v9 = vpop.f32.mrb[21].mxu0  ;;  %v2162_v12 = vadd.f32 %v5110_v7, %v4525_v8 }
 0x953   : > { %v5111_v10 = vpop.f32.mrb[22].mxu0  ;;  %v2154_v22 = vadd.f32 %v4525_v8, %v2153_v9  ;;  %v5661_v9 = vld [vmem:[#allocation14 + $0x10] sm:$0xff]  }
 0x954   : > { %v2165_v13 = vadd.f32 %v5111_v10, %v4525_v8  ;;  %v2156_v14 = vpop.f32.mrb[23].mxu0 }
 0x955   : > { %v2157_v23 = vadd.f32 %v4525_v8, %v2156_v14 }
 0x956   : > { %v2274_v24 = vpack.c.bf16 %v2165_v13, %v2162_v12 }
 0x957   : > { %v2273_v25 = vpack.c.bf16 %v2157_v23, %v2154_v22 }
 0x958   : > { %v2285_v27 = vsel %vm1185_vm0, %v2274_v24, 0 }
 0x959   : > { %5424 = vmatprep.subr.msk.bf16.mxu0 %vm1185_vm0, %v2273_v25  ;;  %v2282_v26 = vsel %vm1185_vm0, %v2273_v25, 0 }
 0x95a   : > { %5133 = vmatpush3.bf16.xpose.msra.mxu0 %v2282_v26 }
 0x95b   : > { %5425 = vmatprep.subr.msk.bf16.mxu0 %vm1185_vm0, %v2274_v24 }
 0x962   : > { %5135 = vmatpush3.bf16.xpose.msra.mxu0 %v2285_v27 }
 0x963   : > { %5140 = vmatprep.subr.bf16.mxu0 %v2386_v58 }
 0x969   : > { %5137 = vmatmul.mubr.msk.bf16.vlgmr.msra.gmra.mrb[24].mxu0 %vm1185_vm0, %v2272_v5 }
 0x96a   : > { %5141 = vmatpush3.bf16.msra.mxu0 %v2386_v58 }
 0x96b   : > { %5142 = vmatprep.subr.bf16.mxu0 %v2387_v57 }
 0x96e   : > { %5143 = vmatpush3.bf16.msra.mxu0 %v2387_v57 }
 0x96f   : > { %5148 = vmatprep.subr.bf16.mxu0 %v5661_v9 }
 0xa3c   : > { %v5138_v36 = vpop.f32.mrb[24].mxu0 }
 0xa3d   : > { %v2321_v37 = vpop.f32.mrb[25].mxu0  ;;  %v2338_v41 = vmul.f32 0.25, %v5138_v36  ;;  %v5671_v36 = vld [vmem:[#allocation5 + $0xd8] sm:$0xff]  }
 0xa3e   : > { %v2336_v38 = vmul.f32 0.25, %v2321_v37  ;;  %v5139_v39 = vpop.f32.mrb[26].mxu0  ;;  %5160 = vmatprep.subr.bf16.mxu1 %v5671_v36  ;;  %v5673_v37 = vld [vmem:[#allocation5 + $0xe0] sm:$0xff]  }
 0xa3f   : > { %v2324_v40 = vpop.f32.mrb[27].mxu0  ;;  %v2339_v44 = vmul.f32 0.25, %v5139_v39  ;;  %v2346_v46 = vsel %vm1251_vm1, %v2338_v41, -inf  ;;  %5161 = vmatpush3.bf16.msra.mxu1 %v5671_v36  ;;  %v5676_v39 = vld [vmem:[#allocation5 + $0xf0] sm:$0xff]   ;;  %v4568_v36 = vld [vmem:[#allocation13 + $0x3] ss:$0 sm:$0xff] }
 0xa40   : > { %v2337_v42 = vmul.f32 0.25, %v2324_v40  ;;  %v2340_v43 = vsel %vm1251_vm1, %v2336_v38, -inf  ;;  %5162 = vmatprep.subr.bf16.mxu1 %v5673_v37  ;;  %v5677_v40 = vld [vmem:[#allocation5 + $0xf8] sm:$0xff]  }
 0xa41   : > { %2341 = vmax.xlane.f32.xlu0 %v2340_v43  ;;  %v2349_v47 = vsel %vm1251_vm1, %v2339_v44, -inf }
 0xa42   : > { %v2343_v45 = vsel %vm1251_vm1, %v2337_v42, -inf }
 0xa43   : > { %2344 = vmax.xlane.f32.xlu1 %v2343_v45  ;;  %5163 = vmatpush3.bf16.msra.mxu1 %v5673_v37 }
 0xa45   : > { %2347 = vmax.xlane.f32.xlu0 %v2346_v46 }
 0xa47   : > { %2350 = vmax.xlane.f32.xlu1 %v2349_v47  ;;  %v5663_v47 = vld [vmem:[#allocation8 + $0xc8] sm:$0xff]  }
 0xace   : > { %v2342_v59 = vpop.xlane.xlu0 %2341 }
 0xacf   : > { %v2352_v60 = vsub.f32 %v2336_v38, %v2342_v59  ;;  %v5675_v38 = vld [vmem:[#allocation5 + $0xe8] sm:$0xff]  }
 0xad0   : > { %v2345_v61 = vpop.xlane.xlu1 %2344  ;;  %5164 = vmatprep.subr.bf16.mxu1 %v5675_v38 }
 0xad1   : > { %v2356_v16 = vmul.f32 1.442695, %v2352_v60  ;;  %v2353_v19 = vsub.f32 %v2337_v42, %v2345_v61  ;;  %5165 = vmatpush3.bf16.msra.mxu1 %v5675_v38 }
 0xad2   : > { %v2348_v20 = vpop.xlane.xlu0 %2347  ;;  %5166 = vmatprep.subr.bf16.mxu1 %v5676_v39 }
 0xad3   : > { %5769 = vpow2.f32 %v2356_v16  ;;  %v2358_v15 = vmul.f32 1.442695, %v2353_v19  ;;  %v2354_v17 = vsub.f32 %v2338_v41, %v2348_v20 }
 0xad4   : > { %v2351_v18 = vpop.xlane.xlu1 %2350 }
 0xad5   : > { %5771 = vpow2.f32 %v2358_v15  ;;  %v2360_v62 = vmul.f32 1.442695, %v2354_v17  ;;  %v2355_v63 = vsub.f32 %v2339_v44, %v2351_v18  ;;  %5167 = vmatpush3.bf16.msra.mxu1 %v5676_v39  ;;  %v4559_v17 = vld [vmem:[#allocation10 + $0x3] ss:$0 sm:$0xff] }
 0xad6   : > { %5168 = vmatprep.subr.bf16.mxu1 %v5677_v40 }
 0xad7   : > { %5773 = vpow2.f32 %v2360_v62  ;;  %v2362_v0 = vmul.f32 1.442695, %v2355_v63 }
 0xad9   : > { %5775 = vpow2.f32 %v2362_v0  ;;  %5169 = vmatpush3.bf16.msra.mxu1 %v5677_v40 }
 0xadc   : > { %5171 = vmatmul.mubr.bf16.vlgmr.msra.gmra.mrb[32].mxu1 %v6726_v21 }
 0xadd   : > { %v5770_v1 = vpop.eup %5769  ;;  %5210 = vmatprep.mubr.bf16.mxu1 %v6720_v11 }
 0xade   : > { %v2364_v2 = vsel %vm1251_vm1, %v5770_v1, 0.0 }
 0xadf   : > { %v5772_v3 = vpop.eup %5771  ;;  %2365 = vadd.xlane.f32.xlu0 %v2364_v2 }
 0xae0   : > { %v2367_v4 = vsel %vm1251_vm1, %v5772_v3, 0.0 }
 0xae1   : > { %v5774_v5 = vpop.eup %5773  ;;  %2368 = vadd.xlane.f32.xlu1 %v2367_v4 }
 0xae2   : > { %v2370_v6 = vsel %vm1251_vm1, %v5774_v5, 0.0 }
 0xae3   : > { %v5776_v7 = vpop.eup %5775  ;;  %2371 = vadd.xlane.f32.xlu0 %v2370_v6 }
 0xae4   : > { %v2373_v8 = vsel %vm1251_vm1, %v5776_v7, 0.0 }
 0xae5   : > { %2374 = vadd.xlane.f32.xlu1 %v2373_v8  ;;  %v5678_v8 = vld [vmem:[#allocation11 + $0xc0] sm:$0xff]  }
 0xae6   : > { %5194 = vmatprep.subr.bf16.mxu1 %v5678_v8 }
 0xae7   : > { %5195 = vmatpush3.bf16.msra.mxu1 %v5678_v8 }
 0xb6c   : > { %v2366_v10 = vpop.xlane.xlu0 %2365 }
 0xb6d   : > { %5777 = vrcp.f32 %v2366_v10  ;;  %v5680_v10 = vld [vmem:[#allocation11 + $0xd0] sm:$0xff]  }
 0xb6e   : > { %v2369_v12 = vpop.xlane.xlu1 %2368 }
 0xb6f   : > { %5779 = vrcp.f32 %v2369_v12  ;;  %v5681_v12 = vld [vmem:[#allocation11 + $0xd8] sm:$0xff]  }
 0xb70   : > { %v2372_v13 = vpop.xlane.xlu0 %2371 }
 0xb71   : > { %5781 = vrcp.f32 %v2372_v13  ;;  %v5682_v13 = vld [vmem:[#allocation11 + $0xe0] sm:$0xff]  }
 0xb72   : > { %v2375_v14 = vpop.xlane.xlu1 %2374 }
 0xb73   : > { %5783 = vrcp.f32 %v2375_v14  ;;  %v5683_v14 = vld [vmem:[#allocation11 + $0xe8] sm:$0xff]  }
 0xb77   : > { %v5778_v22 = vpop.eup %5777 }
 0xb78   : > { %v2377_v24 = vmul.f32 %v5778_v22, %v5770_v1  ;;  %v5684_v22 = vld [vmem:[#allocation11 + $0xf0] sm:$0xff]  }
 0xb79   : > { %v5780_v23 = vpop.eup %5779 }
 0xb7a   : > { %v2379_v25 = vmul.f32 %v5780_v23, %v5772_v3  ;;  %v5685_v23 = vld [vmem:[#allocation11 + $0xf8] sm:$0xff]  }
 0xb7b   : > { %v5782_v26 = vpop.eup %5781 }
 0xb7c   : > { %v2384_v27 = vpack.c.bf16 %v2379_v25, %v2377_v24  ;;  %v2381_v29 = vmul.f32 %v5782_v26, %v5774_v5 }
 0xb7d   : > { %v5784_v28 = vpop.eup %5783 }
 0xb7e   : > { %v2383_v30 = vmul.f32 %v5784_v28, %v5776_v7  ;;  %5144 = vmatprep.mubr.msk.bf16.mxu0 %vm1251_vm1, %v2384_v27 }
 0xb80   : > { %v2385_v31 = vpack.c.bf16 %v2383_v30, %v2381_v29 }
 0xb82   : > { %5145 = vmatmul.mubr.msk.bf16.vlgmr.msra.gmra.mrb[28].mxu0 %vm1251_vm1, %v2385_v31 }
 0xb83   : > { %5149 = vmatpush3.bf16.msra.mxu0 %v5661_v9  ;;  %v5679_v9 = vld [vmem:[#allocation11 + $0xc8] sm:$0xff]  }
 0xb84   : > { %5174 = vmatprep.subr.bf16.mxu0 %v5662_v32  ;;  %5196 = vmatprep.subr.bf16.mxu1 %v5679_v9 }
 0xb85   : > { %5197 = vmatpush3.bf16.msra.mxu1 %v5679_v9 }
 0xb86   : > { %5198 = vmatprep.subr.bf16.mxu1 %v5680_v10 }
 0xb89   : > { %5199 = vmatpush3.bf16.msra.mxu1 %v5680_v10 }
 0xb8a   : > { %5200 = vmatprep.subr.bf16.mxu1 %v5681_v12 }
 0xb8d   : > { %5201 = vmatpush3.bf16.msra.mxu1 %v5681_v12 }
 0xb8e   : > { %5202 = vmatprep.subr.bf16.mxu1 %v5682_v13 }
 0xb91   : > { %5203 = vmatpush3.bf16.msra.mxu1 %v5682_v13  ;;  %v5687_v13 = vld [vmem:[#allocation8 + $0x100] sm:$0xff]  }
 0xb92   : > { %5204 = vmatprep.subr.bf16.mxu1 %v5683_v14 }
 0xb95   : > { %5205 = vmatpush3.bf16.msra.mxu1 %v5683_v14  ;;  %v5690_v14 = vld [vmem:[#allocation5 + $0x100] sm:$0xff]  }
 0xb96   : > { %5206 = vmatprep.subr.bf16.mxu1 %v5684_v22 }
 0xb99   : > { %5207 = vmatpush3.bf16.msra.mxu1 %v5684_v22  ;;  %v5692_v22 = vld [vmem:[#allocation5 + $0x108] sm:$0xff]  }
 0xb9a   : > { %5208 = vmatprep.subr.bf16.mxu1 %v5685_v23 }
 0xb9d   : > { %5209 = vmatpush3.bf16.msra.mxu1 %v5685_v23  ;;  %v5694_v23 = vld [vmem:[#allocation5 + $0x110] sm:$0xff]  }
 0xb9e   : > { %5236 = vmatprep.subr.bf16.mxu1 %v5690_v14 }
 0xba0   : > { %5211 = vmatmul.mubr.bf16.vlgmr.msra.gmra.mrb[36].mxu1 %v6726_v21 }
 0xba1   : > { %5252 = vmatprep.mubr.bf16.mxu1 %v6720_v11  ;;  %5237 = vmatpush3.bf16.msra.mxu1 %v5690_v14 }
 0xba2   : > { %5238 = vmatprep.subr.bf16.mxu1 %v5692_v22 }
 0xba5   : > { %5239 = vmatpush3.bf16.msra.mxu1 %v5692_v22 }
 0xba6   : > { %5240 = vmatprep.subr.bf16.mxu1 %v5694_v23 }
 0xba9   : > { %5241 = vmatpush3.bf16.msra.mxu1 %v5694_v23 }
 0xbaf   : > { %v5172_v55 = vpop.f32.mrb[32].mxu1 }
 0xbb0   : > { %v2607_v56 = vadd.f32 %v5172_v55, %v4550_v54  ;;  %v2598_v57 = vpop.f32.mrb[33].mxu1 }
 0xbb1   : > { %v2599_v58 = vadd.f32 %v4550_v54, %v2598_v57  ;;  %v5173_v59 = vpop.f32.mrb[34].mxu1 }
 0xbb2   : > { %v2610_v60 = vadd.f32 %v5173_v59, %v4550_v54  ;;  %v2601_v61 = vpop.f32.mrb[35].mxu1 }
 0xbb3   : > { %v2602_v16 = vadd.f32 %v4550_v54, %v2601_v61 }
 0xbb4   : > { %v2820_v19 = vpack.c.bf16 %v2610_v60, %v2607_v56 }
 0xbb5   : > { %v2819_v20 = vpack.c.bf16 %v2602_v16, %v2599_v58 }
 0xc55   : > { %v5146_v41 = vpop.f32.mrb[28].mxu0 }
 0xc56   : > { %v2428_v42 = vpop.f32.mrb[29].mxu0 }
 0xc57   : > { %v5147_v43 = vpop.f32.mrb[30].mxu0 }
 0xc58   : > { %v2444_v44 = vpack.c.bf16 %v5147_v43, %v5146_v41  ;;  %v2431_v45 = vpop.f32.mrb[31].mxu0 }
 0xc59   : > { %v2443_v46 = vpack.c.bf16 %v2431_v45, %v2428_v42 }
 0xc5b   : > { %5150 = vmatprep.mubr.msk.bf16.mxu0 %vm1185_vm0, %v2443_v46 }
 0xc5c   : > { %5151 = vmatmul.mubr.msk.bf16.vlgmr.msra.gmra.mrb[16].mxu0 %vm1185_vm0, %v2444_v44 }
 0xc5d   : > { %5175 = vmatpush3.bf16.msra.mxu0 %v5662_v32  ;;  %5190 = vmatprep.mubr.bf16.mxu0 %v6720_v11 }
 0xc5e   : > { %5176 = vmatprep.subr.bf16.mxu0 %v5663_v47 }
 0xc61   : > { %5177 = vmatpush3.bf16.msra.mxu0 %v5663_v47 }
 0xc62   : > { %5178 = vmatprep.subr.bf16.mxu0 %v5664_v48 }
 0xc65   : > { %5179 = vmatpush3.bf16.msra.mxu0 %v5664_v48 }
 0xc66   : > { %5180 = vmatprep.subr.bf16.mxu0 %v5666_v49 }
 0xc69   : > { %5181 = vmatpush3.bf16.msra.mxu0 %v5666_v49 }
 0xc6a   : > { %5182 = vmatprep.subr.bf16.mxu0 %v5668_v50 }
 0xc6d   : > { %5183 = vmatpush3.bf16.msra.mxu0 %v5668_v50 }
 0xc6e   : > { %5184 = vmatprep.subr.bf16.mxu0 %v5670_v51 }
 0xc71   : > { %5185 = vmatpush3.bf16.msra.mxu0 %v5670_v51 }
 0xc72   : > { %5186 = vmatprep.subr.bf16.mxu0 %v5672_v52 }
 0xc73   : > { %v5212_v37 = vpop.f32.mrb[36].mxu1 }
 0xc74   : > { %v2813_v38 = vadd.f32 %v5212_v37, %v4568_v36  ;;  %v2804_v39 = vpop.f32.mrb[37].mxu1  ;;  %v5691_v37 = vld [vmem:[#allocation8 + $0x118] sm:$0xff]  }
 0xc75   : > { %5187 = vmatpush3.bf16.msra.mxu0 %v5672_v52  ;;  %v2805_v40 = vadd.f32 %v4568_v36, %v2804_v39  ;;  %v5213_v41 = vpop.f32.mrb[38].mxu1  ;;  %v5695_v39 = vld [vmem:[#allocation8 + $0x128] sm:$0xff]  }
 0xc76   : > { %5188 = vmatprep.subr.bf16.mxu0 %v5674_v53  ;;  %v2816_v42 = vadd.f32 %v5213_v41, %v4568_v36  ;;  %v2807_v43 = vpop.f32.mrb[39].mxu1  ;;  %v5699_v41 = vld [vmem:[#allocation8 + $0x138] sm:$0xff]  }
 0xc77   : > { %v2808_v44 = vadd.f32 %v4568_v36, %v2807_v43  ;;  %v5689_v36 = vld [vmem:[#allocation8 + $0x110] sm:$0xff]  }
 0xc78   : > { %v2935_v45 = vpack.c.bf16 %v2816_v42, %v2813_v38  ;;  %v5693_v38 = vld [vmem:[#allocation8 + $0x120] sm:$0xff]   ;;  %v4584_v42 = vld [vmem:[#allocation7 + $0x4] ss:$0 sm:$0xff] }
 0xc79   : > { %5189 = vmatpush3.bf16.msra.mxu0 %v5674_v53  ;;  %v2934_v46 = vpack.c.bf16 %v2808_v44, %v2805_v40  ;;  %v5697_v40 = vld [vmem:[#allocation8 + $0x130] sm:$0xff]  }
 0xc7c   : > { %5191 = vmatmul.mubr.bf16.vlgmr.msra.gmra.mrb[32].mxu0 %v6726_v21 }
 0xc7d   : > { %5218 = vmatprep.mubr.msk.bf16.mxu0 %vm1185_vm0, %v2819_v20 }
 0xd4f   : > { %v5192_v15 = vpop.f32.mrb[32].mxu0 }
 0xd50   : > { %v2701_v18 = vpop.f32.mrb[33].mxu0  ;;  %v2710_v63 = vadd.f32 %v5192_v15, %v4559_v17 }
 0xd51   : > { %v5193_v62 = vpop.f32.mrb[34].mxu0  ;;  %v2702_v2 = vadd.f32 %v4559_v17, %v2701_v18  ;;  %v5686_v18 = vld [vmem:[#allocation14 + $0x18] sm:$0xff]  }
 0xd52   : > { %v2713_v0 = vadd.f32 %v5193_v62, %v4559_v17  ;;  %v2704_v1 = vpop.f32.mrb[35].mxu0 }
 0xd53   : > { %v2705_v3 = vadd.f32 %v4559_v17, %v2704_v1 }
 0xd54   : > { %v2822_v4 = vpack.c.bf16 %v2713_v0, %v2710_v63 }
 0xd55   : > { %v2821_v5 = vpack.c.bf16 %v2705_v3, %v2702_v2 }
 0xd56   : > { %v2833_v7 = vsel %vm1185_vm0, %v2822_v4, 0 }
 0xd57   : > { %5426 = vmatprep.subr.msk.bf16.mxu0 %vm1185_vm0, %v2821_v5  ;;  %v2830_v6 = vsel %vm1185_vm0, %v2821_v5, 0 }
 0xd58   : > { %5215 = vmatpush3.bf16.xpose.msra.mxu0 %v2830_v6 }
 0xd59   : > { %5427 = vmatprep.subr.msk.bf16.mxu0 %vm1185_vm0, %v2822_v4 }
 0xd60   : > { %5217 = vmatpush3.bf16.xpose.msra.mxu0 %v2833_v7 }
 0xd61   : > { %5222 = vmatprep.subr.bf16.mxu0 %v2934_v46 }
 0xd67   : > { %5219 = vmatmul.mubr.msk.bf16.vlgmr.msra.gmra.mrb[36].mxu0 %vm1185_vm0, %v2820_v19 }
 0xd68   : > { %5223 = vmatpush3.bf16.msra.mxu0 %v2934_v46 }
 0xd69   : > { %5224 = vmatprep.subr.bf16.mxu0 %v2935_v45 }
 0xd6c   : > { %5225 = vmatpush3.bf16.msra.mxu0 %v2935_v45 }
 0xd6d   : > { %5230 = vmatprep.subr.bf16.mxu0 %v5686_v18 }
 0xe3a   : > { %v5220_v24 = vpop.f32.mrb[36].mxu0 }
 0xe3b   : > { %v2869_v25 = vpop.f32.mrb[37].mxu0  ;;  %v2886_v29 = vmul.f32 0.25, %v5220_v24  ;;  %v5696_v24 = vld [vmem:[#allocation5 + $0x118] sm:$0xff]  }
 0xe3c   : > { %v2884_v26 = vmul.f32 0.25, %v2869_v25  ;;  %v5221_v27 = vpop.f32.mrb[38].mxu0  ;;  %5242 = vmatprep.subr.bf16.mxu1 %v5696_v24  ;;  %v5698_v25 = vld [vmem:[#allocation5 + $0x120] sm:$0xff]  }
 0xe3d   : > { %v2872_v28 = vpop.f32.mrb[39].mxu0  ;;  %v2887_v32 = vmul.f32 0.25, %v5221_v27  ;;  %v2894_v34 = vsel %vm1251_vm1, %v2886_v29, -inf  ;;  %5243 = vmatpush3.bf16.msra.mxu1 %v5696_v24  ;;  %v5701_v27 = vld [vmem:[#allocation5 + $0x130] sm:$0xff]  }
 0xe3e   : > { %v2885_v30 = vmul.f32 0.25, %v2872_v28  ;;  %v2888_v31 = vsel %vm1251_vm1, %v2884_v26, -inf  ;;  %5244 = vmatprep.subr.bf16.mxu1 %v5698_v25  ;;  %v5702_v28 = vld [vmem:[#allocation5 + $0x138] sm:$0xff]   ;;  %v4602_v24 = vld [vmem:[#allocation13 + $0x4] ss:$0 sm:$0xff] }
 0xe3f   : > { %2889 = vmax.xlane.f32.xlu0 %v2888_v31  ;;  %v2897_v35 = vsel %vm1251_vm1, %v2887_v32, -inf }
 0xe40   : > { %v2891_v33 = vsel %vm1251_vm1, %v2885_v30, -inf }
 0xe41   : > { %2892 = vmax.xlane.f32.xlu1 %v2891_v33  ;;  %5245 = vmatpush3.bf16.msra.mxu1 %v5698_v25 }
 0xe43   : > { %2895 = vmax.xlane.f32.xlu0 %v2894_v34 }
 0xe45   : > { %2898 = vmax.xlane.f32.xlu1 %v2897_v35  ;;  %v5688_v35 = vld [vmem:[#allocation8 + $0x108] sm:$0xff]  }
 0xecc   : > { %v2890_v47 = vpop.xlane.xlu0 %2889 }
 0xecd   : > { %v2900_v48 = vsub.f32 %v2884_v26, %v2890_v47  ;;  %v5700_v26 = vld [vmem:[#allocation5 + $0x128] sm:$0xff]  }
 0xece   : > { %v2893_v49 = vpop.xlane.xlu1 %2892  ;;  %5246 = vmatprep.subr.bf16.mxu1 %v5700_v26 }
 0xecf   : > { %v2904_v50 = vmul.f32 1.442695, %v2900_v48  ;;  %v2901_v51 = vsub.f32 %v2885_v30, %v2893_v49  ;;  %5247 = vmatpush3.bf16.msra.mxu1 %v5700_v26 }
 0xed0   : > { %v2896_v52 = vpop.xlane.xlu0 %2895  ;;  %5248 = vmatprep.subr.bf16.mxu1 %v5701_v27 }
 0xed1   : > { %5785 = vpow2.f32 %v2904_v50  ;;  %v2906_v53 = vmul.f32 1.442695, %v2901_v51  ;;  %v2902_v54 = vsub.f32 %v2886_v29, %v2896_v52 }
 0xed2   : > { %v2899_v55 = vpop.xlane.xlu1 %2898 }
 0xed3   : > { %5787 = vpow2.f32 %v2906_v53  ;;  %v2908_v56 = vmul.f32 1.442695, %v2902_v54  ;;  %v2903_v57 = vsub.f32 %v2887_v32, %v2899_v55  ;;  %5249 = vmatpush3.bf16.msra.mxu1 %v5701_v27  ;;  %v4593_v54 = vld [vmem:[#allocation10 + $0x4] ss:$0 sm:$0xff] }
 0xed4   : > { %5250 = vmatprep.subr.bf16.mxu1 %v5702_v28 }
 0xed5   : > { %5789 = vpow2.f32 %v2908_v56  ;;  %v2910_v58 = vmul.f32 1.442695, %v2903_v57 }
 0xed7   : > { %5791 = vpow2.f32 %v2910_v58  ;;  %5251 = vmatpush3.bf16.msra.mxu1 %v5702_v28 }
 0xeda   : > { %5253 = vmatmul.mubr.bf16.vlgmr.msra.gmra.mrb[40].mxu1 %v6726_v21 }
 0xedb   : > { %v5786_v59 = vpop.eup %5785  ;;  %5292 = vmatprep.mubr.bf16.mxu1 %v6720_v11 }
 0xedc   : > { %v2912_v60 = vsel %vm1251_vm1, %v5786_v59, 0.0 }
 0xedd   : > { %v5788_v61 = vpop.eup %5787  ;;  %2913 = vadd.xlane.f32.xlu0 %v2912_v60 }
 0xede   : > { %v2915_v16 = vsel %vm1251_vm1, %v5788_v61, 0.0 }
 0xedf   : > { %v5790_v19 = vpop.eup %5789  ;;  %2916 = vadd.xlane.f32.xlu1 %v2915_v16 }
 0xee0   : > { %v2918_v20 = vsel %vm1251_vm1, %v5790_v19, 0.0 }
 0xee1   : > { %v5792_v15 = vpop.eup %5791  ;;  %2919 = vadd.xlane.f32.xlu0 %v2918_v20 }
 0xee2   : > { %v2921_v17 = vsel %vm1251_vm1, %v5792_v15, 0.0 }
 0xee3   : > { %2922 = vadd.xlane.f32.xlu1 %v2921_v17  ;;  %v5703_v17 = vld [vmem:[#allocation11 + $0x100] sm:$0xff]  }
 0xee4   : > { %5276 = vmatprep.subr.bf16.mxu1 %v5703_v17 }
 0xee5   : > { %5277 = vmatpush3.bf16.msra.mxu1 %v5703_v17 }
 0xf6a   : > { %v2914_v62 = vpop.xlane.xlu0 %2913 }
 0xf6b   : > { %5793 = vrcp.f32 %v2914_v62  ;;  %v5705_v62 = vld [vmem:[#allocation11 + $0x110] sm:$0xff]  }
 0xf6c   : > { %v2917_v63 = vpop.xlane.xlu1 %2916 }
 0xf6d   : > { %5795 = vrcp.f32 %v2917_v63  ;;  %v5706_v63 = vld [vmem:[#allocation11 + $0x118] sm:$0xff]  }
 0xf6e   : > { %v2920_v0 = vpop.xlane.xlu0 %2919 }
 0xf6f   : > { %5797 = vrcp.f32 %v2920_v0  ;;  %v5707_v0 = vld [vmem:[#allocation11 + $0x120] sm:$0xff]  }
 0xf70   : > { %v2923_v1 = vpop.xlane.xlu1 %2922 }
 0xf71   : > { %5799 = vrcp.f32 %v2923_v1  ;;  %v5708_v1 = vld [vmem:[#allocation11 + $0x128] sm:$0xff]  }
 0xf75   : > { %v5794_v2 = vpop.eup %5793 }
 0xf76   : > { %v2925_v4 = vmul.f32 %v5794_v2, %v5786_v59  ;;  %v5709_v2 = vld [vmem:[#allocation11 + $0x130] sm:$0xff]  }
 0xf77   : > { %v5796_v3 = vpop.eup %5795 }
 0xf78   : > { %v2927_v5 = vmul.f32 %v5796_v3, %v5788_v61  ;;  %v5710_v3 = vld [vmem:[#allocation11 + $0x138] sm:$0xff]  }
 0xf79   : > { %v5798_v6 = vpop.eup %5797 }
 0xf7a   : > { %v2932_v7 = vpack.c.bf16 %v2927_v5, %v2925_v4  ;;  %v2929_v9 = vmul.f32 %v5798_v6, %v5790_v19 }
 0xf7b   : > { %v5800_v8 = vpop.eup %5799 }
 0xf7c   : > { %v2931_v10 = vmul.f32 %v5800_v8, %v5792_v15  ;;  %5226 = vmatprep.mubr.msk.bf16.mxu0 %vm1251_vm1, %v2932_v7 }
 0xf7e   : > { %v2933_v12 = vpack.c.bf16 %v2931_v10, %v2929_v9 }
 0xf80   : > { %5227 = vmatmul.mubr.msk.bf16.vlgmr.msra.gmra.mrb[40].mxu0 %vm1251_vm1, %v2933_v12 }
 0xf81   : > { %5231 = vmatpush3.bf16.msra.mxu0 %v5686_v18  ;;  %v5704_v18 = vld [vmem:[#allocation11 + $0x108] sm:$0xff]  }
 0xf82   : > { %5256 = vmatprep.subr.bf16.mxu0 %v5687_v13  ;;  %5278 = vmatprep.subr.bf16.mxu1 %v5704_v18 }
 0xf83   : > { %5279 = vmatpush3.bf16.msra.mxu1 %v5704_v18 }
 0xf84   : > { %5280 = vmatprep.subr.bf16.mxu1 %v5705_v62 }
 0xf87   : > { %5281 = vmatpush3.bf16.msra.mxu1 %v5705_v62 }
 0xf88   : > { %5282 = vmatprep.subr.bf16.mxu1 %v5706_v63 }
 0xf8b   : > { %5283 = vmatpush3.bf16.msra.mxu1 %v5706_v63 }
 0xf8c   : > { %5284 = vmatprep.subr.bf16.mxu1 %v5707_v0 }
 0xf8f   : > { %5285 = vmatpush3.bf16.msra.mxu1 %v5707_v0  ;;  %v5712_v0 = vld [vmem:[#allocation8 + $0x140] sm:$0xff]  }
 0xf90   : > { %5286 = vmatprep.subr.bf16.mxu1 %v5708_v1 }
 0xf93   : > { %5287 = vmatpush3.bf16.msra.mxu1 %v5708_v1  ;;  %v5715_v1 = vld [vmem:[#allocation5 + $0x140] sm:$0xff]  }
 0xf94   : > { %5288 = vmatprep.subr.bf16.mxu1 %v5709_v2 }
 0xf97   : > { %5289 = vmatpush3.bf16.msra.mxu1 %v5709_v2  ;;  %v5717_v2 = vld [vmem:[#allocation5 + $0x148] sm:$0xff]  }
 0xf98   : > { %5290 = vmatprep.subr.bf16.mxu1 %v5710_v3 }
 0xf9b   : > { %5291 = vmatpush3.bf16.msra.mxu1 %v5710_v3  ;;  %v5719_v3 = vld [vmem:[#allocation5 + $0x150] sm:$0xff]  }
 0xf9c   : > { %5318 = vmatprep.subr.bf16.mxu1 %v5715_v1 }
 0xf9e   : > { %5293 = vmatmul.mubr.bf16.vlgmr.msra.gmra.mrb[44].mxu1 %v6726_v21 }
 0xf9f   : > { %5334 = vmatprep.mubr.bf16.mxu1 %v6720_v11  ;;  %5319 = vmatpush3.bf16.msra.mxu1 %v5715_v1 }
 0xfa0   : > { %5320 = vmatprep.subr.bf16.mxu1 %v5717_v2 }
 0xfa3   : > { %5321 = vmatpush3.bf16.msra.mxu1 %v5717_v2 }
 0xfa4   : > { %5322 = vmatprep.subr.bf16.mxu1 %v5719_v3 }
 0xfa7   : > { %5323 = vmatpush3.bf16.msra.mxu1 %v5719_v3 }
 0xfad   : > { %v5254_v43 = vpop.f32.mrb[40].mxu1 }
 0xfae   : > { %v3155_v44 = vadd.f32 %v5254_v43, %v4584_v42  ;;  %v3146_v45 = vpop.f32.mrb[41].mxu1 }
 0xfaf   : > { %v3147_v46 = vadd.f32 %v4584_v42, %v3146_v45  ;;  %v5255_v47 = vpop.f32.mrb[42].mxu1 }
 0xfb0   : > { %v3158_v48 = vadd.f32 %v5255_v47, %v4584_v42  ;;  %v3149_v49 = vpop.f32.mrb[43].mxu1 }
 0xfb1   : > { %v3150_v50 = vadd.f32 %v4584_v42, %v3149_v49 }
 0xfb2   : > { %v3368_v51 = vpack.c.bf16 %v3158_v48, %v3155_v44 }
 0xfb3   : > { %v3367_v52 = vpack.c.bf16 %v3150_v50, %v3147_v46 }
0x1053   : > { %v5228_v29 = vpop.f32.mrb[40].mxu0 }
0x1054   : > { %v2976_v30 = vpop.f32.mrb[41].mxu0 }
0x1055   : > { %v5229_v31 = vpop.f32.mrb[42].mxu0 }
0x1056   : > { %v2992_v32 = vpack.c.bf16 %v5229_v31, %v5228_v29  ;;  %v2979_v33 = vpop.f32.mrb[43].mxu0 }
0x1057   : > { %v2991_v34 = vpack.c.bf16 %v2979_v33, %v2976_v30 }
0x1059   : > { %5232 = vmatprep.mubr.msk.bf16.mxu0 %vm1185_vm0, %v2991_v34 }
0x105a   : > { %5233 = vmatmul.mubr.msk.bf16.vlgmr.msra.gmra.mrb[16].mxu0 %vm1185_vm0, %v2992_v32 }
0x105b   : > { %5257 = vmatpush3.bf16.msra.mxu0 %v5687_v13  ;;  %5272 = vmatprep.mubr.bf16.mxu0 %v6720_v11 }
0x105c   : > { %5258 = vmatprep.subr.bf16.mxu0 %v5688_v35 }
0x105f   : > { %5259 = vmatpush3.bf16.msra.mxu0 %v5688_v35 }
0x1060   : > { %5260 = vmatprep.subr.bf16.mxu0 %v5689_v36 }
0x1063   : > { %5261 = vmatpush3.bf16.msra.mxu0 %v5689_v36 }
0x1064   : > { %5262 = vmatprep.subr.bf16.mxu0 %v5691_v37 }
0x1067   : > { %5263 = vmatpush3.bf16.msra.mxu0 %v5691_v37 }
0x1068   : > { %5264 = vmatprep.subr.bf16.mxu0 %v5693_v38 }
0x106b   : > { %5265 = vmatpush3.bf16.msra.mxu0 %v5693_v38 }
0x106c   : > { %5266 = vmatprep.subr.bf16.mxu0 %v5695_v39 }
0x106f   : > { %5267 = vmatpush3.bf16.msra.mxu0 %v5695_v39 }
0x1070   : > { %5268 = vmatprep.subr.bf16.mxu0 %v5697_v40 }
0x1071   : > { %v5294_v25 = vpop.f32.mrb[44].mxu1 }
0x1072   : > { %v3361_v26 = vadd.f32 %v5294_v25, %v4602_v24  ;;  %v3352_v27 = vpop.f32.mrb[45].mxu1  ;;  %v5716_v25 = vld [vmem:[#allocation8 + $0x158] sm:$0xff]  }
0x1073   : > { %5269 = vmatpush3.bf16.msra.mxu0 %v5697_v40  ;;  %v3353_v28 = vadd.f32 %v4602_v24, %v3352_v27  ;;  %v5295_v29 = vpop.f32.mrb[46].mxu1  ;;  %v5720_v27 = vld [vmem:[#allocation8 + $0x168] sm:$0xff]  }
0x1074   : > { %5270 = vmatprep.subr.bf16.mxu0 %v5699_v41  ;;  %v3364_v30 = vadd.f32 %v5295_v29, %v4602_v24  ;;  %v3355_v31 = vpop.f32.mrb[47].mxu1  ;;  %v5724_v29 = vld [vmem:[#allocation8 + $0x178] sm:$0xff]  }
0x1075   : > { %v3356_v32 = vadd.f32 %v4602_v24, %v3355_v31  ;;  %v5714_v24 = vld [vmem:[#allocation8 + $0x150] sm:$0xff]  }
0x1076   : > { %v3483_v33 = vpack.c.bf16 %v3364_v30, %v3361_v26  ;;  %v5718_v26 = vld [vmem:[#allocation8 + $0x160] sm:$0xff]  }
0x1077   : > { %5271 = vmatpush3.bf16.msra.mxu0 %v5699_v41  ;;  %v3482_v34 = vpack.c.bf16 %v3356_v32, %v3353_v28  ;;  %v5722_v28 = vld [vmem:[#allocation8 + $0x170] sm:$0xff]  }
0x107a   : > { %5273 = vmatmul.mubr.bf16.vlgmr.msra.gmra.mrb[44].mxu0 %v6726_v21 }
0x107b   : > { %5300 = vmatprep.mubr.msk.bf16.mxu0 %vm1185_vm0, %v3367_v52 }
0x114d   : > { %v5274_v53 = vpop.f32.mrb[44].mxu0 }
0x114e   : > { %v3249_v55 = vpop.f32.mrb[45].mxu0  ;;  %v3258_v57 = vadd.f32 %v5274_v53, %v4593_v54 }
0x114f   : > { %v5275_v56 = vpop.f32.mrb[46].mxu0  ;;  %v3250_v60 = vadd.f32 %v4593_v54, %v3249_v55  ;;  %v5711_v55 = vld [vmem:[#allocation14 + $0x20] sm:$0xff]  }
0x1150   : > { %v3261_v58 = vadd.f32 %v5275_v56, %v4593_v54  ;;  %v3252_v59 = vpop.f32.mrb[47].mxu0 }
0x1151   : > { %v3253_v61 = vadd.f32 %v4593_v54, %v3252_v59 }
0x1152   : > { %v3370_v16 = vpack.c.bf16 %v3261_v58, %v3258_v57 }
0x1153   : > { %v3369_v19 = vpack.c.bf16 %v3253_v61, %v3250_v60 }
0x1154   : > { %v3381_v15 = vsel %vm1185_vm0, %v3370_v16, 0 }
0x1155   : > { %5428 = vmatprep.subr.msk.bf16.mxu0 %vm1185_vm0, %v3369_v19  ;;  %v3378_v20 = vsel %vm1185_vm0, %v3369_v19, 0 }
0x1156   : > { %5297 = vmatpush3.bf16.xpose.msra.mxu0 %v3378_v20 }
0x1157   : > { %5429 = vmatprep.subr.msk.bf16.mxu0 %vm1185_vm0, %v3370_v16 }
0x115e   : > { %5299 = vmatpush3.bf16.xpose.msra.mxu0 %v3381_v15 }
0x115f   : > { %5304 = vmatprep.subr.bf16.mxu0 %v3482_v34 }
0x1165   : > { %5301 = vmatmul.mubr.msk.bf16.vlgmr.msra.gmra.mrb[48].mxu0 %vm1185_vm0, %v3368_v51 }
0x1166   : > { %5305 = vmatpush3.bf16.msra.mxu0 %v3482_v34 }
0x1167   : > { %5306 = vmatprep.subr.bf16.mxu0 %v3483_v33 }
0x116a   : > { %5307 = vmatpush3.bf16.msra.mxu0 %v3483_v33 }
0x116b   : > { %5312 = vmatprep.subr.bf16.mxu0 %v5711_v55 }
0x1238   : > { %v5302_v4 = vpop.f32.mrb[48].mxu0 }
0x1239   : > { %v3417_v5 = vpop.f32.mrb[49].mxu0  ;;  %v3434_v9 = vmul.f32 0.25, %v5302_v4  ;;  %v5721_v4 = vld [vmem:[#allocation5 + $0x158] sm:$0xff]  }
0x123a   : > { %v3432_v6 = vmul.f32 0.25, %v3417_v5  ;;  %v5303_v7 = vpop.f32.mrb[50].mxu0  ;;  %5324 = vmatprep.subr.bf16.mxu1 %v5721_v4  ;;  %v5723_v5 = vld [vmem:[#allocation5 + $0x160] sm:$0xff]  }
0x123b   : > { %v3420_v8 = vpop.f32.mrb[51].mxu0  ;;  %v3435_v13 = vmul.f32 0.25, %v5303_v7  ;;  %v3442_v22 = vsel %vm1251_vm1, %v3434_v9, -inf  ;;  %5325 = vmatpush3.bf16.msra.mxu1 %v5721_v4  ;;  %v5726_v7 = vld [vmem:[#allocation5 + $0x170] sm:$0xff]  }
0x123c   : > { %v3433_v10 = vmul.f32 0.25, %v3420_v8  ;;  %v3436_v12 = vsel %vm1251_vm1, %v3432_v6, -inf  ;;  %5326 = vmatprep.subr.bf16.mxu1 %v5723_v5  ;;  %v5727_v8 = vld [vmem:[#allocation5 + $0x178] sm:$0xff]  }
0x123d   : > { %3437 = vmax.xlane.f32.xlu0 %v3436_v12  ;;  %v3445_v23 = vsel %vm1251_vm1, %v3435_v13, -inf }
0x123e   : > { %v3439_v14 = vsel %vm1251_vm1, %v3433_v10, -inf }
0x123f   : > { %3440 = vmax.xlane.f32.xlu1 %v3439_v14  ;;  %5327 = vmatpush3.bf16.msra.mxu1 %v5723_v5 }
0x1241   : > { %3443 = vmax.xlane.f32.xlu0 %v3442_v22 }
0x1243   : > { %3446 = vmax.xlane.f32.xlu1 %v3445_v23  ;;  %v5713_v23 = vld [vmem:[#allocation8 + $0x148] sm:$0xff]  }
0x12ca   : > { %v3438_v35 = vpop.xlane.xlu0 %3437 }
0x12cb   : > { %v3448_v36 = vsub.f32 %v3432_v6, %v3438_v35  ;;  %v5725_v6 = vld [vmem:[#allocation5 + $0x168] sm:$0xff]  }
0x12cc   : > { %v3441_v37 = vpop.xlane.xlu1 %3440  ;;  %5328 = vmatprep.subr.bf16.mxu1 %v5725_v6 }
0x12cd   : > { %v3452_v38 = vmul.f32 1.442695, %v3448_v36  ;;  %v3449_v39 = vsub.f32 %v3433_v10, %v3441_v37  ;;  %5329 = vmatpush3.bf16.msra.mxu1 %v5725_v6 }
0x12ce   : > { %v3444_v40 = vpop.xlane.xlu0 %3443  ;;  %5330 = vmatprep.subr.bf16.mxu1 %v5726_v7 }
0x12cf   : > { %5801 = vpow2.f32 %v3452_v38  ;;  %v3454_v41 = vmul.f32 1.442695, %v3449_v39  ;;  %v3450_v42 = vsub.f32 %v3434_v9, %v3444_v40 }
0x12d0   : > { %v3447_v43 = vpop.xlane.xlu1 %3446 }
0x12d1   : > { %5803 = vpow2.f32 %v3454_v41  ;;  %v3456_v44 = vmul.f32 1.442695, %v3450_v42  ;;  %v3451_v45 = vsub.f32 %v3435_v13, %v3447_v43  ;;  %5331 = vmatpush3.bf16.msra.mxu1 %v5726_v7  ;;  %v4627_v41 = vld [vmem:[#allocation10 + $0x5] ss:$0 sm:$0xff] }
0x12d2   : > { %5332 = vmatprep.subr.bf16.mxu1 %v5727_v8 }
0x12d3   : > { %5805 = vpow2.f32 %v3456_v44  ;;  %v3458_v46 = vmul.f32 1.442695, %v3451_v45 }
0x12d5   : > { %5807 = vpow2.f32 %v3458_v46  ;;  %5333 = vmatpush3.bf16.msra.mxu1 %v5727_v8 }
0x12d8   : > { %5335 = vmatmul.mubr.bf16.vlgmr.msra.gmra.mrb[48].mxu1 %v6726_v21 }
0x12d9   : > { %v5802_v47 = vpop.eup %5801  ;;  %5374 = vmatprep.mubr.bf16.mxu1 %v6720_v11 }
0x12da   : > { %v3460_v48 = vsel %vm1251_vm1, %v5802_v47, 0.0 }
0x12db   : > { %v5804_v49 = vpop.eup %5803  ;;  %3461 = vadd.xlane.f32.xlu0 %v3460_v48 }
0x12dc   : > { %v3463_v50 = vsel %vm1251_vm1, %v5804_v49, 0.0 }
0x12dd   : > { %v5806_v51 = vpop.eup %5805  ;;  %3464 = vadd.xlane.f32.xlu1 %v3463_v50 }
0x12de   : > { %v3466_v52 = vsel %vm1251_vm1, %v5806_v51, 0.0 }
0x12df   : > { %v5808_v53 = vpop.eup %5807  ;;  %3467 = vadd.xlane.f32.xlu0 %v3466_v52 }
0x12e0   : > { %v3469_v54 = vsel %vm1251_vm1, %v5808_v53, 0.0 }
0x12e1   : > { %3470 = vadd.xlane.f32.xlu1 %v3469_v54  ;;  %v5729_v54 = vld [vmem:[#allocation11 + $0x148] sm:$0xff]  }
0x1368   : > { %v3462_v56 = vpop.xlane.xlu0 %3461 }
0x1369   : > { %5809 = vrcp.f32 %v3462_v56  ;;  %v5731_v56 = vld [vmem:[#allocation11 + $0x158] sm:$0xff]  }
0x136a   : > { %v3465_v57 = vpop.xlane.xlu1 %3464 }
0x136b   : > { %5811 = vrcp.f32 %v3465_v57  ;;  %v5732_v57 = vld [vmem:[#allocation11 + $0x160] sm:$0xff]  }
0x136c   : > { %v3468_v58 = vpop.xlane.xlu0 %3467 }
0x136d   : > { %5813 = vrcp.f32 %v3468_v58  ;;  %v5733_v58 = vld [vmem:[#allocation11 + $0x168] sm:$0xff]  }
0x136e   : > { %v3471_v59 = vpop.xlane.xlu1 %3470 }
0x136f   : > { %5815 = vrcp.f32 %v3471_v59  ;;  %v5734_v59 = vld [vmem:[#allocation11 + $0x170] sm:$0xff]  }
0x1373   : > { %v5810_v60 = vpop.eup %5809 }
0x1374   : > { %v3473_v16 = vmul.f32 %v5810_v60, %v5802_v47  ;;  %v5735_v60 = vld [vmem:[#allocation11 + $0x178] sm:$0xff]  }
0x1375   : > { %v5812_v61 = vpop.eup %5811 }
0x1376   : > { %v3475_v19 = vmul.f32 %v5812_v61, %v5804_v49 }
0x1377   : > { %v5814_v20 = vpop.eup %5813 }
0x1378   : > { %v3480_v15 = vpack.c.bf16 %v3475_v19, %v3473_v16  ;;  %v3477_v18 = vmul.f32 %v5814_v20, %v5806_v51 }
0x1379   : > { %v5816_v17 = vpop.eup %5815 }
0x137a   : > { %v3479_v62 = vmul.f32 %v5816_v17, %v5808_v53  ;;  %5308 = vmatprep.mubr.msk.bf16.mxu0 %vm1251_vm1, %v3480_v15  ;;  %v5728_v53 = vld [vmem:[#allocation11 + $0x140] sm:$0xff]  }
0x137b   : > { %5358 = vmatprep.subr.bf16.mxu1 %v5728_v53 }
0x137c   : > { %v3481_v63 = vpack.c.bf16 %v3479_v62, %v3477_v18  ;;  %5359 = vmatpush3.bf16.msra.mxu1 %v5728_v53 }
0x137d   : > { %5360 = vmatprep.subr.bf16.mxu1 %v5729_v54 }
0x137e   : > { %5309 = vmatmul.mubr.msk.bf16.vlgmr.msra.gmra.mrb[52].mxu0 %vm1251_vm1, %v3481_v63 }
0x137f   : > { %5313 = vmatpush3.bf16.msra.mxu0 %v5711_v55  ;;  %v5730_v55 = vld [vmem:[#allocation11 + $0x150] sm:$0xff]  }
0x1380   : > { %5338 = vmatprep.subr.bf16.mxu0 %v5712_v0  ;;  %5361 = vmatpush3.bf16.msra.mxu1 %v5729_v54 }
0x1381   : > { %5362 = vmatprep.subr.bf16.mxu1 %v5730_v55 }
0x1384   : > { %5363 = vmatpush3.bf16.msra.mxu1 %v5730_v55 }
0x1385   : > { %5364 = vmatprep.subr.bf16.mxu1 %v5731_v56 }
0x1388   : > { %5365 = vmatpush3.bf16.msra.mxu1 %v5731_v56 }
0x1389   : > { %5366 = vmatprep.subr.bf16.mxu1 %v5732_v57 }
0x138c   : > { %5367 = vmatpush3.bf16.msra.mxu1 %v5732_v57 }
0x138d   : > { %5368 = vmatprep.subr.bf16.mxu1 %v5733_v58 }
0x1390   : > { %5369 = vmatpush3.bf16.msra.mxu1 %v5733_v58 }
0x1391   : > { %5370 = vmatprep.subr.bf16.mxu1 %v5734_v59 }
0x1394   : > { %5371 = vmatpush3.bf16.msra.mxu1 %v5734_v59 }
0x1395   : > { %5372 = vmatprep.subr.bf16.mxu1 %v5735_v60 }
0x1398   : > { %5373 = vmatpush3.bf16.msra.mxu1 %v5735_v60 }
0x139b   : > { %5375 = vmatmul.mubr.bf16.vlgmr.msra.gmra.mrb[52].mxu1 %v6726_v21 }
0x13ab   : > { %v5336_v30 = vpop.f32.mrb[48].mxu1 }
0x13ac   : > { %v3694_v32 = vpop.f32.mrb[49].mxu1 }
0x13ad   : > { %v5337_v34 = vpop.f32.mrb[50].mxu1 }
0x13ae   : > { %v3697_v36 = vpop.f32.mrb[51].mxu1 }
0x1451   : > { %v5310_v9 = vpop.f32.mrb[52].mxu0 }
0x1452   : > { %v3524_v10 = vpop.f32.mrb[53].mxu0 }
0x1453   : > { %v5311_v12 = vpop.f32.mrb[54].mxu0 }
0x1454   : > { %v3540_v13 = vpack.c.bf16 %v5311_v12, %v5310_v9  ;;  %v3527_v14 = vpop.f32.mrb[55].mxu0 }
0x1455   : > { %v3539_v22 = vpack.c.bf16 %v3527_v14, %v3524_v10 }
0x1457   : > { %5314 = vmatprep.mubr.msk.bf16.mxu0 %vm1185_vm0, %v3539_v22 }
0x1458   : > { %5315 = vmatmul.mubr.msk.bf16.vlgmr.msra.gmra.mrb[16].mxu0 %vm1185_vm0, %v3540_v13 }
0x1459   : > { %5339 = vmatpush3.bf16.msra.mxu0 %v5712_v0  ;;  %5354 = vmatprep.mubr.bf16.mxu0 %v6720_v11  ;;  %v4618_v11 = vld [vmem:[#allocation7 + $0x5] ss:$0 sm:$0xff] }
0x145a   : > { %5340 = vmatprep.subr.bf16.mxu0 %v5713_v23  ;;  %v3703_v31 = vadd.f32 %v5336_v30, %v4618_v11  ;;  %v3695_v33 = vadd.f32 %v4618_v11, %v3694_v32  ;;  %v3706_v35 = vadd.f32 %v5337_v34, %v4618_v11  ;;  %v3698_v37 = vadd.f32 %v4618_v11, %v3697_v36 }
0x145c   : > { %v3916_v38 = vpack.c.bf16 %v3706_v35, %v3703_v31  ;;  %v3915_v39 = vpack.c.bf16 %v3698_v37, %v3695_v33 }
0x145d   : > { %5341 = vmatpush3.bf16.msra.mxu0 %v5713_v23 }
0x145e   : > { %5342 = vmatprep.subr.bf16.mxu0 %v5714_v24 }
0x1461   : > { %5343 = vmatpush3.bf16.msra.mxu0 %v5714_v24 }
0x1462   : > { %5344 = vmatprep.subr.bf16.mxu0 %v5716_v25 }
0x1465   : > { %5345 = vmatpush3.bf16.msra.mxu0 %v5716_v25 }
0x1466   : > { %5346 = vmatprep.subr.bf16.mxu0 %v5718_v26 }
0x1469   : > { %5347 = vmatpush3.bf16.msra.mxu0 %v5718_v26 }
0x146a   : > { %5348 = vmatprep.subr.bf16.mxu0 %v5720_v27 }
0x146d   : > { %5349 = vmatpush3.bf16.msra.mxu0 %v5720_v27 }
0x146e   : > { %5350 = vmatprep.subr.bf16.mxu0 %v5722_v28  ;;  %v5376_v3 = vpop.f32.mrb[52].mxu1 }
0x146f   : > { %v3900_v5 = vpop.f32.mrb[53].mxu1 }
0x1470   : > { %v5377_v7 = vpop.f32.mrb[54].mxu1 }
0x1471   : > { %5351 = vmatpush3.bf16.msra.mxu0 %v5722_v28  ;;  %v3903_v9 = vpop.f32.mrb[55].mxu1 }
0x1472   : > { %5352 = vmatprep.subr.bf16.mxu0 %v5724_v29 }
0x1475   : > { %5353 = vmatpush3.bf16.msra.mxu0 %v5724_v29 }
0x1478   : > { %5355 = vmatmul.mubr.bf16.vlgmr.msra.gmra.mrb[56].mxu0 %v6726_v21  ;;  %v4636_v21 = vld [vmem:[#allocation13 + $0x5] ss:$0 sm:$0xff] }
0x1479   : > { %5382 = vmatprep.mubr.msk.bf16.mxu0 %vm1185_vm0, %v3915_v39  ;;  %v3909_v4 = vadd.f32 %v5376_v3, %v4636_v21  ;;  %v3901_v6 = vadd.f32 %v4636_v21, %v3900_v5  ;;  %v3912_v8 = vadd.f32 %v5377_v7, %v4636_v21  ;;  %v3904_v10 = vadd.f32 %v4636_v21, %v3903_v9 }
0x147b   : > { %v4031_v12 = vpack.c.bf16 %v3912_v8, %v3909_v4  ;;  %v4030_v13 = vpack.c.bf16 %v3904_v10, %v3901_v6 }
0x154b   : > { %v5356_v40 = vpop.f32.mrb[56].mxu0 }
0x154c   : > { %v3797_v42 = vpop.f32.mrb[57].mxu0  ;;  %v3806_v44 = vadd.f32 %v5356_v40, %v4627_v41  ;;  %v5736_v40 = vld [vmem:[#allocation14 + $0x28] sm:$0xff]  }
0x154d   : > { %v5357_v43 = vpop.f32.mrb[58].mxu0  ;;  %v3798_v47 = vadd.f32 %v4627_v41, %v3797_v42 }
0x154e   : > { %v3809_v45 = vadd.f32 %v5357_v43, %v4627_v41  ;;  %v3800_v46 = vpop.f32.mrb[59].mxu0 }
0x154f   : > { %v3801_v48 = vadd.f32 %v4627_v41, %v3800_v46 }
0x1550   : > { %v3918_v49 = vpack.c.bf16 %v3809_v45, %v3806_v44 }
0x1551   : > { %v3917_v50 = vpack.c.bf16 %v3801_v48, %v3798_v47 }
0x1552   : > { %v3929_v52 = vsel %vm1185_vm0, %v3918_v49, 0 }
0x1553   : > { %5430 = vmatprep.subr.msk.bf16.mxu0 %vm1185_vm0, %v3917_v50  ;;  %v3926_v51 = vsel %vm1185_vm0, %v3917_v50, 0 }
0x1554   : > { %5379 = vmatpush3.bf16.xpose.msra.mxu0 %v3926_v51 }
0x1555   : > { %5431 = vmatprep.subr.msk.bf16.mxu0 %vm1185_vm0, %v3918_v49 }
0x155c   : > { %5381 = vmatpush3.bf16.xpose.msra.mxu0 %v3929_v52 }
0x155d   : > { %5386 = vmatprep.subr.bf16.mxu0 %v4030_v13 }
0x1563   : > { %5383 = vmatmul.mubr.msk.bf16.vlgmr.msra.gmra.mrb[60].mxu0 %vm1185_vm0, %v3916_v38 }
0x1564   : > { %5387 = vmatpush3.bf16.msra.mxu0 %v4030_v13 }
0x1565   : > { %5388 = vmatprep.subr.bf16.mxu0 %v4031_v12 }
0x1568   : > { %5389 = vmatpush3.bf16.msra.mxu0 %v4031_v12 }
0x1569   : > { %5394 = vmatprep.subr.bf16.mxu0 %v5736_v40 }
0x1636   : > { %v5384_v61 = vpop.f32.mrb[60].mxu0 }
0x1637   : > { %v3965_v16 = vpop.f32.mrb[61].mxu0  ;;  %v3982_v17 = vmul.f32 0.25, %v5384_v61  ;;  %v4652_v61 = vld [vmem:[#allocation16] ss:$0 sm:$0xff] }
0x1638   : > { %v3980_v19 = vmul.f32 0.25, %v3965_v16  ;;  %v5385_v20 = vpop.f32.mrb[62].mxu0 }
0x1639   : > { %v3968_v15 = vpop.f32.mrb[63].mxu0  ;;  %v3983_v63 = vmul.f32 0.25, %v5385_v20  ;;  %v3990_v1 = vsel %vm1251_vm1, %v3982_v17, -inf }
0x163a   : > { %v3981_v18 = vmul.f32 0.25, %v3968_v15  ;;  %v3984_v62 = vsel %vm1251_vm1, %v3980_v19, -inf }
0x163b   : > { %3985 = vmax.xlane.f32.xlu0 %v3984_v62  ;;  %v3993_v2 = vsel %vm1251_vm1, %v3983_v63, -inf }
0x163c   : > { %v3987_v0 = vsel %vm1251_vm1, %v3981_v18, -inf }
0x163d   : > { %3988 = vmax.xlane.f32.xlu1 %v3987_v0 }
0x163f   : > { %3991 = vmax.xlane.f32.xlu0 %v3990_v1 }
0x1641   : > { %3994 = vmax.xlane.f32.xlu1 %v3993_v2 }
0x16c8   : > { %v3986_v14 = vpop.xlane.xlu0 %3985 }
0x16c9   : > { %v3996_v22 = vsub.f32 %v3980_v19, %v3986_v14 }
0x16ca   : > { %v3989_v23 = vpop.xlane.xlu1 %3988 }
0x16cb   : > { %v4000_v24 = vmul.f32 1.442695, %v3996_v22  ;;  %v3997_v25 = vsub.f32 %v3981_v18, %v3989_v23 }
0x16cc   : > { %v3992_v26 = vpop.xlane.xlu0 %3991 }
0x16cd   : > { %5817 = vpow2.f32 %v4000_v24  ;;  %v4002_v27 = vmul.f32 1.442695, %v3997_v25  ;;  %v3998_v28 = vsub.f32 %v3982_v17, %v3992_v26 }
0x16ce   : > { %v3995_v29 = vpop.xlane.xlu1 %3994 }
0x16cf   : > { %5819 = vpow2.f32 %v4002_v27  ;;  %v4004_v11 = vmul.f32 1.442695, %v3998_v28  ;;  %v3999_v30 = vsub.f32 %v3983_v63, %v3995_v29 }
0x16d1   : > { %5821 = vpow2.f32 %v4004_v11  ;;  %v4006_v31 = vmul.f32 1.442695, %v3999_v30 }
0x16d3   : > { %5823 = vpow2.f32 %v4006_v31 }
0x16d7   : > { %v5818_v32 = vpop.eup %5817 }
0x16d8   : > { %v4008_v33 = vsel %vm1251_vm1, %v5818_v32, 0.0 }
0x16d9   : > { %v5820_v34 = vpop.eup %5819  ;;  %4009 = vadd.xlane.f32.xlu0 %v4008_v33 }
0x16da   : > { %v4011_v35 = vsel %vm1251_vm1, %v5820_v34, 0.0 }
0x16db   : > { %v5822_v36 = vpop.eup %5821  ;;  %4012 = vadd.xlane.f32.xlu1 %v4011_v35  ;;  %v4653_v35 = vld [vmem:[#allocation17] ss:$0 sm:$0xff] }
0x16dc   : > { %v4014_v37 = vsel %vm1251_vm1, %v5822_v36, 0.0 }
0x16dd   : > { %v5824_v38 = vpop.eup %5823  ;;  %4015 = vadd.xlane.f32.xlu0 %v4014_v37 }
0x16de   : > { %v4017_v39 = vsel %vm1251_vm1, %v5824_v38, 0.0 }
0x16df   : > { %4018 = vadd.xlane.f32.xlu1 %v4017_v39 }
0x1766   : > { %v4010_v41 = vpop.xlane.xlu0 %4009 }
0x1767   : > { %5825 = vrcp.f32 %v4010_v41 }
0x1768   : > { %v4013_v42 = vpop.xlane.xlu1 %4012 }
0x1769   : > { %5827 = vrcp.f32 %v4013_v42 }
0x176a   : > { %v4016_v43 = vpop.xlane.xlu0 %4015 }
0x176b   : > { %5829 = vrcp.f32 %v4016_v43 }
0x176c   : > { %v4019_v44 = vpop.xlane.xlu1 %4018 }
0x176d   : > { %5831 = vrcp.f32 %v4019_v44 }
0x1771   : > { %v5826_v45 = vpop.eup %5825 }
0x1772   : > { %v4021_v47 = vmul.f32 %v5826_v45, %v5818_v32 }
0x1773   : > { %v5828_v46 = vpop.eup %5827 }
0x1774   : > { %v4023_v48 = vmul.f32 %v5828_v46, %v5820_v34  ;;  %v5841_v46 = vld [vmem:[%s6692_s24] sm:$0xff] }
0x1775   : > { %v5830_v49 = vpop.eup %5829 }
0x1776   : > { %v4028_v50 = vpack.c.bf16 %v4023_v48, %v4021_v47  ;;  %v4025_v52 = vmul.f32 %v5830_v49, %v5822_v36 }
0x1777   : > { %v5832_v51 = vpop.eup %5831 }
0x1778   : > { %v4027_v53 = vmul.f32 %v5832_v51, %v5824_v38  ;;  %5390 = vmatprep.mubr.msk.bf16.mxu0 %vm1251_vm1, %v4028_v50  ;;  %v4654_v38 = vld [vmem:[#allocation19] ss:$0 sm:$0xff]  ;;  %v5842_v51 = vld [vmem:[%s6692_s24 + $0x8] sm:$0xff] }
0x177a   : > { %v4029_v54 = vpack.c.bf16 %v4027_v53, %v4025_v52 }
0x177c   : > { %5391 = vmatmul.mubr.msk.bf16.vlgmr.msra.gmra.mrb[64].mxu0 %vm1251_vm1, %v4029_v54 }
0x177d   : > { %5395 = vmatpush3.bf16.msra.mxu0 %v5736_v40 }
0x184f   : > { %v5392_v55 = vpop.f32.mrb[64].mxu0 }
0x1850   : > { %v4072_v56 = vpop.f32.mrb[65].mxu0 }
0x1851   : > { %v5393_v57 = vpop.f32.mrb[66].mxu0 }
0x1852   : > { %v4088_v58 = vpack.c.bf16 %v5393_v57, %v5392_v55  ;;  %v4075_v59 = vpop.f32.mrb[67].mxu0  ;;  %v5843_v55 = vld [vmem:[%s6692_s24 + $0x10] sm:$0xff] }
0x1853   : > { %v4087_v60 = vpack.c.bf16 %v4075_v59, %v4072_v56 }
0x1855   : > { %5396 = vmatprep.mubr.msk.bf16.mxu0 %vm1185_vm0, %v4087_v60 }
0x1856   : > { %5397 = vmatmul.mubr.msk.bf16.vlgmr.msra.gmra.mrb[16].mxu0 %vm1185_vm0, %v4088_v58  ;;  %v5844_v58 = vld [vmem:[%s6692_s24 + $0x18] sm:$0xff] }
0x1929   : > { %v5398_v16 = vpop.f32.mrb[16].mxu0 }
0x192a   : > { %v4135_v19 = vpop.f32.mrb[17].mxu0  ;;  %v4162_v62 = vadd.f32 %v5398_v16, %v4652_v61 }
0x192b   : > { %v4160_v20 = vadd.f32 %v4652_v61, %v4135_v19  ;;  %v5399_v15 = vpop.f32.mrb[18].mxu0 }
0x192c   : > { %v4138_v17 = vpop.f32.mrb[19].mxu0  ;;  %v4163_v63 = vadd.f32 %v5399_v15, %v4652_v61 }
0x192d   : > { %v4161_v18 = vadd.f32 %v4652_v61, %v4138_v17  ;;  %4164 = vadd.xlane.f32.xlu0 %v4160_v20 }
0x192f   : > { %4166 = vadd.xlane.f32.xlu1 %v4161_v18 }
0x1931   : > { %4168 = vadd.xlane.f32.xlu0 %v4162_v62 }
0x1933   : > { %4170 = vadd.xlane.f32.xlu1 %v4163_v63 }
0x19ba   : > { %v4165_v0 = vpop.xlane.xlu0 %4164 }
0x19bb   : > { %v4173_v1 = vmul.f32 0.0078125, %v4165_v0 }
0x19bc   : > { %v4167_v2 = vpop.xlane.xlu1 %4166 }
0x19bd   : > { %v4177_v21 = vsub.f32 %v4160_v20, %v4173_v1  ;;  %v4174_v3 = vmul.f32 0.0078125, %v4167_v2 }
0x19be   : > { %v4169_v4 = vpop.xlane.xlu0 %4168 }
0x19bf   : > { %v4178_v5 = vsub.f32 %v4161_v18, %v4174_v3  ;;  %v4175_v6 = vmul.f32 0.0078125, %v4169_v4  ;;  %v4181_v7 = vmul.f32 %v4177_v21, %v4177_v21 }
0x19c0   : > { %v4171_v8 = vpop.xlane.xlu1 %4170 }
0x19c1   : > { %v4179_v9 = vsub.f32 %v4162_v62, %v4175_v6  ;;  %v4176_v10 = vmul.f32 0.0078125, %v4171_v8  ;;  %4185 = vadd.xlane.f32.xlu0 %v4181_v7  ;;  %v4182_v12 = vmul.f32 %v4178_v5, %v4178_v5 }
0x19c3   : > { %v4180_v13 = vsub.f32 %v4163_v63, %v4176_v10  ;;  %4187 = vadd.xlane.f32.xlu1 %v4182_v12  ;;  %v4183_v14 = vmul.f32 %v4179_v9, %v4179_v9 }
0x19c5   : > { %4189 = vadd.xlane.f32.xlu0 %v4183_v14  ;;  %v4184_v22 = vmul.f32 %v4180_v13, %v4180_v13 }
0x19c7   : > { %4191 = vadd.xlane.f32.xlu1 %v4184_v22 }
0x1a4e   : > { %v4186_v23 = vpop.xlane.xlu0 %4185 }
0x1a4f   : > { %v4193_v24 = vmul.f32 0.0078125, %v4186_v23 }
0x1a50   : > { %v4188_v25 = vpop.xlane.xlu1 %4187 }
0x1a51   : > { %v4197_v26 = vadd.f32 1e-05, %v4193_v24  ;;  %v4194_v27 = vmul.f32 0.0078125, %v4188_v25 }
0x1a52   : > { %v4190_v28 = vpop.xlane.xlu0 %4189 }
0x1a53   : > { %5833 = vrsqrt.f32 %v4197_v26  ;;  %v4198_v29 = vadd.f32 1e-05, %v4194_v27  ;;  %v4195_v11 = vmul.f32 0.0078125, %v4190_v28 }
0x1a54   : > { %v4192_v30 = vpop.xlane.xlu1 %4191 }
0x1a55   : > { %5835 = vrsqrt.f32 %v4198_v29  ;;  %v4199_v31 = vadd.f32 1e-05, %v4195_v11  ;;  %v4196_v32 = vmul.f32 0.0078125, %v4192_v30 }
0x1a57   : > { %5837 = vrsqrt.f32 %v4199_v31  ;;  %v4200_v33 = vadd.f32 1e-05, %v4196_v32 }
0x1a59   : > { %5839 = vrsqrt.f32 %v4200_v33 }
0x1a5d   : > { %v5834_v34 = vpop.eup %5833 }
0x1a5e   : > { %v4205_v36 = vmul.f32 %v5834_v34, %v4177_v21 }
0x1a5f   : > { %v5836_v37 = vpop.eup %5835 }
0x1a60   : > { %v4215_v39 = vmul.f32 %v4653_v35, %v4205_v36  ;;  %v4206_v40 = vmul.f32 %v5836_v37, %v4178_v5 }
0x1a61   : > { %v5838_v41 = vpop.eup %5837 }
0x1a62   : > { %v4225_v42 = vadd.f32 %v4654_v38, %v4215_v39  ;;  %v4216_v43 = vmul.f32 %v4653_v35, %v4206_v40  ;;  %v4207_v44 = vmul.f32 %v5838_v41, %v4179_v9 }
0x1a63   : > { %v5840_v45 = vpop.eup %5839 }
0x1a64   : > { %v4229_v47 = vadd.f32 %v5841_v46, %v4225_v42  ;;  %v4226_v48 = vadd.f32 %v4654_v38, %v4216_v43  ;;  %v4217_v49 = vmul.f32 %v4653_v35, %v4207_v44  ;;  %v4208_v50 = vmul.f32 %v5840_v45, %v4180_v13 }
0x1a66   : > { %4233 = vst [vmem:[%s543_s13] sm:$0xff] %v4229_v47  ;;  %v4230_v52 = vadd.f32 %v5842_v51, %v4226_v48  ;;  %v4227_v53 = vadd.f32 %v4654_v38, %v4217_v49  ;;  %v4218_v54 = vmul.f32 %v4653_v35, %v4208_v50 }
0x1a68   : > { %4234 = vst [vmem:[%s543_s13 + $0x8] sm:$0xff] %v4230_v52  ;;  %v4231_v56 = vadd.f32 %v5843_v55, %v4227_v53  ;;  %v4228_v57 = vadd.f32 %v4654_v38, %v4218_v54 }
0x1a6a   : > { %4235 = vst [vmem:[%s543_s13 + $0x10] sm:$0xff] %v4231_v56  ;;  %v4232_v59 = vadd.f32 %v5844_v58, %v4228_v57 }
0x1a6c   : > { %4236 = vst [vmem:[%s543_s13 + $0x18] sm:$0xff] %v4232_v59 }
0x1a6d   : > { %6168 = shalt.err (!%p6165_p3)
}
0x1a6e   : > { %s6169_s24 = scalar_lea.hbm %s6897_s12, 512  ;;  %s6173_s1 = scalar_lea.hbm %s6989_s14, 1024 }
0x1a6f   : > { %p6170_p5 = scmp.ne.s32.totalorder %s6897_s12, %s6169_s24  ;;  %p6174_p9 = scmp.lt.u32.totalorder %s6897_s12, %s6989_s14 }
0x1a70   : > { %p6175_p12 = scmp.lt.u32.totalorder %s6173_s1, %s6169_s24  ;;  %p6177_p13 = scmp.lt.u32.totalorder %s6169_s24, %s6897_s12 }
0x1a71   : > { %p6171_p7 = pnand %p6170_p5, %p6990_p0 }
0x1a72   : > { %p6176_p1 = por %p6175_p12, %p6174_p9 }
0x1a73   : > { %p6172_p6 = pneg %p6171_p7 }
0x1a74   : > { %p6178_p2 = por %p6177_p13, %p6176_p1 }
0x1a76   : > { %p6179_p8 = pnand %p6178_p2, %p6172_p6 }
0x1a78   : > { %6182 = shalt.err (!%p6179_p8)
}
0x1a79   : > { %s6261_s22 = smov 128   ;;  %s6262_s26 = smov 8  }
0x1a7a   : > { %5474 = dma.vmem_to_hbm [thread:$0]  (%p6990_p0), %s6899_s27, 512, %s6897_s12, %s4238_s23, %s6261_s22, %s6261_s22, %s6262_s26  }
0x1a7b PF: > { %s4266_s13 = sand.u32 1, %s6229_s17   ;;  %p6991_p4 = scmp.ne.s32.totalorder %s6974_s21, 0 }
0x1a7c   : > { %p6992_p10 = scmp.ge.s32.totalorder %s6241_s20, 2  ;;  %s4267_s24 = scalar_lea.sflag [#allocation4], %s4266_s13 }
0x1a7e   : > { %p5512_p11 = pnand %p6992_p10, %p6991_p4 }
0x1a80   : > { %6224 = dma.done.wait (!%p5512_p11), %s4267_s24, 512  }
0x1a81   : > { %6226 = vsyncadd (!%p5512_p11), %s4267_s24, 4294966784  ;;  %p29_p3 = scmp.ge.s32.totalorder %s6607_s16, 4   ;;  %s6993_s17 = smov %s6233_s18 }
0x1a82   : > { %s6994_s18 = smov %s6237_s19  ;;  %s6995_s19 = smov %s6618_s30 }
0x1a83   : > { %s6996_s20 = smov %s6607_s16  ;;  %31 = sbr.rel (!%p29_p3) target bundleno = 14 (0xe), region = 149 }
0x1a8a   :  { %4272 = vsyncpa [#allocation3], 1 }
0x1a8b   :  { %4274 = vsyncpa [#allocation3 + $0x1], 1 }
0x1a8c   :  { %4275 = vsyncpa [#allocation6], 1 }
0x1a8d   :  { %4276 = vsyncpa [#allocation9], 1 }
0x1a8e   :  { %4277 = vsyncpa [#allocation12], 1 }
0x1a8f   :  { %4278 = vsyncpa [#allocation15], 1 }
0x1a90   :  { %4279 = vsyncpa [#allocation18], 1 }
0x1a91   :  { %4280 = vsyncpa [#allocation4], 1 }
0x1a92   :  { %4282 = vsyncpa [#allocation4 + $0x1], 1 }

</bundles_post_ra>
